<compile_context>
chip_gen: v6e
topology: v6e:2x2x1
jax: 0.10.0
libtpu: 0.0.40
codegen_flags: <defaults>
</compile_context>

<pallas_src>
import math

import numpy as np
import jax
import jax.numpy as jnp
from jax.experimental import pallas as pl
from jax.experimental.pallas import tpu as pltpu

SUBLANES = 8
LANES = 128


def _round_up(x, m):
    return ((x + m - 1) // m) * m


def _choose_tile(B):
    """Queries per grid step (multiple of 8*128) and padded batch size."""
    qmin = SUBLANES * LANES          # 1024 queries = one (8, 128) tile
    qmax = SUBLANES * 1024           # 8192 queries per step (v6e payload target)
    b = max(int(B), 1)
    bp_min = _round_up(b, qmin)
    # at least 2 grid steps when there is enough work (v7x has 2 TensorCores)
    half = _round_up((bp_min + 1) // 2, qmin)
    tbq = max(qmin, min(qmax, half))
    bp = _round_up(b, tbq)
    return tbq, bp


def _make_kernel(N, order, d, L):
    K_pos = (order + 1) * d
    K_der = order * d
    K_cp = K_pos + K_der

    def kernel(xstart_ref, invdx_ref, xend_ref, table_ref, s_ref, out_ref, idx_ref):
        # s_ref block: (8, L) f32 -- queries packed on sublanes + lanes.
        s = s_ref[...]
        xend = xend_ref[0]

        # torch-style float modulo (result sign follows divisor)
        s_true = s - xend * jnp.floor(s / xend)

        # --- fused bucket search + exact per-segment gather -----------------
        # xstart is ascending, so a monotone where-chain over j ends up holding
        # column idx = clip(#(xstart_j <= s_true) - 1, 0, N-1) for every field.
        idx = jnp.zeros(s.shape, jnp.int32)
        xstart_sel = xstart_ref[0]
        invdx_sel = invdx_ref[0]
        g = [table_ref[r * N + 0] for r in range(K_cp)]
        for j in range(1, N):
            m = s_true >= xstart_ref[j]                  # (8, L) bool, full vregs
            idx = idx + m.astype(jnp.int32)
            xstart_sel = jnp.where(m, xstart_ref[j], xstart_sel)
            invdx_sel = jnp.where(m, invdx_ref[j], invdx_sel)
            for r in range(K_cp):
                g[r] = jnp.where(m, table_ref[r * N + j], g[r])

        # --- Bernstein evaluation (binomials folded into the table) ---------
        t = (s_true - xstart_sel) * invdx_sel
        omt = 1.0 - t

        t_pows = [jnp.ones_like(t)]
        o_pows = [jnp.ones_like(t)]
        for _ in range(order):
            t_pows.append(t_pows[-1] * t)
            o_pows.append(o_pows[-1] * omt)

        basis_pos = [t_pows[k] * o_pows[order - k] for k in range(order + 1)]
        basis_der = [t_pows[k] * o_pows[order - 1 - k] for k in range(order)]

        # Fused output slab: rows [pos dim0 | pos dim1 | ... | der dim0 | ...],
        # each field is a dense 8-sublane-aligned (8, L) block.
        for dim in range(d):
            p = basis_pos[0] * g[dim]
            for k in range(1, order + 1):
                p = p + basis_pos[k] * g[k * d + dim]
            out_ref[dim * SUBLANES:(dim + 1) * SUBLANES, :] = p

            v = basis_der[0] * g[K_pos + dim]
            for k in range(1, order):
                v = v + basis_der[k] * g[K_pos + k * d + dim]
            out_ref[(d + dim) * SUBLANES:(d + dim + 1) * SUBLANES, :] = v

        idx_ref[...] = idx

    return kernel


def composite_bezier_eval_pallas(s_flat, xstart, inv_dx, xend, table_flat, order, d):
    """Evaluate composite Bezier curve (+ analytic derivative) at s_flat."""
    B = int(s_flat.shape[0])
    N = int(xstart.shape[0])
    TBq, Bp = _choose_tile(B)
    L = TBq // SUBLANES
    G = Bp // TBq
    out_rows = 2 * d * SUBLANES

    s_pad = jnp.pad(s_flat.astype(jnp.float32), (0, Bp - B))
    s2 = s_pad.reshape(G * SUBLANES, L)            # query q = g*8L + sub*L + lane

    kernel = _make_kernel(N, order, d, L)

    grid_spec = pltpu.PrefetchScalarGridSpec(
        num_scalar_prefetch=4,                     # xstart, 1/dx, xend, table -> SMEM
        grid=(G,),
        in_specs=[pl.BlockSpec((SUBLANES, L), lambda i, *_: (i, 0))],
        out_specs=(
            pl.BlockSpec((out_rows, L), lambda i, *_: (i, 0)),
            pl.BlockSpec((SUBLANES, L), lambda i, *_: (i, 0)),
        ),
    )

    slab, idx = pl.pallas_call(
        kernel,
        grid_spec=grid_spec,
        out_shape=(jax.ShapeDtypeStruct((G * out_rows, L), jnp.float32),
                   jax.ShapeDtypeStruct((G * SUBLANES, L), jnp.int32)),
        compiler_params=pltpu.CompilerParams(
            dimension_semantics=("parallel",)),
    )(xstart.astype(jnp.float32),
      inv_dx.astype(jnp.float32),
      jnp.asarray(xend, jnp.float32).reshape(1),
      table_flat.astype(jnp.float32),
      s2)

    slab = slab.reshape(G, 2 * d, SUBLANES, L)
    pos = slab[:, :d].transpose(0, 2, 3, 1).reshape(Bp, d)[:B]
    der = slab[:, d:].transpose(0, 2, 3, 1).reshape(Bp, d)[:B]
    idxb = idx.reshape(Bp)[:B]
    return pos, der, idxb


class SimplePathHelperJAX:
    """JAX/Pallas port of SimplePathHelper (forward pass)."""

    def __init__(self, arclengths, curve_control_points, dr_samp):
        arclengths = jnp.asarray(arclengths, jnp.float32)
        cp = jnp.asarray(curve_control_points, jnp.float32)
        N, kp1, d = cp.shape
        self.order = kp1 - 1
        self.d = d
        self.N = N
        self.arclengths = arclengths
        self.control_points = cp
        self.xstart = arclengths[:-1]
        self.xend = arclengths[-1]
        self.dx = arclengths[1:] - arclengths[:-1]
        if not bool(jnp.all(self.dx > 0)):
            raise ValueError("x values must be in ascending order")
        self.inv_dx = 1.0 / self.dx

        order = self.order
        # derivative control points: order * (cp[:,1:] - cp[:,:-1]) / dx
        self.cp_deriv = (order * (cp[:, 1:] - cp[:, :-1])
                         / self.dx[:, None, None])

        # Fused per-segment control-point table (K_cp, N) flattened to 1D for
        # SMEM scalar prefetch.  Binomial coefficients folded in host-side.
        binom_pos = jnp.asarray([math.comb(order, k) for k in range(order + 1)],
                                jnp.float32)
        binom_der = jnp.asarray([math.comb(order - 1, k) for k in range(order)],
                                jnp.float32)
        cp_scaled = cp * binom_pos[None, :, None]                  # (N, order+1, d)
        cpd_scaled = self.cp_deriv * binom_der[None, :, None]      # (N, order, d)
        table = jnp.concatenate(
            [cp_scaled.reshape(N, (order + 1) * d).T,              # row k*d+dim
             cpd_scaled.reshape(N, order * d).T], axis=0)          # row K_pos+k*d+dim
        self.table_flat = table.reshape(-1)                        # index r*N + j

        # __init__-time sampled path (same kernel used for the evaluation)
        self.r_samp = jnp.arange(float(arclengths[0]), float(arclengths[-1]),
                                 dr_samp, dtype=jnp.float32)
        pos, der, _ = composite_bezier_eval_pallas(
            self.r_samp, self.xstart, self.inv_dx, self.xend, self.table_flat,
            self.order, self.d)
        self.points_samp = pos
        tangents = der / jnp.linalg.norm(der, axis=-1, keepdims=True)
        self.tangents_samp = tangents
        # normals = tangents[:, [1,0]]; normals[:,0] *= -1  ->  (-ty, tx)
        self.normals_samp = jnp.stack([-tangents[:, 1], tangents[:, 0]], axis=-1)
        # TODO(synk): kd-tree based closest_point* / y_axis_intersection
        # (bezierPolyRoots, torchaudio convolve) are not part of forward and
        # are not translated.

    def forward(self, s, deriv=False, idxbuckets=None):
        # idxbuckets (when given) only skips the bucket search in torch; the
        # kernel's fused single-pass search recomputes them at no extra cost,
        # producing identical results.
        s = jnp.asarray(s, jnp.float32)
        s_flat = s.reshape(-1)
        pos, der, idx = composite_bezier_eval_pallas(
            s_flat, self.xstart, self.inv_dx, self.xend, self.table_flat,
            self.order, self.d)
        positions = pos.reshape(s.shape + (self.d,))
        idxbuckets_out = idx.reshape(s.shape)
        derivs = der.reshape(s.shape + (self.d,)) if deriv else None
        return positions, derivs, idxbuckets_out


def _reference(s, arclengths, cp, order, d):
    """Numpy reference of SimplePathHelper.forward(s, deriv=True).

    Modulo/bucket decisions are mirrored in float32 (matching the kernel);
    the Bernstein evaluation itself is done in float64.
    """
    s32 = np.asarray(s, np.float32).reshape(-1)
    arc32 = np.asarray(arclengths, np.float32)
    xend32 = arc32[-1]
    s_true = (s32 - xend32 * np.floor(s32 / xend32)).astype(np.float32)
    xstart32 = arc32[:-1]
    idx = np.clip((s_true[:, None] >= xstart32[None, :]).sum(axis=1) - 1,
                  0, len(xstart32) - 1)

    arclengths = np.asarray(arclengths, np.float64)
    cp = np.asarray(cp, np.float64)
    xstart = arclengths[:-1]
    dx = np.diff(arclengths)
    cpd = order * (cp[:, 1:] - cp[:, :-1]) / dx[:, None, None]
    t = (s_true.astype(np.float64) - xstart[idx]) / dx[idx]
    pos = np.zeros((len(s32), d))
    der = np.zeros((len(s32), d))
    for k in range(order + 1):
        b = math.comb(order, k) * t ** k * (1.0 - t) ** (order - k)
        pos += b[:, None] * cp[idx, k]
    for k in range(order):
        b = math.comb(order - 1, k) * t ** k * (1.0 - t) ** (order - 1 - k)
        der += b[:, None] * cpd[idx, k]
    return pos, der, idx


if __name__ == "__main__":
    key = jax.random.PRNGKey(0)
    k1, k2, k3, k4 = jax.random.split(key, 4)

    N_seg, order, d = 16, 3, 2
    seg_lens = 0.5 + jax.random.uniform(k1, (N_seg,), dtype=jnp.float32)
    arclengths = jnp.concatenate(
        [jnp.zeros((1,), jnp.float32), jnp.cumsum(seg_lens)])
    curve_control_points = jax.random.normal(
        k2, (N_seg, order + 1, d), dtype=jnp.float32)
    dr_samp = 0.25

    helper = SimplePathHelperJAX(arclengths, curve_control_points, dr_samp)
    total_len = float(arclengths[-1])

    def check(s):
        positions, derivs, idxbuckets = helper.forward(s, deriv=True)
        jax.block_until_ready((positions, derivs, idxbuckets))
        ref_pos, ref_der, ref_idx = _reference(
            s, arclengths, curve_control_points, order, d)
        np.testing.assert_allclose(np.asarray(positions).reshape(-1, d),
                                   ref_pos, rtol=1e-4, atol=1e-4)
        np.testing.assert_allclose(np.asarray(derivs).reshape(-1, d),
                                   ref_der, rtol=1e-4, atol=1e-4)
        np.testing.assert_array_equal(np.asarray(idxbuckets).reshape(-1),
                                      ref_idx)
        assert positions.shape == s.shape + (d,)
        assert derivs.shape == s.shape + (d,)
        assert idxbuckets.shape == s.shape

    # small batch (single grid step, single (8,128) tile)
    s_small = jax.random.uniform(k3, (2, 8), dtype=jnp.float32,
                                 minval=0.0, maxval=1.5 * total_len)
    check(s_small)

    # larger batch (exercises padding + multi-step parallel grid + negatives)
    s_large = jax.random.uniform(k4, (3, 1000), dtype=jnp.float32,
                                 minval=-0.5 * total_len, maxval=1.5 * total_len)
    check(s_large)

    print("KERNEL_OK")
</pallas_src>

<mosaic_0001>
module attributes {stable_mosaic.version = 11 : i64} {
  func.func @kernel(%arg0: i32, %arg1: memref<16xf32, #tpu.memory_space<smem>>, %arg2: memref<16xf32, #tpu.memory_space<smem>>, %arg3: memref<1xf32, #tpu.memory_space<smem>>, %arg4: memref<224xf32, #tpu.memory_space<smem>>, %arg5: memref<8x128xf32, #tpu.memory_space<vmem>>, %arg6: memref<32x128xf32, #tpu.memory_space<vmem>>, %arg7: memref<8x128xi32, #tpu.memory_space<vmem>>) attributes {dimension_semantics = [#tpu.dimension_semantics<parallel>], iteration_bounds = array<i64: 1>, scalar_prefetch = 4 : i64, scratch_operands = 0 : i64, tpu.core_type = #tpu.core_type<tc>, window_params = [{transform_indices = @transform_0, window_bounds = array<i64: 8, 128>}, {transform_indices = @transform_1, window_bounds = array<i64: 32, 128>}, {transform_indices = @transform_2, window_bounds = array<i64: 8, 128>}]} {
    %c0 = arith.constant 0 : index
    %c0_0 = arith.constant 0 : index
    %0 = vector.load %arg5[%c0, %c0_0] : memref<8x128xf32, #tpu.memory_space<vmem>>, vector<8x128xf32>
    %c0_1 = arith.constant 0 : index
    %1 = memref.load %arg3[%c0_1] : memref<1xf32, #tpu.memory_space<smem>>
    %2 = vector.broadcast %1 : f32 to vector<8x128xf32>
    %3 = arith.divf %0, %2 : vector<8x128xf32>
    %4 = math.floor %3 : vector<8x128xf32>
    %5 = vector.broadcast %1 : f32 to vector<8x128xf32>
    %6 = arith.mulf %5, %4 : vector<8x128xf32>
    %7 = arith.subf %0, %6 : vector<8x128xf32>
    %c0_i32 = arith.constant 0 : i32
    %8 = vector.broadcast %c0_i32 : i32 to vector<8x128xi32>
    %c0_2 = arith.constant 0 : index
    %9 = memref.load %arg1[%c0_2] : memref<16xf32, #tpu.memory_space<smem>>
    %c0_3 = arith.constant 0 : index
    %10 = memref.load %arg2[%c0_3] : memref<16xf32, #tpu.memory_space<smem>>
    %c0_4 = arith.constant 0 : index
    %11 = memref.load %arg4[%c0_4] : memref<224xf32, #tpu.memory_space<smem>>
    %c16 = arith.constant 16 : index
    %12 = memref.load %arg4[%c16] : memref<224xf32, #tpu.memory_space<smem>>
    %c32 = arith.constant 32 : index
    %13 = memref.load %arg4[%c32] : memref<224xf32, #tpu.memory_space<smem>>
    %c48 = arith.constant 48 : index
    %14 = memref.load %arg4[%c48] : memref<224xf32, #tpu.memory_space<smem>>
    %c64 = arith.constant 64 : index
    %15 = memref.load %arg4[%c64] : memref<224xf32, #tpu.memory_space<smem>>
    %c80 = arith.constant 80 : index
    %16 = memref.load %arg4[%c80] : memref<224xf32, #tpu.memory_space<smem>>
    %c96 = arith.constant 96 : index
    %17 = memref.load %arg4[%c96] : memref<224xf32, #tpu.memory_space<smem>>
    %c112 = arith.constant 112 : index
    %18 = memref.load %arg4[%c112] : memref<224xf32, #tpu.memory_space<smem>>
    %c128 = arith.constant 128 : index
    %19 = memref.load %arg4[%c128] : memref<224xf32, #tpu.memory_space<smem>>
    %c144 = arith.constant 144 : index
    %20 = memref.load %arg4[%c144] : memref<224xf32, #tpu.memory_space<smem>>
    %c160 = arith.constant 160 : index
    %21 = memref.load %arg4[%c160] : memref<224xf32, #tpu.memory_space<smem>>
    %c176 = arith.constant 176 : index
    %22 = memref.load %arg4[%c176] : memref<224xf32, #tpu.memory_space<smem>>
    %c192 = arith.constant 192 : index
    %23 = memref.load %arg4[%c192] : memref<224xf32, #tpu.memory_space<smem>>
    %c208 = arith.constant 208 : index
    %24 = memref.load %arg4[%c208] : memref<224xf32, #tpu.memory_space<smem>>
    %c1 = arith.constant 1 : index
    %25 = memref.load %arg1[%c1] : memref<16xf32, #tpu.memory_space<smem>>
    %26 = vector.broadcast %25 : f32 to vector<8x128xf32>
    %27 = arith.cmpf oge, %7, %26 : vector<8x128xf32>
    %28 = arith.extui %27 : vector<8x128xi1> to vector<8x128xi32>
    %29 = arith.addi %8, %28 : vector<8x128xi32>
    %c1_5 = arith.constant 1 : index
    %30 = memref.load %arg1[%c1_5] : memref<16xf32, #tpu.memory_space<smem>>
    %31 = vector.broadcast %30 : f32 to vector<8x128xf32>
    %32 = vector.broadcast %9 : f32 to vector<8x128xf32>
    %33 = arith.select %27, %31, %32 : vector<8x128xi1>, vector<8x128xf32>
    %c1_6 = arith.constant 1 : index
    %34 = memref.load %arg2[%c1_6] : memref<16xf32, #tpu.memory_space<smem>>
    %35 = vector.broadcast %34 : f32 to vector<8x128xf32>
    %36 = vector.broadcast %10 : f32 to vector<8x128xf32>
    %37 = arith.select %27, %35, %36 : vector<8x128xi1>, vector<8x128xf32>
    %c1_7 = arith.constant 1 : index
    %38 = memref.load %arg4[%c1_7] : memref<224xf32, #tpu.memory_space<smem>>
    %39 = vector.broadcast %38 : f32 to vector<8x128xf32>
    %40 = vector.broadcast %11 : f32 to vector<8x128xf32>
    %41 = arith.select %27, %39, %40 : vector<8x128xi1>, vector<8x128xf32>
    %c17 = arith.constant 17 : index
    %42 = memref.load %arg4[%c17] : memref<224xf32, #tpu.memory_space<smem>>
    %43 = vector.broadcast %42 : f32 to vector<8x128xf32>
    %44 = vector.broadcast %12 : f32 to vector<8x128xf32>
    %45 = arith.select %27, %43, %44 : vector<8x128xi1>, vector<8x128xf32>
    %c33 = arith.constant 33 : index
    %46 = memref.load %arg4[%c33] : memref<224xf32, #tpu.memory_space<smem>>
    %47 = vector.broadcast %46 : f32 to vector<8x128xf32>
    %48 = vector.broadcast %13 : f32 to vector<8x128xf32>
    %49 = arith.select %27, %47, %48 : vector<8x128xi1>, vector<8x128xf32>
    %c49 = arith.constant 49 : index
    %50 = memref.load %arg4[%c49] : memref<224xf32, #tpu.memory_space<smem>>
    %51 = vector.broadcast %50 : f32 to vector<8x128xf32>
    %52 = vector.broadcast %14 : f32 to vector<8x128xf32>
    %53 = arith.select %27, %51, %52 : vector<8x128xi1>, vector<8x128xf32>
    %c65 = arith.constant 65 : index
    %54 = memref.load %arg4[%c65] : memref<224xf32, #tpu.memory_space<smem>>
    %55 = vector.broadcast %54 : f32 to vector<8x128xf32>
    %56 = vector.broadcast %15 : f32 to vector<8x128xf32>
    %57 = arith.select %27, %55, %56 : vector<8x128xi1>, vector<8x128xf32>
    %c81 = arith.constant 81 : index
    %58 = memref.load %arg4[%c81] : memref<224xf32, #tpu.memory_space<smem>>
    %59 = vector.broadcast %58 : f32 to vector<8x128xf32>
    %60 = vector.broadcast %16 : f32 to vector<8x128xf32>
    %61 = arith.select %27, %59, %60 : vector<8x128xi1>, vector<8x128xf32>
    %c97 = arith.constant 97 : index
    %62 = memref.load %arg4[%c97] : memref<224xf32, #tpu.memory_space<smem>>
    %63 = vector.broadcast %62 : f32 to vector<8x128xf32>
    %64 = vector.broadcast %17 : f32 to vector<8x128xf32>
    %65 = arith.select %27, %63, %64 : vector<8x128xi1>, vector<8x128xf32>
    %c113 = arith.constant 113 : index
    %66 = memref.load %arg4[%c113] : memref<224xf32, #tpu.memory_space<smem>>
    %67 = vector.broadcast %66 : f32 to vector<8x128xf32>
    %68 = vector.broadcast %18 : f32 to vector<8x128xf32>
    %69 = arith.select %27, %67, %68 : vector<8x128xi1>, vector<8x128xf32>
    %c129 = arith.constant 129 : index
    %70 = memref.load %arg4[%c129] : memref<224xf32, #tpu.memory_space<smem>>
    %71 = vector.broadcast %70 : f32 to vector<8x128xf32>
    %72 = vector.broadcast %19 : f32 to vector<8x128xf32>
    %73 = arith.select %27, %71, %72 : vector<8x128xi1>, vector<8x128xf32>
    %c145 = arith.constant 145 : index
    %74 = memref.load %arg4[%c145] : memref<224xf32, #tpu.memory_space<smem>>
    %75 = vector.broadcast %74 : f32 to vector<8x128xf32>
    %76 = vector.broadcast %20 : f32 to vector<8x128xf32>
    %77 = arith.select %27, %75, %76 : vector<8x128xi1>, vector<8x128xf32>
    %c161 = arith.constant 161 : index
    %78 = memref.load %arg4[%c161] : memref<224xf32, #tpu.memory_space<smem>>
    %79 = vector.broadcast %78 : f32 to vector<8x128xf32>
    %80 = vector.broadcast %21 : f32 to vector<8x128xf32>
    %81 = arith.select %27, %79, %80 : vector<8x128xi1>, vector<8x128xf32>
    %c177 = arith.constant 177 : index
    %82 = memref.load %arg4[%c177] : memref<224xf32, #tpu.memory_space<smem>>
    %83 = vector.broadcast %82 : f32 to vector<8x128xf32>
    %84 = vector.broadcast %22 : f32 to vector<8x128xf32>
    %85 = arith.select %27, %83, %84 : vector<8x128xi1>, vector<8x128xf32>
    %c193 = arith.constant 193 : index
    %86 = memref.load %arg4[%c193] : memref<224xf32, #tpu.memory_space<smem>>
    %87 = vector.broadcast %86 : f32 to vector<8x128xf32>
    %88 = vector.broadcast %23 : f32 to vector<8x128xf32>
    %89 = arith.select %27, %87, %88 : vector<8x128xi1>, vector<8x128xf32>
    %c209 = arith.constant 209 : index
    %90 = memref.load %arg4[%c209] : memref<224xf32, #tpu.memory_space<smem>>
    %91 = vector.broadcast %90 : f32 to vector<8x128xf32>
    %92 = vector.broadcast %24 : f32 to vector<8x128xf32>
    %93 = arith.select %27, %91, %92 : vector<8x128xi1>, vector<8x128xf32>
    %c2 = arith.constant 2 : index
    %94 = memref.load %arg1[%c2] : memref<16xf32, #tpu.memory_space<smem>>
    %95 = vector.broadcast %94 : f32 to vector<8x128xf32>
    %96 = arith.cmpf oge, %7, %95 : vector<8x128xf32>
    %97 = arith.extui %96 : vector<8x128xi1> to vector<8x128xi32>
    %98 = arith.addi %29, %97 : vector<8x128xi32>
    %c2_8 = arith.constant 2 : index
    %99 = memref.load %arg1[%c2_8] : memref<16xf32, #tpu.memory_space<smem>>
    %100 = vector.broadcast %99 : f32 to vector<8x128xf32>
    %101 = arith.select %96, %100, %33 : vector<8x128xi1>, vector<8x128xf32>
    %c2_9 = arith.constant 2 : index
    %102 = memref.load %arg2[%c2_9] : memref<16xf32, #tpu.memory_space<smem>>
    %103 = vector.broadcast %102 : f32 to vector<8x128xf32>
    %104 = arith.select %96, %103, %37 : vector<8x128xi1>, vector<8x128xf32>
    %c2_10 = arith.constant 2 : index
    %105 = memref.load %arg4[%c2_10] : memref<224xf32, #tpu.memory_space<smem>>
    %106 = vector.broadcast %105 : f32 to vector<8x128xf32>
    %107 = arith.select %96, %106, %41 : vector<8x128xi1>, vector<8x128xf32>
    %c18 = arith.constant 18 : index
    %108 = memref.load %arg4[%c18] : memref<224xf32, #tpu.memory_space<smem>>
    %109 = vector.broadcast %108 : f32 to vector<8x128xf32>
    %110 = arith.select %96, %109, %45 : vector<8x128xi1>, vector<8x128xf32>
    %c34 = arith.constant 34 : index
    %111 = memref.load %arg4[%c34] : memref<224xf32, #tpu.memory_space<smem>>
    %112 = vector.broadcast %111 : f32 to vector<8x128xf32>
    %113 = arith.select %96, %112, %49 : vector<8x128xi1>, vector<8x128xf32>
    %c50 = arith.constant 50 : index
    %114 = memref.load %arg4[%c50] : memref<224xf32, #tpu.memory_space<smem>>
    %115 = vector.broadcast %114 : f32 to vector<8x128xf32>
    %116 = arith.select %96, %115, %53 : vector<8x128xi1>, vector<8x128xf32>
    %c66 = arith.constant 66 : index
    %117 = memref.load %arg4[%c66] : memref<224xf32, #tpu.memory_space<smem>>
    %118 = vector.broadcast %117 : f32 to vector<8x128xf32>
    %119 = arith.select %96, %118, %57 : vector<8x128xi1>, vector<8x128xf32>
    %c82 = arith.constant 82 : index
    %120 = memref.load %arg4[%c82] : memref<224xf32, #tpu.memory_space<smem>>
    %121 = vector.broadcast %120 : f32 to vector<8x128xf32>
    %122 = arith.select %96, %121, %61 : vector<8x128xi1>, vector<8x128xf32>
    %c98 = arith.constant 98 : index
    %123 = memref.load %arg4[%c98] : memref<224xf32, #tpu.memory_space<smem>>
    %124 = vector.broadcast %123 : f32 to vector<8x128xf32>
    %125 = arith.select %96, %124, %65 : vector<8x128xi1>, vector<8x128xf32>
    %c114 = arith.constant 114 : index
    %126 = memref.load %arg4[%c114] : memref<224xf32, #tpu.memory_space<smem>>
    %127 = vector.broadcast %126 : f32 to vector<8x128xf32>
    %128 = arith.select %96, %127, %69 : vector<8x128xi1>, vector<8x128xf32>
    %c130 = arith.constant 130 : index
    %129 = memref.load %arg4[%c130] : memref<224xf32, #tpu.memory_space<smem>>
    %130 = vector.broadcast %129 : f32 to vector<8x128xf32>
    %131 = arith.select %96, %130, %73 : vector<8x128xi1>, vector<8x128xf32>
    %c146 = arith.constant 146 : index
    %132 = memref.load %arg4[%c146] : memref<224xf32, #tpu.memory_space<smem>>
    %133 = vector.broadcast %132 : f32 to vector<8x128xf32>
    %134 = arith.select %96, %133, %77 : vector<8x128xi1>, vector<8x128xf32>
    %c162 = arith.constant 162 : index
    %135 = memref.load %arg4[%c162] : memref<224xf32, #tpu.memory_space<smem>>
    %136 = vector.broadcast %135 : f32 to vector<8x128xf32>
    %137 = arith.select %96, %136, %81 : vector<8x128xi1>, vector<8x128xf32>
    %c178 = arith.constant 178 : index
    %138 = memref.load %arg4[%c178] : memref<224xf32, #tpu.memory_space<smem>>
    %139 = vector.broadcast %138 : f32 to vector<8x128xf32>
    %140 = arith.select %96, %139, %85 : vector<8x128xi1>, vector<8x128xf32>
    %c194 = arith.constant 194 : index
    %141 = memref.load %arg4[%c194] : memref<224xf32, #tpu.memory_space<smem>>
    %142 = vector.broadcast %141 : f32 to vector<8x128xf32>
    %143 = arith.select %96, %142, %89 : vector<8x128xi1>, vector<8x128xf32>
    %c210 = arith.constant 210 : index
    %144 = memref.load %arg4[%c210] : memref<224xf32, #tpu.memory_space<smem>>
    %145 = vector.broadcast %144 : f32 to vector<8x128xf32>
    %146 = arith.select %96, %145, %93 : vector<8x128xi1>, vector<8x128xf32>
    %c3 = arith.constant 3 : index
    %147 = memref.load %arg1[%c3] : memref<16xf32, #tpu.memory_space<smem>>
    %148 = vector.broadcast %147 : f32 to vector<8x128xf32>
    %149 = arith.cmpf oge, %7, %148 : vector<8x128xf32>
    %150 = arith.extui %149 : vector<8x128xi1> to vector<8x128xi32>
    %151 = arith.addi %98, %150 : vector<8x128xi32>
    %c3_11 = arith.constant 3 : index
    %152 = memref.load %arg1[%c3_11] : memref<16xf32, #tpu.memory_space<smem>>
    %153 = vector.broadcast %152 : f32 to vector<8x128xf32>
    %154 = arith.select %149, %153, %101 : vector<8x128xi1>, vector<8x128xf32>
    %c3_12 = arith.constant 3 : index
    %155 = memref.load %arg2[%c3_12] : memref<16xf32, #tpu.memory_space<smem>>
    %156 = vector.broadcast %155 : f32 to vector<8x128xf32>
    %157 = arith.select %149, %156, %104 : vector<8x128xi1>, vector<8x128xf32>
    %c3_13 = arith.constant 3 : index
    %158 = memref.load %arg4[%c3_13] : memref<224xf32, #tpu.memory_space<smem>>
    %159 = vector.broadcast %158 : f32 to vector<8x128xf32>
    %160 = arith.select %149, %159, %107 : vector<8x128xi1>, vector<8x128xf32>
    %c19 = arith.constant 19 : index
    %161 = memref.load %arg4[%c19] : memref<224xf32, #tpu.memory_space<smem>>
    %162 = vector.broadcast %161 : f32 to vector<8x128xf32>
    %163 = arith.select %149, %162, %110 : vector<8x128xi1>, vector<8x128xf32>
    %c35 = arith.constant 35 : index
    %164 = memref.load %arg4[%c35] : memref<224xf32, #tpu.memory_space<smem>>
    %165 = vector.broadcast %164 : f32 to vector<8x128xf32>
    %166 = arith.select %149, %165, %113 : vector<8x128xi1>, vector<8x128xf32>
    %c51 = arith.constant 51 : index
    %167 = memref.load %arg4[%c51] : memref<224xf32, #tpu.memory_space<smem>>
    %168 = vector.broadcast %167 : f32 to vector<8x128xf32>
    %169 = arith.select %149, %168, %116 : vector<8x128xi1>, vector<8x128xf32>
    %c67 = arith.constant 67 : index
    %170 = memref.load %arg4[%c67] : memref<224xf32, #tpu.memory_space<smem>>
    %171 = vector.broadcast %170 : f32 to vector<8x128xf32>
    %172 = arith.select %149, %171, %119 : vector<8x128xi1>, vector<8x128xf32>
    %c83 = arith.constant 83 : index
    %173 = memref.load %arg4[%c83] : memref<224xf32, #tpu.memory_space<smem>>
    %174 = vector.broadcast %173 : f32 to vector<8x128xf32>
    %175 = arith.select %149, %174, %122 : vector<8x128xi1>, vector<8x128xf32>
    %c99 = arith.constant 99 : index
    %176 = memref.load %arg4[%c99] : memref<224xf32, #tpu.memory_space<smem>>
    %177 = vector.broadcast %176 : f32 to vector<8x128xf32>
    %178 = arith.select %149, %177, %125 : vector<8x128xi1>, vector<8x128xf32>
    %c115 = arith.constant 115 : index
    %179 = memref.load %arg4[%c115] : memref<224xf32, #tpu.memory_space<smem>>
    %180 = vector.broadcast %179 : f32 to vector<8x128xf32>
    %181 = arith.select %149, %180, %128 : vector<8x128xi1>, vector<8x128xf32>
    %c131 = arith.constant 131 : index
    %182 = memref.load %arg4[%c131] : memref<224xf32, #tpu.memory_space<smem>>
    %183 = vector.broadcast %182 : f32 to vector<8x128xf32>
    %184 = arith.select %149, %183, %131 : vector<8x128xi1>, vector<8x128xf32>
    %c147 = arith.constant 147 : index
    %185 = memref.load %arg4[%c147] : memref<224xf32, #tpu.memory_space<smem>>
    %186 = vector.broadcast %185 : f32 to vector<8x128xf32>
    %187 = arith.select %149, %186, %134 : vector<8x128xi1>, vector<8x128xf32>
    %c163 = arith.constant 163 : index
    %188 = memref.load %arg4[%c163] : memref<224xf32, #tpu.memory_space<smem>>
    %189 = vector.broadcast %188 : f32 to vector<8x128xf32>
    %190 = arith.select %149, %189, %137 : vector<8x128xi1>, vector<8x128xf32>
    %c179 = arith.constant 179 : index
    %191 = memref.load %arg4[%c179] : memref<224xf32, #tpu.memory_space<smem>>
    %192 = vector.broadcast %191 : f32 to vector<8x128xf32>
    %193 = arith.select %149, %192, %140 : vector<8x128xi1>, vector<8x128xf32>
    %c195 = arith.constant 195 : index
    %194 = memref.load %arg4[%c195] : memref<224xf32, #tpu.memory_space<smem>>
    %195 = vector.broadcast %194 : f32 to vector<8x128xf32>
    %196 = arith.select %149, %195, %143 : vector<8x128xi1>, vector<8x128xf32>
    %c211 = arith.constant 211 : index
    %197 = memref.load %arg4[%c211] : memref<224xf32, #tpu.memory_space<smem>>
    %198 = vector.broadcast %197 : f32 to vector<8x128xf32>
    %199 = arith.select %149, %198, %146 : vector<8x128xi1>, vector<8x128xf32>
    %c4 = arith.constant 4 : index
    %200 = memref.load %arg1[%c4] : memref<16xf32, #tpu.memory_space<smem>>
    %201 = vector.broadcast %200 : f32 to vector<8x128xf32>
    %202 = arith.cmpf oge, %7, %201 : vector<8x128xf32>
    %203 = arith.extui %202 : vector<8x128xi1> to vector<8x128xi32>
    %204 = arith.addi %151, %203 : vector<8x128xi32>
    %c4_14 = arith.constant 4 : index
    %205 = memref.load %arg1[%c4_14] : memref<16xf32, #tpu.memory_space<smem>>
    %206 = vector.broadcast %205 : f32 to vector<8x128xf32>
    %207 = arith.select %202, %206, %154 : vector<8x128xi1>, vector<8x128xf32>
    %c4_15 = arith.constant 4 : index
    %208 = memref.load %arg2[%c4_15] : memref<16xf32, #tpu.memory_space<smem>>
    %209 = vector.broadcast %208 : f32 to vector<8x128xf32>
    %210 = arith.select %202, %209, %157 : vector<8x128xi1>, vector<8x128xf32>
    %c4_16 = arith.constant 4 : index
    %211 = memref.load %arg4[%c4_16] : memref<224xf32, #tpu.memory_space<smem>>
    %212 = vector.broadcast %211 : f32 to vector<8x128xf32>
    %213 = arith.select %202, %212, %160 : vector<8x128xi1>, vector<8x128xf32>
    %c20 = arith.constant 20 : index
    %214 = memref.load %arg4[%c20] : memref<224xf32, #tpu.memory_space<smem>>
    %215 = vector.broadcast %214 : f32 to vector<8x128xf32>
    %216 = arith.select %202, %215, %163 : vector<8x128xi1>, vector<8x128xf32>
    %c36 = arith.constant 36 : index
    %217 = memref.load %arg4[%c36] : memref<224xf32, #tpu.memory_space<smem>>
    %218 = vector.broadcast %217 : f32 to vector<8x128xf32>
    %219 = arith.select %202, %218, %166 : vector<8x128xi1>, vector<8x128xf32>
    %c52 = arith.constant 52 : index
    %220 = memref.load %arg4[%c52] : memref<224xf32, #tpu.memory_space<smem>>
    %221 = vector.broadcast %220 : f32 to vector<8x128xf32>
    %222 = arith.select %202, %221, %169 : vector<8x128xi1>, vector<8x128xf32>
    %c68 = arith.constant 68 : index
    %223 = memref.load %arg4[%c68] : memref<224xf32, #tpu.memory_space<smem>>
    %224 = vector.broadcast %223 : f32 to vector<8x128xf32>
    %225 = arith.select %202, %224, %172 : vector<8x128xi1>, vector<8x128xf32>
    %c84 = arith.constant 84 : index
    %226 = memref.load %arg4[%c84] : memref<224xf32, #tpu.memory_space<smem>>
    %227 = vector.broadcast %226 : f32 to vector<8x128xf32>
    %228 = arith.select %202, %227, %175 : vector<8x128xi1>, vector<8x128xf32>
    %c100 = arith.constant 100 : index
    %229 = memref.load %arg4[%c100] : memref<224xf32, #tpu.memory_space<smem>>
    %230 = vector.broadcast %229 : f32 to vector<8x128xf32>
    %231 = arith.select %202, %230, %178 : vector<8x128xi1>, vector<8x128xf32>
    %c116 = arith.constant 116 : index
    %232 = memref.load %arg4[%c116] : memref<224xf32, #tpu.memory_space<smem>>
    %233 = vector.broadcast %232 : f32 to vector<8x128xf32>
    %234 = arith.select %202, %233, %181 : vector<8x128xi1>, vector<8x128xf32>
    %c132 = arith.constant 132 : index
    %235 = memref.load %arg4[%c132] : memref<224xf32, #tpu.memory_space<smem>>
    %236 = vector.broadcast %235 : f32 to vector<8x128xf32>
    %237 = arith.select %202, %236, %184 : vector<8x128xi1>, vector<8x128xf32>
    %c148 = arith.constant 148 : index
    %238 = memref.load %arg4[%c148] : memref<224xf32, #tpu.memory_space<smem>>
    %239 = vector.broadcast %238 : f32 to vector<8x128xf32>
    %240 = arith.select %202, %239, %187 : vector<8x128xi1>, vector<8x128xf32>
    %c164 = arith.constant 164 : index
    %241 = memref.load %arg4[%c164] : memref<224xf32, #tpu.memory_space<smem>>
    %242 = vector.broadcast %241 : f32 to vector<8x128xf32>
    %243 = arith.select %202, %242, %190 : vector<8x128xi1>, vector<8x128xf32>
    %c180 = arith.constant 180 : index
    %244 = memref.load %arg4[%c180] : memref<224xf32, #tpu.memory_space<smem>>
    %245 = vector.broadcast %244 : f32 to vector<8x128xf32>
    %246 = arith.select %202, %245, %193 : vector<8x128xi1>, vector<8x128xf32>
    %c196 = arith.constant 196 : index
    %247 = memref.load %arg4[%c196] : memref<224xf32, #tpu.memory_space<smem>>
    %248 = vector.broadcast %247 : f32 to vector<8x128xf32>
    %249 = arith.select %202, %248, %196 : vector<8x128xi1>, vector<8x128xf32>
    %c212 = arith.constant 212 : index
    %250 = memref.load %arg4[%c212] : memref<224xf32, #tpu.memory_space<smem>>
    %251 = vector.broadcast %250 : f32 to vector<8x128xf32>
    %252 = arith.select %202, %251, %199 : vector<8x128xi1>, vector<8x128xf32>
    %c5 = arith.constant 5 : index
    %253 = memref.load %arg1[%c5] : memref<16xf32, #tpu.memory_space<smem>>
    %254 = vector.broadcast %253 : f32 to vector<8x128xf32>
    %255 = arith.cmpf oge, %7, %254 : vector<8x128xf32>
    %256 = arith.extui %255 : vector<8x128xi1> to vector<8x128xi32>
    %257 = arith.addi %204, %256 : vector<8x128xi32>
    %c5_17 = arith.constant 5 : index
    %258 = memref.load %arg1[%c5_17] : memref<16xf32, #tpu.memory_space<smem>>
    %259 = vector.broadcast %258 : f32 to vector<8x128xf32>
    %260 = arith.select %255, %259, %207 : vector<8x128xi1>, vector<8x128xf32>
    %c5_18 = arith.constant 5 : index
    %261 = memref.load %arg2[%c5_18] : memref<16xf32, #tpu.memory_space<smem>>
    %262 = vector.broadcast %261 : f32 to vector<8x128xf32>
    %263 = arith.select %255, %262, %210 : vector<8x128xi1>, vector<8x128xf32>
    %c5_19 = arith.constant 5 : index
    %264 = memref.load %arg4[%c5_19] : memref<224xf32, #tpu.memory_space<smem>>
    %265 = vector.broadcast %264 : f32 to vector<8x128xf32>
    %266 = arith.select %255, %265, %213 : vector<8x128xi1>, vector<8x128xf32>
    %c21 = arith.constant 21 : index
    %267 = memref.load %arg4[%c21] : memref<224xf32, #tpu.memory_space<smem>>
    %268 = vector.broadcast %267 : f32 to vector<8x128xf32>
    %269 = arith.select %255, %268, %216 : vector<8x128xi1>, vector<8x128xf32>
    %c37 = arith.constant 37 : index
    %270 = memref.load %arg4[%c37] : memref<224xf32, #tpu.memory_space<smem>>
    %271 = vector.broadcast %270 : f32 to vector<8x128xf32>
    %272 = arith.select %255, %271, %219 : vector<8x128xi1>, vector<8x128xf32>
    %c53 = arith.constant 53 : index
    %273 = memref.load %arg4[%c53] : memref<224xf32, #tpu.memory_space<smem>>
    %274 = vector.broadcast %273 : f32 to vector<8x128xf32>
    %275 = arith.select %255, %274, %222 : vector<8x128xi1>, vector<8x128xf32>
    %c69 = arith.constant 69 : index
    %276 = memref.load %arg4[%c69] : memref<224xf32, #tpu.memory_space<smem>>
    %277 = vector.broadcast %276 : f32 to vector<8x128xf32>
    %278 = arith.select %255, %277, %225 : vector<8x128xi1>, vector<8x128xf32>
    %c85 = arith.constant 85 : index
    %279 = memref.load %arg4[%c85] : memref<224xf32, #tpu.memory_space<smem>>
    %280 = vector.broadcast %279 : f32 to vector<8x128xf32>
    %281 = arith.select %255, %280, %228 : vector<8x128xi1>, vector<8x128xf32>
    %c101 = arith.constant 101 : index
    %282 = memref.load %arg4[%c101] : memref<224xf32, #tpu.memory_space<smem>>
    %283 = vector.broadcast %282 : f32 to vector<8x128xf32>
    %284 = arith.select %255, %283, %231 : vector<8x128xi1>, vector<8x128xf32>
    %c117 = arith.constant 117 : index
    %285 = memref.load %arg4[%c117] : memref<224xf32, #tpu.memory_space<smem>>
    %286 = vector.broadcast %285 : f32 to vector<8x128xf32>
    %287 = arith.select %255, %286, %234 : vector<8x128xi1>, vector<8x128xf32>
    %c133 = arith.constant 133 : index
    %288 = memref.load %arg4[%c133] : memref<224xf32, #tpu.memory_space<smem>>
    %289 = vector.broadcast %288 : f32 to vector<8x128xf32>
    %290 = arith.select %255, %289, %237 : vector<8x128xi1>, vector<8x128xf32>
    %c149 = arith.constant 149 : index
    %291 = memref.load %arg4[%c149] : memref<224xf32, #tpu.memory_space<smem>>
    %292 = vector.broadcast %291 : f32 to vector<8x128xf32>
    %293 = arith.select %255, %292, %240 : vector<8x128xi1>, vector<8x128xf32>
    %c165 = arith.constant 165 : index
    %294 = memref.load %arg4[%c165] : memref<224xf32, #tpu.memory_space<smem>>
    %295 = vector.broadcast %294 : f32 to vector<8x128xf32>
    %296 = arith.select %255, %295, %243 : vector<8x128xi1>, vector<8x128xf32>
    %c181 = arith.constant 181 : index
    %297 = memref.load %arg4[%c181] : memref<224xf32, #tpu.memory_space<smem>>
    %298 = vector.broadcast %297 : f32 to vector<8x128xf32>
    %299 = arith.select %255, %298, %246 : vector<8x128xi1>, vector<8x128xf32>
    %c197 = arith.constant 197 : index
    %300 = memref.load %arg4[%c197] : memref<224xf32, #tpu.memory_space<smem>>
    %301 = vector.broadcast %300 : f32 to vector<8x128xf32>
    %302 = arith.select %255, %301, %249 : vector<8x128xi1>, vector<8x128xf32>
    %c213 = arith.constant 213 : index
    %303 = memref.load %arg4[%c213] : memref<224xf32, #tpu.memory_space<smem>>
    %304 = vector.broadcast %303 : f32 to vector<8x128xf32>
    %305 = arith.select %255, %304, %252 : vector<8x128xi1>, vector<8x128xf32>
    %c6 = arith.constant 6 : index
    %306 = memref.load %arg1[%c6] : memref<16xf32, #tpu.memory_space<smem>>
    %307 = vector.broadcast %306 : f32 to vector<8x128xf32>
    %308 = arith.cmpf oge, %7, %307 : vector<8x128xf32>
    %309 = arith.extui %308 : vector<8x128xi1> to vector<8x128xi32>
    %310 = arith.addi %257, %309 : vector<8x128xi32>
    %c6_20 = arith.constant 6 : index
    %311 = memref.load %arg1[%c6_20] : memref<16xf32, #tpu.memory_space<smem>>
    %312 = vector.broadcast %311 : f32 to vector<8x128xf32>
    %313 = arith.select %308, %312, %260 : vector<8x128xi1>, vector<8x128xf32>
    %c6_21 = arith.constant 6 : index
    %314 = memref.load %arg2[%c6_21] : memref<16xf32, #tpu.memory_space<smem>>
    %315 = vector.broadcast %314 : f32 to vector<8x128xf32>
    %316 = arith.select %308, %315, %263 : vector<8x128xi1>, vector<8x128xf32>
    %c6_22 = arith.constant 6 : index
    %317 = memref.load %arg4[%c6_22] : memref<224xf32, #tpu.memory_space<smem>>
    %318 = vector.broadcast %317 : f32 to vector<8x128xf32>
    %319 = arith.select %308, %318, %266 : vector<8x128xi1>, vector<8x128xf32>
    %c22 = arith.constant 22 : index
    %320 = memref.load %arg4[%c22] : memref<224xf32, #tpu.memory_space<smem>>
    %321 = vector.broadcast %320 : f32 to vector<8x128xf32>
    %322 = arith.select %308, %321, %269 : vector<8x128xi1>, vector<8x128xf32>
    %c38 = arith.constant 38 : index
    %323 = memref.load %arg4[%c38] : memref<224xf32, #tpu.memory_space<smem>>
    %324 = vector.broadcast %323 : f32 to vector<8x128xf32>
    %325 = arith.select %308, %324, %272 : vector<8x128xi1>, vector<8x128xf32>
    %c54 = arith.constant 54 : index
    %326 = memref.load %arg4[%c54] : memref<224xf32, #tpu.memory_space<smem>>
    %327 = vector.broadcast %326 : f32 to vector<8x128xf32>
    %328 = arith.select %308, %327, %275 : vector<8x128xi1>, vector<8x128xf32>
    %c70 = arith.constant 70 : index
    %329 = memref.load %arg4[%c70] : memref<224xf32, #tpu.memory_space<smem>>
    %330 = vector.broadcast %329 : f32 to vector<8x128xf32>
    %331 = arith.select %308, %330, %278 : vector<8x128xi1>, vector<8x128xf32>
    %c86 = arith.constant 86 : index
    %332 = memref.load %arg4[%c86] : memref<224xf32, #tpu.memory_space<smem>>
    %333 = vector.broadcast %332 : f32 to vector<8x128xf32>
    %334 = arith.select %308, %333, %281 : vector<8x128xi1>, vector<8x128xf32>
    %c102 = arith.constant 102 : index
    %335 = memref.load %arg4[%c102] : memref<224xf32, #tpu.memory_space<smem>>
    %336 = vector.broadcast %335 : f32 to vector<8x128xf32>
    %337 = arith.select %308, %336, %284 : vector<8x128xi1>, vector<8x128xf32>
    %c118 = arith.constant 118 : index
    %338 = memref.load %arg4[%c118] : memref<224xf32, #tpu.memory_space<smem>>
    %339 = vector.broadcast %338 : f32 to vector<8x128xf32>
    %340 = arith.select %308, %339, %287 : vector<8x128xi1>, vector<8x128xf32>
    %c134 = arith.constant 134 : index
    %341 = memref.load %arg4[%c134] : memref<224xf32, #tpu.memory_space<smem>>
    %342 = vector.broadcast %341 : f32 to vector<8x128xf32>
    %343 = arith.select %308, %342, %290 : vector<8x128xi1>, vector<8x128xf32>
    %c150 = arith.constant 150 : index
    %344 = memref.load %arg4[%c150] : memref<224xf32, #tpu.memory_space<smem>>
    %345 = vector.broadcast %344 : f32 to vector<8x128xf32>
    %346 = arith.select %308, %345, %293 : vector<8x128xi1>, vector<8x128xf32>
    %c166 = arith.constant 166 : index
    %347 = memref.load %arg4[%c166] : memref<224xf32, #tpu.memory_space<smem>>
    %348 = vector.broadcast %347 : f32 to vector<8x128xf32>
    %349 = arith.select %308, %348, %296 : vector<8x128xi1>, vector<8x128xf32>
    %c182 = arith.constant 182 : index
    %350 = memref.load %arg4[%c182] : memref<224xf32, #tpu.memory_space<smem>>
    %351 = vector.broadcast %350 : f32 to vector<8x128xf32>
    %352 = arith.select %308, %351, %299 : vector<8x128xi1>, vector<8x128xf32>
    %c198 = arith.constant 198 : index
    %353 = memref.load %arg4[%c198] : memref<224xf32, #tpu.memory_space<smem>>
    %354 = vector.broadcast %353 : f32 to vector<8x128xf32>
    %355 = arith.select %308, %354, %302 : vector<8x128xi1>, vector<8x128xf32>
    %c214 = arith.constant 214 : index
    %356 = memref.load %arg4[%c214] : memref<224xf32, #tpu.memory_space<smem>>
    %357 = vector.broadcast %356 : f32 to vector<8x128xf32>
    %358 = arith.select %308, %357, %305 : vector<8x128xi1>, vector<8x128xf32>
    %c7 = arith.constant 7 : index
    %359 = memref.load %arg1[%c7] : memref<16xf32, #tpu.memory_space<smem>>
    %360 = vector.broadcast %359 : f32 to vector<8x128xf32>
    %361 = arith.cmpf oge, %7, %360 : vector<8x128xf32>
    %362 = arith.extui %361 : vector<8x128xi1> to vector<8x128xi32>
    %363 = arith.addi %310, %362 : vector<8x128xi32>
    %c7_23 = arith.constant 7 : index
    %364 = memref.load %arg1[%c7_23] : memref<16xf32, #tpu.memory_space<smem>>
    %365 = vector.broadcast %364 : f32 to vector<8x128xf32>
    %366 = arith.select %361, %365, %313 : vector<8x128xi1>, vector<8x128xf32>
    %c7_24 = arith.constant 7 : index
    %367 = memref.load %arg2[%c7_24] : memref<16xf32, #tpu.memory_space<smem>>
    %368 = vector.broadcast %367 : f32 to vector<8x128xf32>
    %369 = arith.select %361, %368, %316 : vector<8x128xi1>, vector<8x128xf32>
    %c7_25 = arith.constant 7 : index
    %370 = memref.load %arg4[%c7_25] : memref<224xf32, #tpu.memory_space<smem>>
    %371 = vector.broadcast %370 : f32 to vector<8x128xf32>
    %372 = arith.select %361, %371, %319 : vector<8x128xi1>, vector<8x128xf32>
    %c23 = arith.constant 23 : index
    %373 = memref.load %arg4[%c23] : memref<224xf32, #tpu.memory_space<smem>>
    %374 = vector.broadcast %373 : f32 to vector<8x128xf32>
    %375 = arith.select %361, %374, %322 : vector<8x128xi1>, vector<8x128xf32>
    %c39 = arith.constant 39 : index
    %376 = memref.load %arg4[%c39] : memref<224xf32, #tpu.memory_space<smem>>
    %377 = vector.broadcast %376 : f32 to vector<8x128xf32>
    %378 = arith.select %361, %377, %325 : vector<8x128xi1>, vector<8x128xf32>
    %c55 = arith.constant 55 : index
    %379 = memref.load %arg4[%c55] : memref<224xf32, #tpu.memory_space<smem>>
    %380 = vector.broadcast %379 : f32 to vector<8x128xf32>
    %381 = arith.select %361, %380, %328 : vector<8x128xi1>, vector<8x128xf32>
    %c71 = arith.constant 71 : index
    %382 = memref.load %arg4[%c71] : memref<224xf32, #tpu.memory_space<smem>>
    %383 = vector.broadcast %382 : f32 to vector<8x128xf32>
    %384 = arith.select %361, %383, %331 : vector<8x128xi1>, vector<8x128xf32>
    %c87 = arith.constant 87 : index
    %385 = memref.load %arg4[%c87] : memref<224xf32, #tpu.memory_space<smem>>
    %386 = vector.broadcast %385 : f32 to vector<8x128xf32>
    %387 = arith.select %361, %386, %334 : vector<8x128xi1>, vector<8x128xf32>
    %c103 = arith.constant 103 : index
    %388 = memref.load %arg4[%c103] : memref<224xf32, #tpu.memory_space<smem>>
    %389 = vector.broadcast %388 : f32 to vector<8x128xf32>
    %390 = arith.select %361, %389, %337 : vector<8x128xi1>, vector<8x128xf32>
    %c119 = arith.constant 119 : index
    %391 = memref.load %arg4[%c119] : memref<224xf32, #tpu.memory_space<smem>>
    %392 = vector.broadcast %391 : f32 to vector<8x128xf32>
    %393 = arith.select %361, %392, %340 : vector<8x128xi1>, vector<8x128xf32>
    %c135 = arith.constant 135 : index
    %394 = memref.load %arg4[%c135] : memref<224xf32, #tpu.memory_space<smem>>
    %395 = vector.broadcast %394 : f32 to vector<8x128xf32>
    %396 = arith.select %361, %395, %343 : vector<8x128xi1>, vector<8x128xf32>
    %c151 = arith.constant 151 : index
    %397 = memref.load %arg4[%c151] : memref<224xf32, #tpu.memory_space<smem>>
    %398 = vector.broadcast %397 : f32 to vector<8x128xf32>
    %399 = arith.select %361, %398, %346 : vector<8x128xi1>, vector<8x128xf32>
    %c167 = arith.constant 167 : index
    %400 = memref.load %arg4[%c167] : memref<224xf32, #tpu.memory_space<smem>>
    %401 = vector.broadcast %400 : f32 to vector<8x128xf32>
    %402 = arith.select %361, %401, %349 : vector<8x128xi1>, vector<8x128xf32>
    %c183 = arith.constant 183 : index
    %403 = memref.load %arg4[%c183] : memref<224xf32, #tpu.memory_space<smem>>
    %404 = vector.broadcast %403 : f32 to vector<8x128xf32>
    %405 = arith.select %361, %404, %352 : vector<8x128xi1>, vector<8x128xf32>
    %c199 = arith.constant 199 : index
    %406 = memref.load %arg4[%c199] : memref<224xf32, #tpu.memory_space<smem>>
    %407 = vector.broadcast %406 : f32 to vector<8x128xf32>
    %408 = arith.select %361, %407, %355 : vector<8x128xi1>, vector<8x128xf32>
    %c215 = arith.constant 215 : index
    %409 = memref.load %arg4[%c215] : memref<224xf32, #tpu.memory_space<smem>>
    %410 = vector.broadcast %409 : f32 to vector<8x128xf32>
    %411 = arith.select %361, %410, %358 : vector<8x128xi1>, vector<8x128xf32>
    %c8 = arith.constant 8 : index
    %412 = memref.load %arg1[%c8] : memref<16xf32, #tpu.memory_space<smem>>
    %413 = vector.broadcast %412 : f32 to vector<8x128xf32>
    %414 = arith.cmpf oge, %7, %413 : vector<8x128xf32>
    %415 = arith.extui %414 : vector<8x128xi1> to vector<8x128xi32>
    %416 = arith.addi %363, %415 : vector<8x128xi32>
    %c8_26 = arith.constant 8 : index
    %417 = memref.load %arg1[%c8_26] : memref<16xf32, #tpu.memory_space<smem>>
    %418 = vector.broadcast %417 : f32 to vector<8x128xf32>
    %419 = arith.select %414, %418, %366 : vector<8x128xi1>, vector<8x128xf32>
    %c8_27 = arith.constant 8 : index
    %420 = memref.load %arg2[%c8_27] : memref<16xf32, #tpu.memory_space<smem>>
    %421 = vector.broadcast %420 : f32 to vector<8x128xf32>
    %422 = arith.select %414, %421, %369 : vector<8x128xi1>, vector<8x128xf32>
    %c8_28 = arith.constant 8 : index
    %423 = memref.load %arg4[%c8_28] : memref<224xf32, #tpu.memory_space<smem>>
    %424 = vector.broadcast %423 : f32 to vector<8x128xf32>
    %425 = arith.select %414, %424, %372 : vector<8x128xi1>, vector<8x128xf32>
    %c24 = arith.constant 24 : index
    %426 = memref.load %arg4[%c24] : memref<224xf32, #tpu.memory_space<smem>>
    %427 = vector.broadcast %426 : f32 to vector<8x128xf32>
    %428 = arith.select %414, %427, %375 : vector<8x128xi1>, vector<8x128xf32>
    %c40 = arith.constant 40 : index
    %429 = memref.load %arg4[%c40] : memref<224xf32, #tpu.memory_space<smem>>
    %430 = vector.broadcast %429 : f32 to vector<8x128xf32>
    %431 = arith.select %414, %430, %378 : vector<8x128xi1>, vector<8x128xf32>
    %c56 = arith.constant 56 : index
    %432 = memref.load %arg4[%c56] : memref<224xf32, #tpu.memory_space<smem>>
    %433 = vector.broadcast %432 : f32 to vector<8x128xf32>
    %434 = arith.select %414, %433, %381 : vector<8x128xi1>, vector<8x128xf32>
    %c72 = arith.constant 72 : index
    %435 = memref.load %arg4[%c72] : memref<224xf32, #tpu.memory_space<smem>>
    %436 = vector.broadcast %435 : f32 to vector<8x128xf32>
    %437 = arith.select %414, %436, %384 : vector<8x128xi1>, vector<8x128xf32>
    %c88 = arith.constant 88 : index
    %438 = memref.load %arg4[%c88] : memref<224xf32, #tpu.memory_space<smem>>
    %439 = vector.broadcast %438 : f32 to vector<8x128xf32>
    %440 = arith.select %414, %439, %387 : vector<8x128xi1>, vector<8x128xf32>
    %c104 = arith.constant 104 : index
    %441 = memref.load %arg4[%c104] : memref<224xf32, #tpu.memory_space<smem>>
    %442 = vector.broadcast %441 : f32 to vector<8x128xf32>
    %443 = arith.select %414, %442, %390 : vector<8x128xi1>, vector<8x128xf32>
    %c120 = arith.constant 120 : index
    %444 = memref.load %arg4[%c120] : memref<224xf32, #tpu.memory_space<smem>>
    %445 = vector.broadcast %444 : f32 to vector<8x128xf32>
    %446 = arith.select %414, %445, %393 : vector<8x128xi1>, vector<8x128xf32>
    %c136 = arith.constant 136 : index
    %447 = memref.load %arg4[%c136] : memref<224xf32, #tpu.memory_space<smem>>
    %448 = vector.broadcast %447 : f32 to vector<8x128xf32>
    %449 = arith.select %414, %448, %396 : vector<8x128xi1>, vector<8x128xf32>
    %c152 = arith.constant 152 : index
    %450 = memref.load %arg4[%c152] : memref<224xf32, #tpu.memory_space<smem>>
    %451 = vector.broadcast %450 : f32 to vector<8x128xf32>
    %452 = arith.select %414, %451, %399 : vector<8x128xi1>, vector<8x128xf32>
    %c168 = arith.constant 168 : index
    %453 = memref.load %arg4[%c168] : memref<224xf32, #tpu.memory_space<smem>>
    %454 = vector.broadcast %453 : f32 to vector<8x128xf32>
    %455 = arith.select %414, %454, %402 : vector<8x128xi1>, vector<8x128xf32>
    %c184 = arith.constant 184 : index
    %456 = memref.load %arg4[%c184] : memref<224xf32, #tpu.memory_space<smem>>
    %457 = vector.broadcast %456 : f32 to vector<8x128xf32>
    %458 = arith.select %414, %457, %405 : vector<8x128xi1>, vector<8x128xf32>
    %c200 = arith.constant 200 : index
    %459 = memref.load %arg4[%c200] : memref<224xf32, #tpu.memory_space<smem>>
    %460 = vector.broadcast %459 : f32 to vector<8x128xf32>
    %461 = arith.select %414, %460, %408 : vector<8x128xi1>, vector<8x128xf32>
    %c216 = arith.constant 216 : index
    %462 = memref.load %arg4[%c216] : memref<224xf32, #tpu.memory_space<smem>>
    %463 = vector.broadcast %462 : f32 to vector<8x128xf32>
    %464 = arith.select %414, %463, %411 : vector<8x128xi1>, vector<8x128xf32>
    %c9 = arith.constant 9 : index
    %465 = memref.load %arg1[%c9] : memref<16xf32, #tpu.memory_space<smem>>
    %466 = vector.broadcast %465 : f32 to vector<8x128xf32>
    %467 = arith.cmpf oge, %7, %466 : vector<8x128xf32>
    %468 = arith.extui %467 : vector<8x128xi1> to vector<8x128xi32>
    %469 = arith.addi %416, %468 : vector<8x128xi32>
    %c9_29 = arith.constant 9 : index
    %470 = memref.load %arg1[%c9_29] : memref<16xf32, #tpu.memory_space<smem>>
    %471 = vector.broadcast %470 : f32 to vector<8x128xf32>
    %472 = arith.select %467, %471, %419 : vector<8x128xi1>, vector<8x128xf32>
    %c9_30 = arith.constant 9 : index
    %473 = memref.load %arg2[%c9_30] : memref<16xf32, #tpu.memory_space<smem>>
    %474 = vector.broadcast %473 : f32 to vector<8x128xf32>
    %475 = arith.select %467, %474, %422 : vector<8x128xi1>, vector<8x128xf32>
    %c9_31 = arith.constant 9 : index
    %476 = memref.load %arg4[%c9_31] : memref<224xf32, #tpu.memory_space<smem>>
    %477 = vector.broadcast %476 : f32 to vector<8x128xf32>
    %478 = arith.select %467, %477, %425 : vector<8x128xi1>, vector<8x128xf32>
    %c25 = arith.constant 25 : index
    %479 = memref.load %arg4[%c25] : memref<224xf32, #tpu.memory_space<smem>>
    %480 = vector.broadcast %479 : f32 to vector<8x128xf32>
    %481 = arith.select %467, %480, %428 : vector<8x128xi1>, vector<8x128xf32>
    %c41 = arith.constant 41 : index
    %482 = memref.load %arg4[%c41] : memref<224xf32, #tpu.memory_space<smem>>
    %483 = vector.broadcast %482 : f32 to vector<8x128xf32>
    %484 = arith.select %467, %483, %431 : vector<8x128xi1>, vector<8x128xf32>
    %c57 = arith.constant 57 : index
    %485 = memref.load %arg4[%c57] : memref<224xf32, #tpu.memory_space<smem>>
    %486 = vector.broadcast %485 : f32 to vector<8x128xf32>
    %487 = arith.select %467, %486, %434 : vector<8x128xi1>, vector<8x128xf32>
    %c73 = arith.constant 73 : index
    %488 = memref.load %arg4[%c73] : memref<224xf32, #tpu.memory_space<smem>>
    %489 = vector.broadcast %488 : f32 to vector<8x128xf32>
    %490 = arith.select %467, %489, %437 : vector<8x128xi1>, vector<8x128xf32>
    %c89 = arith.constant 89 : index
    %491 = memref.load %arg4[%c89] : memref<224xf32, #tpu.memory_space<smem>>
    %492 = vector.broadcast %491 : f32 to vector<8x128xf32>
    %493 = arith.select %467, %492, %440 : vector<8x128xi1>, vector<8x128xf32>
    %c105 = arith.constant 105 : index
    %494 = memref.load %arg4[%c105] : memref<224xf32, #tpu.memory_space<smem>>
    %495 = vector.broadcast %494 : f32 to vector<8x128xf32>
    %496 = arith.select %467, %495, %443 : vector<8x128xi1>, vector<8x128xf32>
    %c121 = arith.constant 121 : index
    %497 = memref.load %arg4[%c121] : memref<224xf32, #tpu.memory_space<smem>>
    %498 = vector.broadcast %497 : f32 to vector<8x128xf32>
    %499 = arith.select %467, %498, %446 : vector<8x128xi1>, vector<8x128xf32>
    %c137 = arith.constant 137 : index
    %500 = memref.load %arg4[%c137] : memref<224xf32, #tpu.memory_space<smem>>
    %501 = vector.broadcast %500 : f32 to vector<8x128xf32>
    %502 = arith.select %467, %501, %449 : vector<8x128xi1>, vector<8x128xf32>
    %c153 = arith.constant 153 : index
    %503 = memref.load %arg4[%c153] : memref<224xf32, #tpu.memory_space<smem>>
    %504 = vector.broadcast %503 : f32 to vector<8x128xf32>
    %505 = arith.select %467, %504, %452 : vector<8x128xi1>, vector<8x128xf32>
    %c169 = arith.constant 169 : index
    %506 = memref.load %arg4[%c169] : memref<224xf32, #tpu.memory_space<smem>>
    %507 = vector.broadcast %506 : f32 to vector<8x128xf32>
    %508 = arith.select %467, %507, %455 : vector<8x128xi1>, vector<8x128xf32>
    %c185 = arith.constant 185 : index
    %509 = memref.load %arg4[%c185] : memref<224xf32, #tpu.memory_space<smem>>
    %510 = vector.broadcast %509 : f32 to vector<8x128xf32>
    %511 = arith.select %467, %510, %458 : vector<8x128xi1>, vector<8x128xf32>
    %c201 = arith.constant 201 : index
    %512 = memref.load %arg4[%c201] : memref<224xf32, #tpu.memory_space<smem>>
    %513 = vector.broadcast %512 : f32 to vector<8x128xf32>
    %514 = arith.select %467, %513, %461 : vector<8x128xi1>, vector<8x128xf32>
    %c217 = arith.constant 217 : index
    %515 = memref.load %arg4[%c217] : memref<224xf32, #tpu.memory_space<smem>>
    %516 = vector.broadcast %515 : f32 to vector<8x128xf32>
    %517 = arith.select %467, %516, %464 : vector<8x128xi1>, vector<8x128xf32>
    %c10 = arith.constant 10 : index
    %518 = memref.load %arg1[%c10] : memref<16xf32, #tpu.memory_space<smem>>
    %519 = vector.broadcast %518 : f32 to vector<8x128xf32>
    %520 = arith.cmpf oge, %7, %519 : vector<8x128xf32>
    %521 = arith.extui %520 : vector<8x128xi1> to vector<8x128xi32>
    %522 = arith.addi %469, %521 : vector<8x128xi32>
    %c10_32 = arith.constant 10 : index
    %523 = memref.load %arg1[%c10_32] : memref<16xf32, #tpu.memory_space<smem>>
    %524 = vector.broadcast %523 : f32 to vector<8x128xf32>
    %525 = arith.select %520, %524, %472 : vector<8x128xi1>, vector<8x128xf32>
    %c10_33 = arith.constant 10 : index
    %526 = memref.load %arg2[%c10_33] : memref<16xf32, #tpu.memory_space<smem>>
    %527 = vector.broadcast %526 : f32 to vector<8x128xf32>
    %528 = arith.select %520, %527, %475 : vector<8x128xi1>, vector<8x128xf32>
    %c10_34 = arith.constant 10 : index
    %529 = memref.load %arg4[%c10_34] : memref<224xf32, #tpu.memory_space<smem>>
    %530 = vector.broadcast %529 : f32 to vector<8x128xf32>
    %531 = arith.select %520, %530, %478 : vector<8x128xi1>, vector<8x128xf32>
    %c26 = arith.constant 26 : index
    %532 = memref.load %arg4[%c26] : memref<224xf32, #tpu.memory_space<smem>>
    %533 = vector.broadcast %532 : f32 to vector<8x128xf32>
    %534 = arith.select %520, %533, %481 : vector<8x128xi1>, vector<8x128xf32>
    %c42 = arith.constant 42 : index
    %535 = memref.load %arg4[%c42] : memref<224xf32, #tpu.memory_space<smem>>
    %536 = vector.broadcast %535 : f32 to vector<8x128xf32>
    %537 = arith.select %520, %536, %484 : vector<8x128xi1>, vector<8x128xf32>
    %c58 = arith.constant 58 : index
    %538 = memref.load %arg4[%c58] : memref<224xf32, #tpu.memory_space<smem>>
    %539 = vector.broadcast %538 : f32 to vector<8x128xf32>
    %540 = arith.select %520, %539, %487 : vector<8x128xi1>, vector<8x128xf32>
    %c74 = arith.constant 74 : index
    %541 = memref.load %arg4[%c74] : memref<224xf32, #tpu.memory_space<smem>>
    %542 = vector.broadcast %541 : f32 to vector<8x128xf32>
    %543 = arith.select %520, %542, %490 : vector<8x128xi1>, vector<8x128xf32>
    %c90 = arith.constant 90 : index
    %544 = memref.load %arg4[%c90] : memref<224xf32, #tpu.memory_space<smem>>
    %545 = vector.broadcast %544 : f32 to vector<8x128xf32>
    %546 = arith.select %520, %545, %493 : vector<8x128xi1>, vector<8x128xf32>
    %c106 = arith.constant 106 : index
    %547 = memref.load %arg4[%c106] : memref<224xf32, #tpu.memory_space<smem>>
    %548 = vector.broadcast %547 : f32 to vector<8x128xf32>
    %549 = arith.select %520, %548, %496 : vector<8x128xi1>, vector<8x128xf32>
    %c122 = arith.constant 122 : index
    %550 = memref.load %arg4[%c122] : memref<224xf32, #tpu.memory_space<smem>>
    %551 = vector.broadcast %550 : f32 to vector<8x128xf32>
    %552 = arith.select %520, %551, %499 : vector<8x128xi1>, vector<8x128xf32>
    %c138 = arith.constant 138 : index
    %553 = memref.load %arg4[%c138] : memref<224xf32, #tpu.memory_space<smem>>
    %554 = vector.broadcast %553 : f32 to vector<8x128xf32>
    %555 = arith.select %520, %554, %502 : vector<8x128xi1>, vector<8x128xf32>
    %c154 = arith.constant 154 : index
    %556 = memref.load %arg4[%c154] : memref<224xf32, #tpu.memory_space<smem>>
    %557 = vector.broadcast %556 : f32 to vector<8x128xf32>
    %558 = arith.select %520, %557, %505 : vector<8x128xi1>, vector<8x128xf32>
    %c170 = arith.constant 170 : index
    %559 = memref.load %arg4[%c170] : memref<224xf32, #tpu.memory_space<smem>>
    %560 = vector.broadcast %559 : f32 to vector<8x128xf32>
    %561 = arith.select %520, %560, %508 : vector<8x128xi1>, vector<8x128xf32>
    %c186 = arith.constant 186 : index
    %562 = memref.load %arg4[%c186] : memref<224xf32, #tpu.memory_space<smem>>
    %563 = vector.broadcast %562 : f32 to vector<8x128xf32>
    %564 = arith.select %520, %563, %511 : vector<8x128xi1>, vector<8x128xf32>
    %c202 = arith.constant 202 : index
    %565 = memref.load %arg4[%c202] : memref<224xf32, #tpu.memory_space<smem>>
    %566 = vector.broadcast %565 : f32 to vector<8x128xf32>
    %567 = arith.select %520, %566, %514 : vector<8x128xi1>, vector<8x128xf32>
    %c218 = arith.constant 218 : index
    %568 = memref.load %arg4[%c218] : memref<224xf32, #tpu.memory_space<smem>>
    %569 = vector.broadcast %568 : f32 to vector<8x128xf32>
    %570 = arith.select %520, %569, %517 : vector<8x128xi1>, vector<8x128xf32>
    %c11 = arith.constant 11 : index
    %571 = memref.load %arg1[%c11] : memref<16xf32, #tpu.memory_space<smem>>
    %572 = vector.broadcast %571 : f32 to vector<8x128xf32>
    %573 = arith.cmpf oge, %7, %572 : vector<8x128xf32>
    %574 = arith.extui %573 : vector<8x128xi1> to vector<8x128xi32>
    %575 = arith.addi %522, %574 : vector<8x128xi32>
    %c11_35 = arith.constant 11 : index
    %576 = memref.load %arg1[%c11_35] : memref<16xf32, #tpu.memory_space<smem>>
    %577 = vector.broadcast %576 : f32 to vector<8x128xf32>
    %578 = arith.select %573, %577, %525 : vector<8x128xi1>, vector<8x128xf32>
    %c11_36 = arith.constant 11 : index
    %579 = memref.load %arg2[%c11_36] : memref<16xf32, #tpu.memory_space<smem>>
    %580 = vector.broadcast %579 : f32 to vector<8x128xf32>
    %581 = arith.select %573, %580, %528 : vector<8x128xi1>, vector<8x128xf32>
    %c11_37 = arith.constant 11 : index
    %582 = memref.load %arg4[%c11_37] : memref<224xf32, #tpu.memory_space<smem>>
    %583 = vector.broadcast %582 : f32 to vector<8x128xf32>
    %584 = arith.select %573, %583, %531 : vector<8x128xi1>, vector<8x128xf32>
    %c27 = arith.constant 27 : index
    %585 = memref.load %arg4[%c27] : memref<224xf32, #tpu.memory_space<smem>>
    %586 = vector.broadcast %585 : f32 to vector<8x128xf32>
    %587 = arith.select %573, %586, %534 : vector<8x128xi1>, vector<8x128xf32>
    %c43 = arith.constant 43 : index
    %588 = memref.load %arg4[%c43] : memref<224xf32, #tpu.memory_space<smem>>
    %589 = vector.broadcast %588 : f32 to vector<8x128xf32>
    %590 = arith.select %573, %589, %537 : vector<8x128xi1>, vector<8x128xf32>
    %c59 = arith.constant 59 : index
    %591 = memref.load %arg4[%c59] : memref<224xf32, #tpu.memory_space<smem>>
    %592 = vector.broadcast %591 : f32 to vector<8x128xf32>
    %593 = arith.select %573, %592, %540 : vector<8x128xi1>, vector<8x128xf32>
    %c75 = arith.constant 75 : index
    %594 = memref.load %arg4[%c75] : memref<224xf32, #tpu.memory_space<smem>>
    %595 = vector.broadcast %594 : f32 to vector<8x128xf32>
    %596 = arith.select %573, %595, %543 : vector<8x128xi1>, vector<8x128xf32>
    %c91 = arith.constant 91 : index
    %597 = memref.load %arg4[%c91] : memref<224xf32, #tpu.memory_space<smem>>
    %598 = vector.broadcast %597 : f32 to vector<8x128xf32>
    %599 = arith.select %573, %598, %546 : vector<8x128xi1>, vector<8x128xf32>
    %c107 = arith.constant 107 : index
    %600 = memref.load %arg4[%c107] : memref<224xf32, #tpu.memory_space<smem>>
    %601 = vector.broadcast %600 : f32 to vector<8x128xf32>
    %602 = arith.select %573, %601, %549 : vector<8x128xi1>, vector<8x128xf32>
    %c123 = arith.constant 123 : index
    %603 = memref.load %arg4[%c123] : memref<224xf32, #tpu.memory_space<smem>>
    %604 = vector.broadcast %603 : f32 to vector<8x128xf32>
    %605 = arith.select %573, %604, %552 : vector<8x128xi1>, vector<8x128xf32>
    %c139 = arith.constant 139 : index
    %606 = memref.load %arg4[%c139] : memref<224xf32, #tpu.memory_space<smem>>
    %607 = vector.broadcast %606 : f32 to vector<8x128xf32>
    %608 = arith.select %573, %607, %555 : vector<8x128xi1>, vector<8x128xf32>
    %c155 = arith.constant 155 : index
    %609 = memref.load %arg4[%c155] : memref<224xf32, #tpu.memory_space<smem>>
    %610 = vector.broadcast %609 : f32 to vector<8x128xf32>
    %611 = arith.select %573, %610, %558 : vector<8x128xi1>, vector<8x128xf32>
    %c171 = arith.constant 171 : index
    %612 = memref.load %arg4[%c171] : memref<224xf32, #tpu.memory_space<smem>>
    %613 = vector.broadcast %612 : f32 to vector<8x128xf32>
    %614 = arith.select %573, %613, %561 : vector<8x128xi1>, vector<8x128xf32>
    %c187 = arith.constant 187 : index
    %615 = memref.load %arg4[%c187] : memref<224xf32, #tpu.memory_space<smem>>
    %616 = vector.broadcast %615 : f32 to vector<8x128xf32>
    %617 = arith.select %573, %616, %564 : vector<8x128xi1>, vector<8x128xf32>
    %c203 = arith.constant 203 : index
    %618 = memref.load %arg4[%c203] : memref<224xf32, #tpu.memory_space<smem>>
    %619 = vector.broadcast %618 : f32 to vector<8x128xf32>
    %620 = arith.select %573, %619, %567 : vector<8x128xi1>, vector<8x128xf32>
    %c219 = arith.constant 219 : index
    %621 = memref.load %arg4[%c219] : memref<224xf32, #tpu.memory_space<smem>>
    %622 = vector.broadcast %621 : f32 to vector<8x128xf32>
    %623 = arith.select %573, %622, %570 : vector<8x128xi1>, vector<8x128xf32>
    %c12 = arith.constant 12 : index
    %624 = memref.load %arg1[%c12] : memref<16xf32, #tpu.memory_space<smem>>
    %625 = vector.broadcast %624 : f32 to vector<8x128xf32>
    %626 = arith.cmpf oge, %7, %625 : vector<8x128xf32>
    %627 = arith.extui %626 : vector<8x128xi1> to vector<8x128xi32>
    %628 = arith.addi %575, %627 : vector<8x128xi32>
    %c12_38 = arith.constant 12 : index
    %629 = memref.load %arg1[%c12_38] : memref<16xf32, #tpu.memory_space<smem>>
    %630 = vector.broadcast %629 : f32 to vector<8x128xf32>
    %631 = arith.select %626, %630, %578 : vector<8x128xi1>, vector<8x128xf32>
    %c12_39 = arith.constant 12 : index
    %632 = memref.load %arg2[%c12_39] : memref<16xf32, #tpu.memory_space<smem>>
    %633 = vector.broadcast %632 : f32 to vector<8x128xf32>
    %634 = arith.select %626, %633, %581 : vector<8x128xi1>, vector<8x128xf32>
    %c12_40 = arith.constant 12 : index
    %635 = memref.load %arg4[%c12_40] : memref<224xf32, #tpu.memory_space<smem>>
    %636 = vector.broadcast %635 : f32 to vector<8x128xf32>
    %637 = arith.select %626, %636, %584 : vector<8x128xi1>, vector<8x128xf32>
    %c28 = arith.constant 28 : index
    %638 = memref.load %arg4[%c28] : memref<224xf32, #tpu.memory_space<smem>>
    %639 = vector.broadcast %638 : f32 to vector<8x128xf32>
    %640 = arith.select %626, %639, %587 : vector<8x128xi1>, vector<8x128xf32>
    %c44 = arith.constant 44 : index
    %641 = memref.load %arg4[%c44] : memref<224xf32, #tpu.memory_space<smem>>
    %642 = vector.broadcast %641 : f32 to vector<8x128xf32>
    %643 = arith.select %626, %642, %590 : vector<8x128xi1>, vector<8x128xf32>
    %c60 = arith.constant 60 : index
    %644 = memref.load %arg4[%c60] : memref<224xf32, #tpu.memory_space<smem>>
    %645 = vector.broadcast %644 : f32 to vector<8x128xf32>
    %646 = arith.select %626, %645, %593 : vector<8x128xi1>, vector<8x128xf32>
    %c76 = arith.constant 76 : index
    %647 = memref.load %arg4[%c76] : memref<224xf32, #tpu.memory_space<smem>>
    %648 = vector.broadcast %647 : f32 to vector<8x128xf32>
    %649 = arith.select %626, %648, %596 : vector<8x128xi1>, vector<8x128xf32>
    %c92 = arith.constant 92 : index
    %650 = memref.load %arg4[%c92] : memref<224xf32, #tpu.memory_space<smem>>
    %651 = vector.broadcast %650 : f32 to vector<8x128xf32>
    %652 = arith.select %626, %651, %599 : vector<8x128xi1>, vector<8x128xf32>
    %c108 = arith.constant 108 : index
    %653 = memref.load %arg4[%c108] : memref<224xf32, #tpu.memory_space<smem>>
    %654 = vector.broadcast %653 : f32 to vector<8x128xf32>
    %655 = arith.select %626, %654, %602 : vector<8x128xi1>, vector<8x128xf32>
    %c124 = arith.constant 124 : index
    %656 = memref.load %arg4[%c124] : memref<224xf32, #tpu.memory_space<smem>>
    %657 = vector.broadcast %656 : f32 to vector<8x128xf32>
    %658 = arith.select %626, %657, %605 : vector<8x128xi1>, vector<8x128xf32>
    %c140 = arith.constant 140 : index
    %659 = memref.load %arg4[%c140] : memref<224xf32, #tpu.memory_space<smem>>
    %660 = vector.broadcast %659 : f32 to vector<8x128xf32>
    %661 = arith.select %626, %660, %608 : vector<8x128xi1>, vector<8x128xf32>
    %c156 = arith.constant 156 : index
    %662 = memref.load %arg4[%c156] : memref<224xf32, #tpu.memory_space<smem>>
    %663 = vector.broadcast %662 : f32 to vector<8x128xf32>
    %664 = arith.select %626, %663, %611 : vector<8x128xi1>, vector<8x128xf32>
    %c172 = arith.constant 172 : index
    %665 = memref.load %arg4[%c172] : memref<224xf32, #tpu.memory_space<smem>>
    %666 = vector.broadcast %665 : f32 to vector<8x128xf32>
    %667 = arith.select %626, %666, %614 : vector<8x128xi1>, vector<8x128xf32>
    %c188 = arith.constant 188 : index
    %668 = memref.load %arg4[%c188] : memref<224xf32, #tpu.memory_space<smem>>
    %669 = vector.broadcast %668 : f32 to vector<8x128xf32>
    %670 = arith.select %626, %669, %617 : vector<8x128xi1>, vector<8x128xf32>
    %c204 = arith.constant 204 : index
    %671 = memref.load %arg4[%c204] : memref<224xf32, #tpu.memory_space<smem>>
    %672 = vector.broadcast %671 : f32 to vector<8x128xf32>
    %673 = arith.select %626, %672, %620 : vector<8x128xi1>, vector<8x128xf32>
    %c220 = arith.constant 220 : index
    %674 = memref.load %arg4[%c220] : memref<224xf32, #tpu.memory_space<smem>>
    %675 = vector.broadcast %674 : f32 to vector<8x128xf32>
    %676 = arith.select %626, %675, %623 : vector<8x128xi1>, vector<8x128xf32>
    %c13 = arith.constant 13 : index
    %677 = memref.load %arg1[%c13] : memref<16xf32, #tpu.memory_space<smem>>
    %678 = vector.broadcast %677 : f32 to vector<8x128xf32>
    %679 = arith.cmpf oge, %7, %678 : vector<8x128xf32>
    %680 = arith.extui %679 : vector<8x128xi1> to vector<8x128xi32>
    %681 = arith.addi %628, %680 : vector<8x128xi32>
    %c13_41 = arith.constant 13 : index
    %682 = memref.load %arg1[%c13_41] : memref<16xf32, #tpu.memory_space<smem>>
    %683 = vector.broadcast %682 : f32 to vector<8x128xf32>
    %684 = arith.select %679, %683, %631 : vector<8x128xi1>, vector<8x128xf32>
    %c13_42 = arith.constant 13 : index
    %685 = memref.load %arg2[%c13_42] : memref<16xf32, #tpu.memory_space<smem>>
    %686 = vector.broadcast %685 : f32 to vector<8x128xf32>
    %687 = arith.select %679, %686, %634 : vector<8x128xi1>, vector<8x128xf32>
    %c13_43 = arith.constant 13 : index
    %688 = memref.load %arg4[%c13_43] : memref<224xf32, #tpu.memory_space<smem>>
    %689 = vector.broadcast %688 : f32 to vector<8x128xf32>
    %690 = arith.select %679, %689, %637 : vector<8x128xi1>, vector<8x128xf32>
    %c29 = arith.constant 29 : index
    %691 = memref.load %arg4[%c29] : memref<224xf32, #tpu.memory_space<smem>>
    %692 = vector.broadcast %691 : f32 to vector<8x128xf32>
    %693 = arith.select %679, %692, %640 : vector<8x128xi1>, vector<8x128xf32>
    %c45 = arith.constant 45 : index
    %694 = memref.load %arg4[%c45] : memref<224xf32, #tpu.memory_space<smem>>
    %695 = vector.broadcast %694 : f32 to vector<8x128xf32>
    %696 = arith.select %679, %695, %643 : vector<8x128xi1>, vector<8x128xf32>
    %c61 = arith.constant 61 : index
    %697 = memref.load %arg4[%c61] : memref<224xf32, #tpu.memory_space<smem>>
    %698 = vector.broadcast %697 : f32 to vector<8x128xf32>
    %699 = arith.select %679, %698, %646 : vector<8x128xi1>, vector<8x128xf32>
    %c77 = arith.constant 77 : index
    %700 = memref.load %arg4[%c77] : memref<224xf32, #tpu.memory_space<smem>>
    %701 = vector.broadcast %700 : f32 to vector<8x128xf32>
    %702 = arith.select %679, %701, %649 : vector<8x128xi1>, vector<8x128xf32>
    %c93 = arith.constant 93 : index
    %703 = memref.load %arg4[%c93] : memref<224xf32, #tpu.memory_space<smem>>
    %704 = vector.broadcast %703 : f32 to vector<8x128xf32>
    %705 = arith.select %679, %704, %652 : vector<8x128xi1>, vector<8x128xf32>
    %c109 = arith.constant 109 : index
    %706 = memref.load %arg4[%c109] : memref<224xf32, #tpu.memory_space<smem>>
    %707 = vector.broadcast %706 : f32 to vector<8x128xf32>
    %708 = arith.select %679, %707, %655 : vector<8x128xi1>, vector<8x128xf32>
    %c125 = arith.constant 125 : index
    %709 = memref.load %arg4[%c125] : memref<224xf32, #tpu.memory_space<smem>>
    %710 = vector.broadcast %709 : f32 to vector<8x128xf32>
    %711 = arith.select %679, %710, %658 : vector<8x128xi1>, vector<8x128xf32>
    %c141 = arith.constant 141 : index
    %712 = memref.load %arg4[%c141] : memref<224xf32, #tpu.memory_space<smem>>
    %713 = vector.broadcast %712 : f32 to vector<8x128xf32>
    %714 = arith.select %679, %713, %661 : vector<8x128xi1>, vector<8x128xf32>
    %c157 = arith.constant 157 : index
    %715 = memref.load %arg4[%c157] : memref<224xf32, #tpu.memory_space<smem>>
    %716 = vector.broadcast %715 : f32 to vector<8x128xf32>
    %717 = arith.select %679, %716, %664 : vector<8x128xi1>, vector<8x128xf32>
    %c173 = arith.constant 173 : index
    %718 = memref.load %arg4[%c173] : memref<224xf32, #tpu.memory_space<smem>>
    %719 = vector.broadcast %718 : f32 to vector<8x128xf32>
    %720 = arith.select %679, %719, %667 : vector<8x128xi1>, vector<8x128xf32>
    %c189 = arith.constant 189 : index
    %721 = memref.load %arg4[%c189] : memref<224xf32, #tpu.memory_space<smem>>
    %722 = vector.broadcast %721 : f32 to vector<8x128xf32>
    %723 = arith.select %679, %722, %670 : vector<8x128xi1>, vector<8x128xf32>
    %c205 = arith.constant 205 : index
    %724 = memref.load %arg4[%c205] : memref<224xf32, #tpu.memory_space<smem>>
    %725 = vector.broadcast %724 : f32 to vector<8x128xf32>
    %726 = arith.select %679, %725, %673 : vector<8x128xi1>, vector<8x128xf32>
    %c221 = arith.constant 221 : index
    %727 = memref.load %arg4[%c221] : memref<224xf32, #tpu.memory_space<smem>>
    %728 = vector.broadcast %727 : f32 to vector<8x128xf32>
    %729 = arith.select %679, %728, %676 : vector<8x128xi1>, vector<8x128xf32>
    %c14 = arith.constant 14 : index
    %730 = memref.load %arg1[%c14] : memref<16xf32, #tpu.memory_space<smem>>
    %731 = vector.broadcast %730 : f32 to vector<8x128xf32>
    %732 = arith.cmpf oge, %7, %731 : vector<8x128xf32>
    %733 = arith.extui %732 : vector<8x128xi1> to vector<8x128xi32>
    %734 = arith.addi %681, %733 : vector<8x128xi32>
    %c14_44 = arith.constant 14 : index
    %735 = memref.load %arg1[%c14_44] : memref<16xf32, #tpu.memory_space<smem>>
    %736 = vector.broadcast %735 : f32 to vector<8x128xf32>
    %737 = arith.select %732, %736, %684 : vector<8x128xi1>, vector<8x128xf32>
    %c14_45 = arith.constant 14 : index
    %738 = memref.load %arg2[%c14_45] : memref<16xf32, #tpu.memory_space<smem>>
    %739 = vector.broadcast %738 : f32 to vector<8x128xf32>
    %740 = arith.select %732, %739, %687 : vector<8x128xi1>, vector<8x128xf32>
    %c14_46 = arith.constant 14 : index
    %741 = memref.load %arg4[%c14_46] : memref<224xf32, #tpu.memory_space<smem>>
    %742 = vector.broadcast %741 : f32 to vector<8x128xf32>
    %743 = arith.select %732, %742, %690 : vector<8x128xi1>, vector<8x128xf32>
    %c30 = arith.constant 30 : index
    %744 = memref.load %arg4[%c30] : memref<224xf32, #tpu.memory_space<smem>>
    %745 = vector.broadcast %744 : f32 to vector<8x128xf32>
    %746 = arith.select %732, %745, %693 : vector<8x128xi1>, vector<8x128xf32>
    %c46 = arith.constant 46 : index
    %747 = memref.load %arg4[%c46] : memref<224xf32, #tpu.memory_space<smem>>
    %748 = vector.broadcast %747 : f32 to vector<8x128xf32>
    %749 = arith.select %732, %748, %696 : vector<8x128xi1>, vector<8x128xf32>
    %c62 = arith.constant 62 : index
    %750 = memref.load %arg4[%c62] : memref<224xf32, #tpu.memory_space<smem>>
    %751 = vector.broadcast %750 : f32 to vector<8x128xf32>
    %752 = arith.select %732, %751, %699 : vector<8x128xi1>, vector<8x128xf32>
    %c78 = arith.constant 78 : index
    %753 = memref.load %arg4[%c78] : memref<224xf32, #tpu.memory_space<smem>>
    %754 = vector.broadcast %753 : f32 to vector<8x128xf32>
    %755 = arith.select %732, %754, %702 : vector<8x128xi1>, vector<8x128xf32>
    %c94 = arith.constant 94 : index
    %756 = memref.load %arg4[%c94] : memref<224xf32, #tpu.memory_space<smem>>
    %757 = vector.broadcast %756 : f32 to vector<8x128xf32>
    %758 = arith.select %732, %757, %705 : vector<8x128xi1>, vector<8x128xf32>
    %c110 = arith.constant 110 : index
    %759 = memref.load %arg4[%c110] : memref<224xf32, #tpu.memory_space<smem>>
    %760 = vector.broadcast %759 : f32 to vector<8x128xf32>
    %761 = arith.select %732, %760, %708 : vector<8x128xi1>, vector<8x128xf32>
    %c126 = arith.constant 126 : index
    %762 = memref.load %arg4[%c126] : memref<224xf32, #tpu.memory_space<smem>>
    %763 = vector.broadcast %762 : f32 to vector<8x128xf32>
    %764 = arith.select %732, %763, %711 : vector<8x128xi1>, vector<8x128xf32>
    %c142 = arith.constant 142 : index
    %765 = memref.load %arg4[%c142] : memref<224xf32, #tpu.memory_space<smem>>
    %766 = vector.broadcast %765 : f32 to vector<8x128xf32>
    %767 = arith.select %732, %766, %714 : vector<8x128xi1>, vector<8x128xf32>
    %c158 = arith.constant 158 : index
    %768 = memref.load %arg4[%c158] : memref<224xf32, #tpu.memory_space<smem>>
    %769 = vector.broadcast %768 : f32 to vector<8x128xf32>
    %770 = arith.select %732, %769, %717 : vector<8x128xi1>, vector<8x128xf32>
    %c174 = arith.constant 174 : index
    %771 = memref.load %arg4[%c174] : memref<224xf32, #tpu.memory_space<smem>>
    %772 = vector.broadcast %771 : f32 to vector<8x128xf32>
    %773 = arith.select %732, %772, %720 : vector<8x128xi1>, vector<8x128xf32>
    %c190 = arith.constant 190 : index
    %774 = memref.load %arg4[%c190] : memref<224xf32, #tpu.memory_space<smem>>
    %775 = vector.broadcast %774 : f32 to vector<8x128xf32>
    %776 = arith.select %732, %775, %723 : vector<8x128xi1>, vector<8x128xf32>
    %c206 = arith.constant 206 : index
    %777 = memref.load %arg4[%c206] : memref<224xf32, #tpu.memory_space<smem>>
    %778 = vector.broadcast %777 : f32 to vector<8x128xf32>
    %779 = arith.select %732, %778, %726 : vector<8x128xi1>, vector<8x128xf32>
    %c222 = arith.constant 222 : index
    %780 = memref.load %arg4[%c222] : memref<224xf32, #tpu.memory_space<smem>>
    %781 = vector.broadcast %780 : f32 to vector<8x128xf32>
    %782 = arith.select %732, %781, %729 : vector<8x128xi1>, vector<8x128xf32>
    %c15 = arith.constant 15 : index
    %783 = memref.load %arg1[%c15] : memref<16xf32, #tpu.memory_space<smem>>
    %784 = vector.broadcast %783 : f32 to vector<8x128xf32>
    %785 = arith.cmpf oge, %7, %784 : vector<8x128xf32>
    %786 = arith.extui %785 : vector<8x128xi1> to vector<8x128xi32>
    %787 = arith.addi %734, %786 : vector<8x128xi32>
    %c15_47 = arith.constant 15 : index
    %788 = memref.load %arg1[%c15_47] : memref<16xf32, #tpu.memory_space<smem>>
    %789 = vector.broadcast %788 : f32 to vector<8x128xf32>
    %790 = arith.select %785, %789, %737 : vector<8x128xi1>, vector<8x128xf32>
    %c15_48 = arith.constant 15 : index
    %791 = memref.load %arg2[%c15_48] : memref<16xf32, #tpu.memory_space<smem>>
    %792 = vector.broadcast %791 : f32 to vector<8x128xf32>
    %793 = arith.select %785, %792, %740 : vector<8x128xi1>, vector<8x128xf32>
    %c15_49 = arith.constant 15 : index
    %794 = memref.load %arg4[%c15_49] : memref<224xf32, #tpu.memory_space<smem>>
    %795 = vector.broadcast %794 : f32 to vector<8x128xf32>
    %796 = arith.select %785, %795, %743 : vector<8x128xi1>, vector<8x128xf32>
    %c31 = arith.constant 31 : index
    %797 = memref.load %arg4[%c31] : memref<224xf32, #tpu.memory_space<smem>>
    %798 = vector.broadcast %797 : f32 to vector<8x128xf32>
    %799 = arith.select %785, %798, %746 : vector<8x128xi1>, vector<8x128xf32>
    %c47 = arith.constant 47 : index
    %800 = memref.load %arg4[%c47] : memref<224xf32, #tpu.memory_space<smem>>
    %801 = vector.broadcast %800 : f32 to vector<8x128xf32>
    %802 = arith.select %785, %801, %749 : vector<8x128xi1>, vector<8x128xf32>
    %c63 = arith.constant 63 : index
    %803 = memref.load %arg4[%c63] : memref<224xf32, #tpu.memory_space<smem>>
    %804 = vector.broadcast %803 : f32 to vector<8x128xf32>
    %805 = arith.select %785, %804, %752 : vector<8x128xi1>, vector<8x128xf32>
    %c79 = arith.constant 79 : index
    %806 = memref.load %arg4[%c79] : memref<224xf32, #tpu.memory_space<smem>>
    %807 = vector.broadcast %806 : f32 to vector<8x128xf32>
    %808 = arith.select %785, %807, %755 : vector<8x128xi1>, vector<8x128xf32>
    %c95 = arith.constant 95 : index
    %809 = memref.load %arg4[%c95] : memref<224xf32, #tpu.memory_space<smem>>
    %810 = vector.broadcast %809 : f32 to vector<8x128xf32>
    %811 = arith.select %785, %810, %758 : vector<8x128xi1>, vector<8x128xf32>
    %c111 = arith.constant 111 : index
    %812 = memref.load %arg4[%c111] : memref<224xf32, #tpu.memory_space<smem>>
    %813 = vector.broadcast %812 : f32 to vector<8x128xf32>
    %814 = arith.select %785, %813, %761 : vector<8x128xi1>, vector<8x128xf32>
    %c127 = arith.constant 127 : index
    %815 = memref.load %arg4[%c127] : memref<224xf32, #tpu.memory_space<smem>>
    %816 = vector.broadcast %815 : f32 to vector<8x128xf32>
    %817 = arith.select %785, %816, %764 : vector<8x128xi1>, vector<8x128xf32>
    %c143 = arith.constant 143 : index
    %818 = memref.load %arg4[%c143] : memref<224xf32, #tpu.memory_space<smem>>
    %819 = vector.broadcast %818 : f32 to vector<8x128xf32>
    %820 = arith.select %785, %819, %767 : vector<8x128xi1>, vector<8x128xf32>
    %c159 = arith.constant 159 : index
    %821 = memref.load %arg4[%c159] : memref<224xf32, #tpu.memory_space<smem>>
    %822 = vector.broadcast %821 : f32 to vector<8x128xf32>
    %823 = arith.select %785, %822, %770 : vector<8x128xi1>, vector<8x128xf32>
    %c175 = arith.constant 175 : index
    %824 = memref.load %arg4[%c175] : memref<224xf32, #tpu.memory_space<smem>>
    %825 = vector.broadcast %824 : f32 to vector<8x128xf32>
    %826 = arith.select %785, %825, %773 : vector<8x128xi1>, vector<8x128xf32>
    %c191 = arith.constant 191 : index
    %827 = memref.load %arg4[%c191] : memref<224xf32, #tpu.memory_space<smem>>
    %828 = vector.broadcast %827 : f32 to vector<8x128xf32>
    %829 = arith.select %785, %828, %776 : vector<8x128xi1>, vector<8x128xf32>
    %c207 = arith.constant 207 : index
    %830 = memref.load %arg4[%c207] : memref<224xf32, #tpu.memory_space<smem>>
    %831 = vector.broadcast %830 : f32 to vector<8x128xf32>
    %832 = arith.select %785, %831, %779 : vector<8x128xi1>, vector<8x128xf32>
    %c223 = arith.constant 223 : index
    %833 = memref.load %arg4[%c223] : memref<224xf32, #tpu.memory_space<smem>>
    %834 = vector.broadcast %833 : f32 to vector<8x128xf32>
    %835 = arith.select %785, %834, %782 : vector<8x128xi1>, vector<8x128xf32>
    %836 = arith.subf %7, %790 : vector<8x128xf32>
    %837 = arith.mulf %836, %793 : vector<8x128xf32>
    %cst = arith.constant 1.000000e+00 : f32
    %838 = vector.broadcast %cst : f32 to vector<8x128xf32>
    %839 = arith.subf %838, %837 : vector<8x128xf32>
    %cst_50 = arith.constant 1.000000e+00 : f32
    %840 = vector.broadcast %cst_50 : f32 to vector<8x128xf32>
    %cst_51 = arith.constant 1.000000e+00 : f32
    %841 = vector.broadcast %cst_51 : f32 to vector<8x128xf32>
    %842 = arith.mulf %840, %837 : vector<8x128xf32>
    %843 = arith.mulf %841, %839 : vector<8x128xf32>
    %844 = arith.mulf %842, %837 : vector<8x128xf32>
    %845 = arith.mulf %843, %839 : vector<8x128xf32>
    %846 = arith.mulf %844, %837 : vector<8x128xf32>
    %847 = arith.mulf %845, %839 : vector<8x128xf32>
    %848 = arith.mulf %840, %847 : vector<8x128xf32>
    %849 = arith.mulf %842, %845 : vector<8x128xf32>
    %850 = arith.mulf %844, %843 : vector<8x128xf32>
    %851 = arith.mulf %846, %841 : vector<8x128xf32>
    %852 = arith.mulf %840, %845 : vector<8x128xf32>
    %853 = arith.mulf %842, %843 : vector<8x128xf32>
    %854 = arith.mulf %844, %841 : vector<8x128xf32>
    %855 = arith.mulf %848, %796 : vector<8x128xf32>
    %856 = arith.mulf %849, %802 : vector<8x128xf32>
    %857 = arith.addf %855, %856 : vector<8x128xf32>
    %858 = arith.mulf %850, %808 : vector<8x128xf32>
    %859 = arith.addf %857, %858 : vector<8x128xf32>
    %860 = arith.mulf %851, %814 : vector<8x128xf32>
    %861 = arith.addf %859, %860 : vector<8x128xf32>
    %c0_52 = arith.constant 0 : index
    %c0_53 = arith.constant 0 : index
    %862 = vector.load %arg6[%c0_52, %c0_53] : memref<32x128xf32, #tpu.memory_space<vmem>>, vector<8x128xf32>
    tpu.vector_store %arg6[%c0_52, %c0_53], %861 {strides = array<i32>} : memref<32x128xf32, #tpu.memory_space<vmem>>, vector<8x128xf32>,
    %863 = arith.mulf %852, %820 : vector<8x128xf32>
    %864 = arith.mulf %853, %826 : vector<8x128xf32>
    %865 = arith.addf %863, %864 : vector<8x128xf32>
    %866 = arith.mulf %854, %832 : vector<8x128xf32>
    %867 = arith.addf %865, %866 : vector<8x128xf32>
    %c16_54 = arith.constant 16 : index
    %c0_55 = arith.constant 0 : index
    %868 = vector.load %arg6[%c16_54, %c0_55] : memref<32x128xf32, #tpu.memory_space<vmem>>, vector<8x128xf32>
    tpu.vector_store %arg6[%c16_54, %c0_55], %867 {strides = array<i32>} : memref<32x128xf32, #tpu.memory_space<vmem>>, vector<8x128xf32>,
    %869 = arith.mulf %848, %799 : vector<8x128xf32>
    %870 = arith.mulf %849, %805 : vector<8x128xf32>
    %871 = arith.addf %869, %870 : vector<8x128xf32>
    %872 = arith.mulf %850, %811 : vector<8x128xf32>
    %873 = arith.addf %871, %872 : vector<8x128xf32>
    %874 = arith.mulf %851, %817 : vector<8x128xf32>
    %875 = arith.addf %873, %874 : vector<8x128xf32>
    %c8_56 = arith.constant 8 : index
    %c0_57 = arith.constant 0 : index
    %876 = vector.load %arg6[%c8_56, %c0_57] : memref<32x128xf32, #tpu.memory_space<vmem>>, vector<8x128xf32>
    tpu.vector_store %arg6[%c8_56, %c0_57], %875 {strides = array<i32>} : memref<32x128xf32, #tpu.memory_space<vmem>>, vector<8x128xf32>,
    %877 = arith.mulf %852, %823 : vector<8x128xf32>
    %878 = arith.mulf %853, %829 : vector<8x128xf32>
    %879 = arith.addf %877, %878 : vector<8x128xf32>
    %880 = arith.mulf %854, %835 : vector<8x128xf32>
    %881 = arith.addf %879, %880 : vector<8x128xf32>
    %c24_58 = arith.constant 24 : index
    %c0_59 = arith.constant 0 : index
    %882 = vector.load %arg6[%c24_58, %c0_59] : memref<32x128xf32, #tpu.memory_space<vmem>>, vector<8x128xf32>
    tpu.vector_store %arg6[%c24_58, %c0_59], %881 {strides = array<i32>} : memref<32x128xf32, #tpu.memory_space<vmem>>, vector<8x128xf32>,
    %c0_60 = arith.constant 0 : index
    %c0_61 = arith.constant 0 : index
    %883 = vector.load %arg7[%c0_60, %c0_61] : memref<8x128xi32, #tpu.memory_space<vmem>>, vector<8x128xi32>
    tpu.vector_store %arg7[%c0_60, %c0_61], %787 {strides = array<i32>} : memref<8x128xi32, #tpu.memory_space<vmem>>, vector<8x128xi32>,
    return
  }
  func.func @transform_0(%arg0: i32, %arg1: memref<16xf32, #tpu.memory_space<smem>>, %arg2: memref<16xf32, #tpu.memory_space<smem>>, %arg3: memref<1xf32, #tpu.memory_space<smem>>, %arg4: memref<224xf32, #tpu.memory_space<smem>>) -> (i32, i32) {
    %c0_i32 = arith.constant 0 : i32
    %c0_i32_0 = arith.constant 0 : i32
    return %arg0, %c0_i32 : i32, i32
  }
  func.func @transform_1(%arg0: i32, %arg1: memref<16xf32, #tpu.memory_space<smem>>, %arg2: memref<16xf32, #tpu.memory_space<smem>>, %arg3: memref<1xf32, #tpu.memory_space<smem>>, %arg4: memref<224xf32, #tpu.memory_space<smem>>) -> (i32, i32) {
    %c0_i32 = arith.constant 0 : i32
    %c0_i32_0 = arith.constant 0 : i32
    return %arg0, %c0_i32 : i32, i32
  }
  func.func @transform_2(%arg0: i32, %arg1: memref<16xf32, #tpu.memory_space<smem>>, %arg2: memref<16xf32, #tpu.memory_space<smem>>, %arg3: memref<1xf32, #tpu.memory_space<smem>>, %arg4: memref<224xf32, #tpu.memory_space<smem>>) -> (i32, i32) {
    %c0_i32 = arith.constant 0 : i32
    %c0_i32_0 = arith.constant 0 : i32
    return %arg0, %c0_i32 : i32, i32
  }
}

</mosaic_0001>

<bundles_post_ra>
// kernel: tpu_custom_call.1
= control target key start
LH: loop header
LB: loop body
LE: loop exit
PB: predicated region body
PF: predicated region fallthrough
CT: control target
= control target key end

     0   :  { %s2715_s0 = inlined_call_operand.vmem [shape: f32[16], index: 0, kind: input, shape index: {}]   ;;  %s2716_s2 = inlined_call_operand.<no memory space> [shape: f32[1], index: 2, kind: input, shape index: {}]   ;;  %s2717_s4 = inlined_call_operand.hbm [shape: f32[8,128], index: 4, kind: input, shape index: {}]   ;;  %s2718_s5 = inlined_call_operand.hbm [shape: f32[32,128], index: 5, kind: output, shape index: {0}]   ;;  %s2719_s6 = inlined_call_operand.hbm [shape: s32[8,128], index: 6, kind: output, shape index: {1}]   ;;  %s2720_s3 = inlined_call_operand.vmem [shape: f32[224], index: 3, kind: input, shape index: {}]   ;;  %s2721_s1 = inlined_call_operand.hbm [shape: f32[16], index: 1, kind: input, shape index: {}]  }
   0x1   :  { %2722 = sst [smem:[#allocation111_spill]] %s2718_s5  ;;  %s12_s23 = sshll.u32 %s2715_s0, 4  ;;  %s13_s23 = int_to_ptr.vmem [resolvable:$true] %s12_s23 }
   0x2   :  { %2723 = sst [smem:[#allocation112_spill]] %s2719_s6  ;;  %s19_s26 = sshll.u32 %s2720_s3, 4  ;;  %s20_s26 = int_to_ptr.vmem [resolvable:$true] %s19_s26 }
   0x3   :  { %s1179_s27 = scalar_lea.vmem %s13_s23, 16  ;;  %p1184_p1 = scmp.lt.s32.totalorder %s13_s23, %s13_s23 }
   0x4   :  { %p1180_p0 = scmp.ne.s32.totalorder %s13_s23, %s1179_s27  ;;  %p1185_p2 = scmp.lt.s32.totalorder %s1179_s27, %s1179_s27 }
   0x6   :  { %p1186_p3 = por %p1185_p2, %p1184_p1 }
   0x8   :  { %p1187_p4 = pnand %p1186_p3, %p1180_p0 }
   0xa   :  { %1190 = shalt.err (!%p1187_p4)  }
   0xb   :  { %s1279_s28 = smov [#allocation3]   ;;  %s1280_s29 = smov [#allocation4]  }
   0xc   :  { %15 = dma.vmem_to_smem %s13_s23, 16, %s1279_s28, [#allocation2] }
   0xd   :  { %17 = dma.hbm_to_smem %s2721_s1, 16, %s1280_s29, [#allocation2] }
   0xe   :  { %s1199_s0 = scalar_lea.vmem %s20_s26, 32  ;;  %p1204_p6 = scmp.lt.s32.totalorder %s20_s26, %s20_s26 }
   0xf   :  { %p1200_p5 = scmp.ne.s32.totalorder %s20_s26, %s1199_s0  ;;  %p1205_p7 = scmp.lt.s32.totalorder %s1199_s0, %s1199_s0 }
  0x11   :  { %p1206_p8 = por %p1205_p7, %p1204_p6 }
  0x13   :  { %p1207_p9 = pnand %p1206_p8, %p1200_p5 }
  0x15   :  { %1210 = shalt.err (!%p1207_p9)  }
  0x16   :  { %s1281_s3 = smov [#allocation6]  }
  0x17   :  { %22 = dma.vmem_to_smem %s20_s26, 32, %s1281_s3, [#allocation2] }
  0x18   :  { %1271 = dma.done.wait [#allocation2], 64 }
  0x19   :  { %1272 = vsyncadd [#allocation2], 4294967232 }
  0x1a   :  { %24 = sfence }
  0x1b   :  { %25 = vsyncpa [#allocation8], 0 }
  0x1c   :  { %26 = vsyncpa [#allocation9], 0 }
  0x1d   :  { %27 = vsyncpa [#allocation12], 0  ;;  %s1282_s8 = smov [#allocation7]  }
  0x1e   :  { %s34_s9 = sshll.u32 %s1282_s8, 4  ;;  %s35_s9 = int_to_ptr.vmem [resolvable:$true] %s34_s9 }
  0x1f   :  { %s1219_s10 = scalar_lea.vmem %s35_s9, 128  ;;  %p1224_p11 = scmp.lt.s32.totalorder %s35_s9, %s35_s9 }
  0x20   :  { %p1220_p10 = scmp.ne.s32.totalorder %s35_s9, %s1219_s10  ;;  %p1225_p12 = scmp.lt.s32.totalorder %s1219_s10, %s1219_s10 }
  0x22   :  { %p1226_p13 = por %p1225_p12, %p1224_p11 }
  0x24   :  { %p1227_p0 = pnand %p1226_p13, %p1220_p10 }
  0x26   :  { %1230 = shalt.err (!%p1227_p0)
}
  0x27   :  { %37 = dma.hbm_to_vmem [thread:$0]  %s2717_s4, 128, %s35_s9, [#allocation8]  }
  0x28   :  { %1273 = dma.done.wait [#allocation8], 128  }
  0x29   :  { %1274 = vsyncadd [#allocation8], 4294967168  ;;  %s1335_s12 = sld [smem:[#allocation3]]  ;;  %v43_v0 = vstv %s2716_s2  ;;  %v41_v2 = vld [vmem:[#allocation7] sm:$0xff]  ;;  %v1283_v28 = vmov 0  }
  0x2a   :  { %s1337_s13 = sld [smem:[#allocation4]]  ;;  %1177 = vrcp.f32 %v43_v0 }
  0x2b   :  { %s1339_s14 = sld [smem:[#allocation6]] }
  0x2c   :  { %s1341_s15 = sld [smem:[#allocation6 + $0x10]] }
  0x2d   :  { %s1343_s16 = sld [smem:[#allocation6 + $0x20]] }
  0x2e   :  { %s1345_s17 = sld [smem:[#allocation6 + $0x30]] }
  0x2f   :  { %s1347_s18 = sld [smem:[#allocation6 + $0x40]]  ;;  %v69_v7 = vstv %s1335_s12 }
  0x30   :  { %s1349_s19 = sld [smem:[#allocation6 + $0x50]]  ;;  %v73_v9 = vstv %s1337_s13 }
  0x31   :  { %s1351_s20 = sld [smem:[#allocation6 + $0x60]]  ;;  %v77_v10 = vstv %s1339_s14 }
  0x32   :  { %s1353_s4 = sld [smem:[#allocation6 + $0x70]]  ;;  %v81_v11 = vstv %s1341_s15 }
  0x33   :  { %s1355_s21 = sld [smem:[#allocation6 + $0x80]]  ;;  %v85_v12 = vstv %s1343_s16 }
  0x34   :  { %s1357_s22 = sld [smem:[#allocation6 + $0x90]]  ;;  %v89_v13 = vstv %s1345_s17 }
  0x35   :  { %s1359_s23 = sld [smem:[#allocation6 + $0xa0]]  ;;  %v93_v14 = vstv %s1347_s18 }
  0x36   :  { %s1361_s24 = sld [smem:[#allocation6 + $0xb0]]  ;;  %v97_v15 = vstv %s1349_s19 }
  0x37   :  { %s1363_s25 = sld [smem:[#allocation6 + $0xc0]]  ;;  %v1178_v1 = vpop.eup %1177  ;;  %v101_v16 = vstv %s1351_s20 }
  0x38   :  { %s1365_s26 = sld [smem:[#allocation6 + $0xd0]]  ;;  %v45_v3 = vmul.f32 %v1178_v1, %v41_v2  ;;  %v105_v17 = vstv %s1353_s4 }
  0x39   :  { %s1367_s27 = sld [smem:[#allocation3 + $0x1]]  ;;  %v109_v18 = vstv %s1355_s21 }
  0x3a   :  { %s1369_s28 = sld [smem:[#allocation4 + $0x1]]  ;;  %v46_v4 = vfloor.f32 %v45_v3  ;;  %v113_v19 = vstv %s1357_s22 }
  0x3b   :  { %s1371_s29 = sld [smem:[#allocation6 + $0x1]]  ;;  %v117_v23 = vstv %s1359_s23 }
  0x3c   :  { %s1373_s30 = sld [smem:[#allocation6 + $0x11]]  ;;  %v47_v5 = vmul.f32 %v46_v4, %v43_v0  ;;  %v121_v26 = vstv %s1361_s24 }
  0x3d   :  { %2724 = sst [smem:[#allocation17_spill]] %s1363_s25 }
  0x3e   :  { %2725 = sst [smem:[#allocation18_spill]] %s1365_s26  ;;  %v1582_v6 = vsub.f32 %v41_v2, %v47_v5 }
  0x3f   :  { %s1375_s7 = sld [smem:[#allocation6 + $0x21]]  ;;  %v66_v8 = vstv %s1367_s27 }
  0x40   :  { %s1377_s0 = sld [smem:[#allocation6 + $0x31]]  ;;  %vm1606_vm0 = vcmp.ge.f32.partialorder %v1582_v6, %v66_v8  ;;  %v72_v21 = vstv %s1369_s28 }
  0x41   :  { %s1379_s3 = sld [smem:[#allocation6 + $0x41]]  ;;  %v76_v22 = vstv %s1371_s29  ;;  %v68_v29 = vsel %vm1606_vm0, 1, %v1283_v28  ;;  %v70_v33 = vsel %vm1606_vm0, %v66_v8, %v69_v7  ;;  %v74_v34 = vsel %vm1606_vm0, %v72_v21, %v73_v9 }
  0x42   :  { %s1381_s8 = sld [smem:[#allocation6 + $0x51]]  ;;  %v80_v24 = vstv %s1373_s30  ;;  %v78_v35 = vsel %vm1606_vm0, %v76_v22, %v77_v10 }
  0x43   :  { %s1383_s9 = sld [smem:[#allocation6 + $0x61]]  ;;  %v82_v37 = vsel %vm1606_vm0, %v80_v24, %v81_v11 }
  0x44   :  { %s1385_s10 = sld [smem:[#allocation6 + $0x71]] }
  0x45   :  { %s1387_s1 = sld [smem:[#allocation6 + $0x81]]  ;;  %v84_v25 = vstv %s1375_s7 }
  0x46   :  { %2726 = sst [smem:[#allocation19_spill]] %s1377_s0  ;;  %v86_v38 = vsel %vm1606_vm0, %v84_v25, %v85_v12 }
  0x47   :  { %2727 = sst [smem:[#allocation20_spill]] %s1379_s3 }
  0x48   :  { %2728 = sst [smem:[#allocation21_spill]] %s1381_s8 }
  0x49   :  { %2729 = sst [smem:[#allocation22_spill]] %s1383_s9 }
  0x4a   :  { %2730 = sst [smem:[#allocation23_spill]] %s1385_s10 }
  0x4b   :  { %2731 = sst [smem:[#allocation24_spill]] %s1387_s1 }
  0x4c   :  { %s1389_s11 = sld [smem:[#allocation6 + $0x91]] }
  0x4d   :  { %s1391_s5 = sld [smem:[#allocation6 + $0xa1]] }
  0x4e   :  { %s1393_s6 = sld [smem:[#allocation6 + $0xb1]] }
  0x4f   :  { %s1395_s26 = sld [smem:[#allocation6 + $0xc1]] }
  0x50   :  { %s1397_s25 = sld [smem:[#allocation6 + $0xd1]] }
  0x51   :  { %s1399_s0 = sld [smem:[#allocation3 + $0x2]] }
  0x52   :  { %2732 = sst [smem:[#allocation25_spill]] %s1389_s11 }
  0x53   :  { %2733 = sst [smem:[#allocation26_spill]] %s1391_s5 }
  0x54   :  { %2734 = sst [smem:[#allocation27_spill]] %s1393_s6 }
  0x55   :  { %2735 = sst [smem:[#allocation28_spill]] %s1395_s26 }
  0x56   :  { %2736 = sst [smem:[#allocation29_spill]] %s1397_s25 }
  0x57   :  { %2737 = sst [smem:[#allocation30_spill]] %s1399_s0 }
  0x58   :  { %s1401_s3 = sld [smem:[#allocation4 + $0x2]] }
  0x59   :  { %s1403_s8 = sld [smem:[#allocation6 + $0x2]] }
  0x5a   :  { %s1405_s9 = sld [smem:[#allocation6 + $0x12]] }
  0x5b   :  { %s1407_s10 = sld [smem:[#allocation6 + $0x22]] }
  0x5c   :  { %s1409_s1 = sld [smem:[#allocation6 + $0x32]] }
  0x5d   :  { %s1411_s11 = sld [smem:[#allocation6 + $0x42]] }
  0x5e   :  { %2738 = sst [smem:[#allocation31_spill]] %s1401_s3 }
  0x5f   :  { %2739 = sst [smem:[#allocation32_spill]] %s1403_s8 }
  0x60   :  { %2740 = sst [smem:[#allocation33_spill]] %s1405_s9 }
  0x61   :  { %2741 = sst [smem:[#allocation34_spill]] %s1407_s10 }
  0x62   :  { %2742 = sst [smem:[#allocation35_spill]] %s1409_s1 }
  0x63   :  { %2743 = sst [smem:[#allocation36_spill]] %s1411_s11 }
  0x64   :  { %s1413_s5 = sld [smem:[#allocation6 + $0x52]] }
  0x65   :  { %s1415_s6 = sld [smem:[#allocation6 + $0x62]] }
  0x66   :  { %s1417_s26 = sld [smem:[#allocation6 + $0x72]] }
  0x67   :  { %s1419_s25 = sld [smem:[#allocation6 + $0x82]] }
  0x68   :  { %s1421_s0 = sld [smem:[#allocation6 + $0x92]] }
  0x69   :  { %s1423_s3 = sld [smem:[#allocation6 + $0xa2]] }
  0x6a   :  { %2744 = sst [smem:[#allocation37_spill]] %s1413_s5 }
  0x6b   :  { %2745 = sst [smem:[#allocation38_spill]] %s1415_s6 }
  0x6c   :  { %2746 = sst [smem:[#allocation39_spill]] %s1417_s26 }
  0x6d   :  { %2747 = sst [smem:[#allocation40_spill]] %s1419_s25 }
  0x6e   :  { %2748 = sst [smem:[#allocation41_spill]] %s1421_s0 }
  0x6f   :  { %2749 = sst [smem:[#allocation42_spill]] %s1423_s3 }
  0x70   :  { %s1425_s8 = sld [smem:[#allocation6 + $0xb2]] }
  0x71   :  { %s1427_s9 = sld [smem:[#allocation6 + $0xc2]] }
  0x72   :  { %s1429_s10 = sld [smem:[#allocation6 + $0xd2]] }
  0x73   :  { %s1431_s1 = sld [smem:[#allocation3 + $0x3]] }
  0x74   :  { %s1433_s11 = sld [smem:[#allocation4 + $0x3]] }
  0x75   :  { %s1435_s5 = sld [smem:[#allocation6 + $0x3]] }
  0x76   :  { %2750 = sst [smem:[#allocation43_spill]] %s1425_s8 }
  0x77   :  { %2751 = sst [smem:[#allocation44_spill]] %s1427_s9 }
  0x78   :  { %2752 = sst [smem:[#allocation45_spill]] %s1429_s10 }
  0x79   :  { %2753 = sst [smem:[#allocation46_spill]] %s1431_s1 }
  0x7a   :  { %2754 = sst [smem:[#allocation47_spill]] %s1433_s11 }
  0x7b   :  { %2755 = sst [smem:[#allocation48_spill]] %s1435_s5 }
  0x7c   :  { %s1437_s6 = sld [smem:[#allocation6 + $0x13]] }
  0x7d   :  { %s1439_s26 = sld [smem:[#allocation6 + $0x23]] }
  0x7e   :  { %s1441_s25 = sld [smem:[#allocation6 + $0x33]] }
  0x7f   :  { %s1443_s0 = sld [smem:[#allocation6 + $0x43]] }
  0x80   :  { %s1445_s3 = sld [smem:[#allocation6 + $0x53]] }
  0x81   :  { %s1447_s8 = sld [smem:[#allocation6 + $0x63]] }
  0x82   :  { %2756 = sst [smem:[#allocation49_spill]] %s1437_s6 }
  0x83   :  { %2757 = sst [smem:[#allocation50_spill]] %s1439_s26 }
  0x84   :  { %2758 = sst [smem:[#allocation51_spill]] %s1441_s25 }
  0x85   :  { %2759 = sst [smem:[#allocation52_spill]] %s1443_s0 }
  0x86   :  { %2760 = sst [smem:[#allocation53_spill]] %s1445_s3 }
  0x87   :  { %2761 = sst [smem:[#allocation54_spill]] %s1447_s8 }
  0x88   :  { %s1449_s9 = sld [smem:[#allocation6 + $0x73]] }
  0x89   :  { %s1451_s10 = sld [smem:[#allocation6 + $0x83]] }
  0x8a   :  { %s1453_s1 = sld [smem:[#allocation6 + $0x93]] }
  0x8b   :  { %s1455_s11 = sld [smem:[#allocation6 + $0xa3]] }
  0x8c   :  { %s1457_s5 = sld [smem:[#allocation6 + $0xb3]] }
  0x8d   :  { %s1459_s6 = sld [smem:[#allocation6 + $0xc3]] }
  0x8e   :  { %2762 = sst [smem:[#allocation55_spill]] %s1449_s9 }
  0x8f   :  { %2763 = sst [smem:[#allocation56_spill]] %s1451_s10 }
  0x90   :  { %2764 = sst [smem:[#allocation57_spill]] %s1453_s1 }
  0x91   :  { %2765 = sst [smem:[#allocation58_spill]] %s1455_s11 }
  0x92   :  { %2766 = sst [smem:[#allocation59_spill]] %s1457_s5 }
  0x93   :  { %2767 = sst [smem:[#allocation60_spill]] %s1459_s6 }
  0x94   :  { %s1461_s26 = sld [smem:[#allocation6 + $0xd3]] }
  0x95   :  { %s1463_s25 = sld [smem:[#allocation3 + $0x4]] }
  0x96   :  { %s1465_s0 = sld [smem:[#allocation4 + $0x4]] }
  0x97   :  { %s1467_s3 = sld [smem:[#allocation6 + $0x4]] }
  0x98   :  { %s1469_s8 = sld [smem:[#allocation6 + $0x14]] }
  0x99   :  { %s1471_s9 = sld [smem:[#allocation6 + $0x24]] }
  0x9a   :  { %2768 = sst [smem:[#allocation61_spill]] %s1461_s26 }
  0x9b   :  { %2769 = sst [smem:[#allocation62_spill]] %s1463_s25 }
  0x9c   :  { %2770 = sst [smem:[#allocation63_spill]] %s1465_s0 }
  0x9d   :  { %2771 = sst [smem:[#allocation64_spill]] %s1467_s3 }
  0x9e   :  { %2772 = sst [smem:[#allocation65_spill]] %s1469_s8 }
  0x9f   :  { %2773 = sst [smem:[#allocation66_spill]] %s1471_s9 }
  0xa0   :  { %s1473_s10 = sld [smem:[#allocation6 + $0x34]] }
  0xa1   :  { %s1475_s1 = sld [smem:[#allocation6 + $0x44]] }
  0xa2   :  { %s1477_s11 = sld [smem:[#allocation6 + $0x54]] }
  0xa3   :  { %s1479_s5 = sld [smem:[#allocation6 + $0x64]] }
  0xa4   :  { %s1481_s6 = sld [smem:[#allocation6 + $0x74]] }
  0xa5   :  { %s1483_s26 = sld [smem:[#allocation6 + $0x84]] }
  0xa6   :  { %2774 = sst [smem:[#allocation67_spill]] %s1473_s10 }
  0xa7   :  { %2775 = sst [smem:[#allocation68_spill]] %s1475_s1 }
  0xa8   :  { %2776 = sst [smem:[#allocation69_spill]] %s1477_s11 }
  0xa9   :  { %2777 = sst [smem:[#allocation70_spill]] %s1479_s5 }
  0xaa   :  { %2778 = sst [smem:[#allocation71_spill]] %s1481_s6 }
  0xab   :  { %2779 = sst [smem:[#allocation72_spill]] %s1483_s26 }
  0xac   :  { %s1485_s25 = sld [smem:[#allocation6 + $0x94]] }
  0xad   :  { %s1487_s0 = sld [smem:[#allocation6 + $0xa4]] }
  0xae   :  { %s1489_s3 = sld [smem:[#allocation6 + $0xb4]] }
  0xaf   :  { %s1491_s8 = sld [smem:[#allocation6 + $0xc4]] }
  0xb0   :  { %s1493_s9 = sld [smem:[#allocation6 + $0xd4]] }
  0xb1   :  { %s1495_s10 = sld [smem:[#allocation3 + $0x5]] }
  0xb2   :  { %2780 = sst [smem:[#allocation73_spill]] %s1485_s25 }
  0xb3   :  { %2781 = sst [smem:[#allocation74_spill]] %s1487_s0 }
  0xb4   :  { %2782 = sst [smem:[#allocation75_spill]] %s1489_s3 }
  0xb5   :  { %2783 = sst [smem:[#allocation76_spill]] %s1491_s8 }
  0xb6   :  { %2784 = sst [smem:[#allocation77_spill]] %s1493_s9 }
  0xb7   :  { %2785 = sst [smem:[#allocation78_spill]] %s1495_s10 }
  0xb8   :  { %s1497_s1 = sld [smem:[#allocation4 + $0x5]] }
  0xb9   :  { %s1499_s11 = sld [smem:[#allocation6 + $0x5]] }
  0xba   :  { %s1501_s5 = sld [smem:[#allocation6 + $0x15]] }
  0xbb   :  { %s1503_s6 = sld [smem:[#allocation6 + $0x25]] }
  0xbc   :  { %s1505_s26 = sld [smem:[#allocation6 + $0x35]] }
  0xbd   :  { %s1507_s25 = sld [smem:[#allocation6 + $0x45]] }
  0xbe   :  { %2786 = sst [smem:[#allocation79_spill]] %s1497_s1 }
  0xbf   :  { %2787 = sst [smem:[#allocation80_spill]] %s1499_s11 }
  0xc0   :  { %2788 = sst [smem:[#allocation81_spill]] %s1501_s5 }
  0xc1   :  { %2789 = sst [smem:[#allocation82_spill]] %s1503_s6 }
  0xc2   :  { %2790 = sst [smem:[#allocation83_spill]] %s1505_s26 }
  0xc3   :  { %2791 = sst [smem:[#allocation84_spill]] %s1507_s25 }
  0xc4   :  { %s1509_s0 = sld [smem:[#allocation6 + $0x55]] }
  0xc5   :  { %s1511_s3 = sld [smem:[#allocation6 + $0x65]] }
  0xc6   :  { %s1513_s8 = sld [smem:[#allocation6 + $0x75]] }
  0xc7   :  { %s1515_s9 = sld [smem:[#allocation6 + $0x85]] }
  0xc8   :  { %s1520_s11 = sld [smem:[#allocation6 + $0x95]] }
  0xc9   :  { %s1522_s5 = sld [smem:[#allocation6 + $0xa5]] }
  0xca   :  { %2792 = sst [smem:[#allocation85_spill]] %s1509_s0 }
  0xcb   :  { %2793 = sst [smem:[#allocation86_spill]] %s1511_s3 }
  0xcc   :  { %2794 = sst [smem:[#allocation87_spill]] %s1513_s8 }
  0xcd   :  { %2795 = sst [smem:[#allocation88_spill]] %s1515_s9 }
  0xce   :  { %s1524_s6 = sld [smem:[#allocation6 + $0xb5]] }
  0xcf   :  { %2796 = sst [smem:[#allocation89_spill]] %s1522_s5 }
  0xd0   :  { %s1526_s25 = sld [smem:[#allocation6 + $0xc5]] }
  0xd1   :  { %s1528_s0 = sld [smem:[#allocation6 + $0xd5]] }
  0xd2   :  { %s1530_s3 = sld [smem:[#allocation3 + $0x6]] }
  0xd3   :  { %s1532_s8 = sld [smem:[#allocation4 + $0x6]] }
  0xd4   :  { %2797 = sst [smem:[#allocation90_spill]] %s1524_s6 }
  0xd5   :  { %s1534_s9 = sld [smem:[#allocation6 + $0x6]] }
  0xd6   :  { %2798 = sst [smem:[#allocation91_spill]] %s1526_s25 }
  0xd7   :  { %2799 = sst [smem:[#allocation92_spill]] %s1528_s0 }
  0xd8   :  { %s1536_s26 = sld [smem:[#allocation6 + $0x16]] }
  0xd9   :  { %2800 = sst [smem:[#allocation93_spill]] %s1532_s8 }
  0xda   :  { %s1538_s2 = sld [smem:[#allocation6 + $0x26]] }
  0xdb   :  { %2801 = sst [smem:[#allocation94_spill]] %s1534_s9 }
  0xdc   :  { %s1540_s10 = sld [smem:[#allocation6 + $0x36]] }
  0xdd   :  { %s1542_s1 = sld [smem:[#allocation6 + $0x46]] }
  0xde   :  { %2802 = sst [smem:[#allocation95_spill]] %s1536_s26 }
  0xdf   :  { %s1544_s6 = sld [smem:[#allocation6 + $0x56]] }
  0xe0   :  { %s1546_s5 = sld [smem:[#allocation6 + $0x66]] }
  0xe1   :  { %s1548_s25 = sld [smem:[#allocation6 + $0x76]] }
  0xe2   :  { %2803 = sst [smem:[#allocation96_spill]] %s1540_s10 }
  0xe3   :  { %2804 = sst [smem:[#allocation97_spill]] %s1542_s1 }
  0xe4   :  { %s1550_s0 = sld [smem:[#allocation6 + $0x86]] }
  0xe5   :  { %s1552_s8 = sld [smem:[#allocation6 + $0x96]] }
  0xe6   :  { %2805 = sst [smem:[#allocation98_spill]] %s1546_s5 }
  0xe7   :  { %2806 = sst [smem:[#allocation99_spill]] %s1548_s25 }
  0xe8   :  { %s1554_s9 = sld [smem:[#allocation6 + $0xa6]] }
  0xe9   :  { %s1556_s26 = sld [smem:[#allocation6 + $0xb6]] }
  0xea   :  { %2807 = sst [smem:[#allocation100_spill]] %s1550_s0 }
  0xeb   :  { %2808 = sst [smem:[#allocation101_spill]] %s1552_s8 }
  0xec   :  { %s1558_s10 = sld [smem:[#allocation6 + $0xc6]] }
  0xed   :  { %s1560_s1 = sld [smem:[#allocation6 + $0xd6]] }
  0xee   :  { %2809 = sst [smem:[#allocation102_spill]] %s1554_s9 }
  0xef   :  { %2810 = sst [smem:[#allocation103_spill]] %s1556_s26 }
  0xf0   :  { %s1562_s5 = sld [smem:[#allocation3 + $0x7]] }
  0xf1   :  { %s1564_s25 = sld [smem:[#allocation4 + $0x7]] }
  0xf2   :  { %2811 = sst [smem:[#allocation104_spill]] %s1558_s10 }
  0xf3   :  { %2812 = sst [smem:[#allocation105_spill]] %s1560_s1 }
  0xf4   :  { %s1566_s8 = sld [smem:[#allocation6 + $0x7]] }
  0xf5   :  { %s1568_s9 = sld [smem:[#allocation6 + $0x17]] }
  0xf6   :  { %s1570_s26 = sld [smem:[#allocation6 + $0x27]] }
  0xf7   :  { %2813 = sst [smem:[#allocation106_spill]] %s1564_s25 }
  0xf8   :  { %s1572_s10 = sld [smem:[#allocation6 + $0x37]] }
  0xf9   :  { %s1574_s1 = sld [smem:[#allocation6 + $0x47]] }
  0xfa   :  { %2814 = sst [smem:[#allocation107_spill]] %s1566_s8 }
  0xfb   :  { %s1576_s0 = sld [smem:[#allocation6 + $0x57]] }
  0xfc   :  { %2815 = sst [smem:[#allocation108_spill]] %s1570_s26 }
  0xfd   :  { %s1578_s25 = sld [smem:[#allocation6 + $0x67]] }
  0xfe   :  { %s1580_s8 = sld [smem:[#allocation6 + $0x77]] }
  0xff   :  { %s1585_s26 = sld [smem:[#allocation6 + $0x87]] }
 0x100   :  { %s1597_s12 = sld [smem:[#allocation6 + $0xa7]] }
 0x101   :  { %2816 = sst [smem:[#allocation109_spill]] %s1576_s0 }
 0x102   :  { %s1591_s0 = sld [smem:[#allocation6 + $0x97]] }
 0x103   :  { %s2819_s27 = sld [smem:[#allocation19_spill]] }
 0x104   :  { %2817 = sst [smem:[#allocation110_spill]] %s1580_s8 }
 0x105   :  { %s2818_s8 = sld [smem:[#allocation17_spill]] }
 0x106   :  { %s2820_s13 = sld [smem:[#allocation20_spill]] }
 0x107   :  { %s2821_s14 = sld [smem:[#allocation18_spill]] }
 0x108   :  { %s1603_s15 = sld [smem:[#allocation6 + $0xb7]] }
 0x109   :  { %s2824_s16 = sld [smem:[#allocation21_spill]]  ;;  %v88_v30 = vstv %s2819_s27 }
 0x10a   :  { %s1613_s17 = sld [smem:[#allocation6 + $0xc7]]  ;;  %v90_v41 = vsel %vm1606_vm0, %v88_v30, %v89_v13 }
 0x10b   :  { %s2825_s18 = sld [smem:[#allocation22_spill]]  ;;  %v125_v27 = vstv %s2818_s8 }
 0x10c   :  { %s2826_s19 = sld [smem:[#allocation30_spill]]  ;;  %v92_v31 = vstv %s2820_s13 }
 0x10d   :  { %s1619_s20 = sld [smem:[#allocation6 + $0xd7]]  ;;  %v129_v32 = vstv %s2821_s14  ;;  %v94_v42 = vsel %vm1606_vm0, %v92_v31, %v93_v14 }
 0x10e   :  { %s2827_s4 = sld [smem:[#allocation23_spill]] }
 0x10f   :  { %s2828_s21 = sld [smem:[#allocation24_spill]]  ;;  %v96_v36 = vstv %s2824_s16 }
 0x110   :  { %s1627_s22 = sld [smem:[#allocation3 + $0x8]]  ;;  %v98_v45 = vsel %vm1606_vm0, %v96_v36, %v97_v15 }
 0x111   :  { %s2829_s23 = sld [smem:[#allocation25_spill]]  ;;  %v100_v39 = vstv %s2825_s18 }
 0x112   :  { %s2830_s24 = sld [smem:[#allocation26_spill]]  ;;  %v132_v40 = vstv %s2826_s19  ;;  %v102_v49 = vsel %vm1606_vm0, %v100_v39, %v101_v16 }
 0x113   :  { %s2831_s28 = sld [smem:[#allocation27_spill]]  ;;  %vm1666_vm1 = vcmp.ge.f32.partialorder %v1582_v6, %v132_v40 }
 0x114   :  { %s1636_s29 = sld [smem:[#allocation4 + $0x8]]  ;;  %v104_v43 = vstv %s2827_s4  ;;  %v134_v55 = vsel %vm1666_vm1, 1, %v1283_v28  ;;  %v136_v2 = vsel %vm1666_vm1, %v132_v40, %v70_v33 }
 0x115   :  { %s2832_s30 = sld [smem:[#allocation28_spill]]  ;;  %v108_v44 = vstv %s2828_s21  ;;  %v106_v53 = vsel %vm1606_vm0, %v104_v43, %v105_v17  ;;  %v135_v1 = vadd.s32 %v134_v55, %v68_v29 }
 0x116   :  { %s2833_s7 = sld [smem:[#allocation29_spill]]  ;;  %v110_v54 = vsel %vm1606_vm0, %v108_v44, %v109_v18 }
 0x117   :  { %s1644_s8 = sld [smem:[#allocation6 + $0x8]]  ;;  %v112_v46 = vstv %s2829_s23 }
 0x118   :  { %s2835_s27 = sld [smem:[#allocation31_spill]]  ;;  %v116_v47 = vstv %s2830_s24  ;;  %v114_v57 = vsel %vm1606_vm0, %v112_v46, %v113_v19 }
 0x119   :  { %s1652_s13 = sld [smem:[#allocation6 + $0x18]]  ;;  %v120_v48 = vstv %s2831_s28  ;;  %v118_v58 = vsel %vm1606_vm0, %v116_v47, %v117_v23 }
 0x11a   :  { %s2837_s14 = sld [smem:[#allocation32_spill]]  ;;  %v122_v59 = vsel %vm1606_vm0, %v120_v48, %v121_v26 }
 0x11b   :  { %s1659_s16 = sld [smem:[#allocation6 + $0x28]]  ;;  %v124_v50 = vstv %s2832_s30 }
 0x11c   :  { %s2839_s18 = sld [smem:[#allocation33_spill]]  ;;  %v128_v51 = vstv %s2833_s7  ;;  %v126_v61 = vsel %vm1606_vm0, %v124_v50, %v125_v27 }
 0x11d   :  { %2834 = sst [smem:[#allocation17_spill]] %s1644_s8  ;;  %v130_v62 = vsel %vm1606_vm0, %v128_v51, %v129_v32 }
 0x11e   :  { %s2840_s19 = sld [smem:[#allocation34_spill]]  ;;  %v138_v56 = vstv %s2835_s27 }
 0x11f   :  { %2836 = sst [smem:[#allocation19_spill]] %s1652_s13  ;;  %v139_v3 = vsel %vm1666_vm1, %v138_v56, %v74_v34 }
 0x120   :  { %s1670_s4 = sld [smem:[#allocation6 + $0x38]]  ;;  %v141_v60 = vstv %s2837_s14 }
 0x121   :  { %2838 = sst [smem:[#allocation20_spill]] %s1659_s16  ;;  %v142_v5 = vsel %vm1666_vm1, %v141_v60, %v78_v35 }
 0x122   :  { %s2844_s21 = sld [smem:[#allocation35_spill]]  ;;  %v144_v63 = vstv %s2839_s18 }
 0x123   :  { %s1680_s23 = sld [smem:[#allocation6 + $0x48]]  ;;  %v145_v10 = vsel %vm1666_vm1, %v144_v63, %v82_v37 }
 0x124   :  { %s2846_s24 = sld [smem:[#allocation36_spill]]  ;;  %v147_v0 = vstv %s2840_s19 }
 0x125   :  { %s2847_s28 = sld [smem:[#allocation37_spill]]  ;;  %v148_v11 = vsel %vm1666_vm1, %v147_v0, %v86_v38 }
 0x126   :  { %2843 = sst [smem:[#allocation18_spill]] %s1670_s4 }
 0x127   :  { %s2848_s30 = sld [smem:[#allocation38_spill]] }
 0x128   :  { %s1689_s7 = sld [smem:[#allocation6 + $0x58]]  ;;  %v150_v4 = vstv %s2844_s21 }
 0x129   :  { %2845 = sst [smem:[#allocation21_spill]] %s1680_s23  ;;  %v151_v14 = vsel %vm1666_vm1, %v150_v4, %v90_v41 }
 0x12a   :  { %s2850_s27 = sld [smem:[#allocation39_spill]]  ;;  %v153_v7 = vstv %s2846_s24 }
 0x12b   :  { %s2851_s23 = sld [smem:[#allocation40_spill]]  ;;  %v156_v8 = vstv %s2847_s28  ;;  %v154_v18 = vsel %vm1666_vm1, %v153_v7, %v94_v42 }
 0x12c   :  { %s1697_s4 = sld [smem:[#allocation6 + $0x68]]  ;;  %v157_v19 = vsel %vm1666_vm1, %v156_v8, %v98_v45 }
 0x12d   :  { %s2853_s16 = sld [smem:[#allocation41_spill]]  ;;  %v159_v9 = vstv %s2848_s30 }
 0x12e   :  { %2849 = sst [smem:[#allocation22_spill]] %s1689_s7  ;;  %v160_v20 = vsel %vm1666_vm1, %v159_v9, %v102_v49 }
 0x12f   :  { %s2854_s14 = sld [smem:[#allocation42_spill]] }
 0x130   :  { %s2855_s7 = sld [smem:[#allocation46_spill]]  ;;  %v162_v12 = vstv %s2850_s27 }
 0x131   :  { %s1704_s13 = sld [smem:[#allocation6 + $0x78]]  ;;  %v165_v13 = vstv %s2851_s23  ;;  %v163_v22 = vsel %vm1666_vm1, %v162_v12, %v106_v53 }
 0x132   :  { %2852 = sst [smem:[#allocation30_spill]] %s1697_s4  ;;  %v166_v23 = vsel %vm1666_vm1, %v165_v13, %v110_v54 }
 0x133   :  { %s2857_s18 = sld [smem:[#allocation43_spill]]  ;;  %v168_v15 = vstv %s2853_s16 }
 0x134   :  { %s1711_s19 = sld [smem:[#allocation6 + $0x88]]  ;;  %v169_v26 = vsel %vm1666_vm1, %v168_v15, %v114_v57 }
 0x135   :  { %s2859_s4 = sld [smem:[#allocation44_spill]]  ;;  %v171_v16 = vstv %s2854_s14 }
 0x136   :  { %s2860_s21 = sld [smem:[#allocation45_spill]]  ;;  %v183_v17 = vstv %s2855_s7  ;;  %v172_v27 = vsel %vm1666_vm1, %v171_v16, %v118_v58 }
 0x137   :  { %2856 = sst [smem:[#allocation23_spill]] %s1704_s13  ;;  %vm1750_vm2 = vcmp.ge.f32.partialorder %v1582_v6, %v183_v17 }
 0x138   :  { %s1719_s13 = sld [smem:[#allocation6 + $0x98]]  ;;  %v185_v32 = vsel %vm1750_vm2, 1, %v1283_v28  ;;  %v187_v39 = vsel %vm1750_vm2, %v183_v17, %v136_v2 }
 0x139   :  { %s2862_s24 = sld [smem:[#allocation47_spill]]  ;;  %v174_v21 = vstv %s2857_s18  ;;  %v186_v43 = vadd.s32 %v185_v32, %v135_v1 }
 0x13a   :  { %2858 = sst [smem:[#allocation24_spill]] %s1711_s19  ;;  %v175_v31 = vsel %vm1666_vm1, %v174_v21, %v122_v59 }
 0x13b   :  { %s1726_s28 = sld [smem:[#allocation6 + $0xa8]]  ;;  %v177_v24 = vstv %s2859_s4 }
 0x13c   :  { %s2864_s23 = sld [smem:[#allocation48_spill]]  ;;  %v180_v25 = vstv %s2860_s21  ;;  %v178_v35 = vsel %vm1666_vm1, %v177_v24, %v126_v61 }
 0x13d   :  { %s2865_s30 = sld [smem:[#allocation49_spill]]  ;;  %v181_v36 = vsel %vm1666_vm1, %v180_v25, %v130_v62 }
 0x13e   :  { %2861 = sst [smem:[#allocation25_spill]] %s1719_s13 }
 0x13f   :  { %s1735_s27 = sld [smem:[#allocation6 + $0xb8]]  ;;  %v189_v30 = vstv %s2862_s24 }
 0x140   :  { %s2867_s16 = sld [smem:[#allocation50_spill]]  ;;  %v190_v40 = vsel %vm1750_vm2, %v189_v30, %v139_v3 }
 0x141   :  { %2863 = sst [smem:[#allocation26_spill]] %s1726_s28 }
 0x142   :  { %s2868_s7 = sld [smem:[#allocation51_spill]]  ;;  %v192_v33 = vstv %s2864_s23 }
 0x143   :  { %s1743_s14 = sld [smem:[#allocation6 + $0xc8]]  ;;  %v195_v34 = vstv %s2865_s30  ;;  %v193_v44 = vsel %vm1750_vm2, %v192_v33, %v142_v5 }
 0x144   :  { %s2870_s18 = sld [smem:[#allocation52_spill]]  ;;  %v196_v45 = vsel %vm1750_vm2, %v195_v34, %v145_v10 }
 0x145   :  { %2866 = sst [smem:[#allocation27_spill]] %s1735_s27 }
 0x146   :  { %s2873_s27 = sld [smem:[#allocation53_spill]]  ;;  %v198_v37 = vstv %s2867_s16 }
 0x147   :  { %s1755_s28 = sld [smem:[#allocation6 + $0xd8]]  ;;  %v199_v47 = vsel %vm1750_vm2, %v198_v37, %v148_v11 }
 0x148   :  { %s2875_s4 = sld [smem:[#allocation54_spill]]  ;;  %v201_v38 = vstv %s2868_s7 }
 0x149   :  { %2869 = sst [smem:[#allocation28_spill]] %s1743_s14  ;;  %v202_v48 = vsel %vm1750_vm2, %v201_v38, %v151_v14 }
 0x14a   :  { %s1764_s21 = sld [smem:[#allocation3 + $0x9]]  ;;  %v204_v41 = vstv %s2870_s18 }
 0x14b   :  { %s2877_s24 = sld [smem:[#allocation55_spill]]  ;;  %v205_v51 = vsel %vm1750_vm2, %v204_v41, %v154_v18 }
 0x14c   :  { %s1772_s14 = sld [smem:[#allocation4 + $0x9]]  ;;  %v207_v42 = vstv %s2873_s27 }
 0x14d   :  { %2874 = sst [smem:[#allocation29_spill]] %s1755_s28  ;;  %v208_v52 = vsel %vm1750_vm2, %v207_v42, %v157_v19 }
 0x14e   :  { %s2878_s28 = sld [smem:[#allocation62_spill]]  ;;  %v210_v46 = vstv %s2875_s4 }
 0x14f   :  { %s2880_s23 = sld [smem:[#allocation56_spill]]  ;;  %v211_v55 = vsel %vm1750_vm2, %v210_v46, %v160_v20 }
 0x150   :  { %2876 = sst [smem:[#allocation31_spill]] %s1764_s21 }
 0x151   :  { %s2881_s30 = sld [smem:[#allocation57_spill]]  ;;  %v213_v49 = vstv %s2877_s24 }
 0x152   :  { %2879 = sst [smem:[#allocation32_spill]] %s1772_s14  ;;  %v214_v59 = vsel %vm1750_vm2, %v213_v49, %v163_v22 }
 0x153   :  { %s1780_s13 = sld [smem:[#allocation6 + $0x9]] }
 0x154   :  { %s2883_s16 = sld [smem:[#allocation58_spill]]  ;;  %v234_v50 = vstv %s2878_s28 }
 0x155   :  { %s2884_s7 = sld [smem:[#allocation59_spill]]  ;;  %v216_v53 = vstv %s2880_s23  ;;  %vm1816_vm3 = vcmp.ge.f32.partialorder %v1582_v6, %v234_v50 }
 0x156   :  { %s2885_s14 = sld [smem:[#allocation60_spill]]  ;;  %v217_v63 = vsel %vm1750_vm2, %v216_v53, %v166_v23  ;;  %v236_v1 = vsel %vm1816_vm3, 1, %v1283_v28  ;;  %v238_v9 = vsel %vm1816_vm3, %v234_v50, %v187_v39 }
 0x157   :  { %s1787_s21 = sld [smem:[#allocation6 + $0x19]]  ;;  %v219_v54 = vstv %s2881_s30  ;;  %v237_v12 = vadd.s32 %v236_v1, %v186_v43 }
 0x158   :  { %s2887_s27 = sld [smem:[#allocation61_spill]]  ;;  %v220_v0 = vsel %vm1750_vm2, %v219_v54, %v169_v26 }
 0x159   :  { %2882 = sst [smem:[#allocation33_spill]] %s1780_s13 }
 0x15a   :  { %s2888_s18 = sld [smem:[#allocation63_spill]]  ;;  %v222_v56 = vstv %s2883_s16 }
 0x15b   :  { %s1795_s13 = sld [smem:[#allocation6 + $0x29]]  ;;  %v225_v57 = vstv %s2884_s7  ;;  %v223_v3 = vsel %vm1750_vm2, %v222_v56, %v172_v27  ;;  %v336_v56 = vstv %s1530_s3 }
 0x15c   :  { %s2890_s4 = sld [smem:[#allocation64_spill]]  ;;  %v228_v58 = vstv %s2885_s14  ;;  %v226_v4 = vsel %vm1750_vm2, %v225_v57, %v175_v31  ;;  %vm1960_vm5 = vcmp.ge.f32.partialorder %v1582_v6, %v336_v56 }
 0x15d   :  { %2886 = sst [smem:[#allocation34_spill]] %s1787_s21  ;;  %v229_v5 = vsel %vm1750_vm2, %v228_v58, %v178_v35 }
 0x15e   :  { %s1803_s21 = sld [smem:[#allocation6 + $0x39]]  ;;  %v231_v60 = vstv %s2887_s27 }
 0x15f   :  { %s2892_s24 = sld [smem:[#allocation65_spill]]  ;;  %v232_v8 = vsel %vm1750_vm2, %v231_v60, %v181_v36 }
 0x160   :  { %s1810_s28 = sld [smem:[#allocation6 + $0x49]]  ;;  %v240_v62 = vstv %s2888_s18 }
 0x161   :  { %2889 = sst [smem:[#allocation35_spill]] %s1795_s13  ;;  %v241_v10 = vsel %vm1816_vm3, %v240_v62, %v190_v40 }
 0x162   :  { %s2896_s23 = sld [smem:[#allocation66_spill]]  ;;  %v243_v2 = vstv %s2890_s4 }
 0x163   :  { %s1821_s30 = sld [smem:[#allocation6 + $0x59]]  ;;  %v244_v13 = vsel %vm1816_vm3, %v243_v2, %v193_v44 }
 0x164   :  { %2891 = sst [smem:[#allocation36_spill]] %s1803_s21 }
 0x165   :  { %s2898_s14 = sld [smem:[#allocation67_spill]]  ;;  %v246_v7 = vstv %s2892_s24 }
 0x166   :  { %2893 = sst [smem:[#allocation37_spill]] %s1810_s28  ;;  %v247_v16 = vsel %vm1816_vm3, %v246_v7, %v196_v45 }
 0x167   :  { %s2899_s16 = sld [smem:[#allocation68_spill]] }
 0x168   :  { %s1831_s7 = sld [smem:[#allocation6 + $0x69]]  ;;  %v249_v11 = vstv %s2896_s23 }
 0x169   :  { %2897 = sst [smem:[#allocation38_spill]] %s1821_s30  ;;  %v250_v20 = vsel %vm1816_vm3, %v249_v11, %v199_v47 }
 0x16a   :  { %s2901_s27 = sld [smem:[#allocation69_spill]] }
 0x16b   :  { %s2902_s18 = sld [smem:[#allocation70_spill]]  ;;  %v252_v14 = vstv %s2898_s14 }
 0x16c   :  { %s2903_s30 = sld [smem:[#allocation71_spill]]  ;;  %v253_v24 = vsel %vm1816_vm3, %v252_v14, %v202_v48 }
 0x16d   :  { %s1840_s28 = sld [smem:[#allocation6 + $0x79]]  ;;  %v255_v15 = vstv %s2899_s16 }
 0x16e   :  { %2900 = sst [smem:[#allocation39_spill]] %s1831_s7  ;;  %v256_v25 = vsel %vm1816_vm3, %v255_v15, %v205_v51 }
 0x16f   :  { %s2905_s4 = sld [smem:[#allocation72_spill]] }
 0x170   :  { %s2906_s7 = sld [smem:[#allocation73_spill]]  ;;  %v258_v17 = vstv %s2901_s27 }
 0x171   :  { %s2907_s21 = sld [smem:[#allocation78_spill]]  ;;  %v261_v18 = vstv %s2902_s18  ;;  %v259_v29 = vsel %vm1816_vm3, %v258_v17, %v208_v52  ;;  %v351_v17 = vstv %s1538_s2 }
 0x172   :  { %s1849_s13 = sld [smem:[#allocation6 + $0x89]]  ;;  %v264_v19 = vstv %s2903_s30  ;;  %v262_v30 = vsel %vm1816_vm3, %v261_v18, %v211_v55 }
 0x173   :  { %2904 = sst [smem:[#allocation40_spill]] %s1840_s28  ;;  %v265_v31 = vsel %vm1816_vm3, %v264_v19, %v214_v59 }
 0x174   :  { %s2909_s24 = sld [smem:[#allocation74_spill]] }
 0x175   :  { %s2910_s28 = sld [smem:[#allocation75_spill]]  ;;  %v267_v21 = vstv %s2905_s4 }
 0x176   :  { %s1855_s19 = sld [smem:[#allocation6 + $0x99]]  ;;  %v270_v22 = vstv %s2906_s7  ;;  %v268_v33 = vsel %vm1816_vm3, %v267_v21, %v217_v63  ;;  %v321_v63 = vstv %s1520_s11 }
 0x177   :  { %s2911_s8 = sld [smem:[#allocation76_spill]]  ;;  %v285_v23 = vstv %s2907_s21  ;;  %v271_v34 = vsel %vm1816_vm3, %v270_v22, %v220_v0 }
 0x178   :  { %2908 = sst [smem:[#allocation41_spill]] %s1849_s13  ;;  %vm1894_vm4 = vcmp.ge.f32.partialorder %v1582_v6, %v285_v23 }
 0x179   :  { %s1862_s23 = sld [smem:[#allocation6 + $0xa9]]  ;;  %v287_v39 = vsel %vm1894_vm4, 1, %v1283_v28  ;;  %v289_v46 = vsel %vm1894_vm4, %v285_v23, %v238_v9 }
 0x17a   :  { %s2912_s13 = sld [smem:[#allocation77_spill]]  ;;  %v273_v26 = vstv %s2909_s24  ;;  %v288_v49 = vadd.s32 %v287_v39, %v237_v12  ;;  %v340_v19 = vsel %vm1960_vm5, %v336_v56, %v289_v46  ;;  %v405_v56 = vstv %s1572_s10 }
 0x17b   :  { %s1869_s14 = sld [smem:[#allocation6 + $0xb9]]  ;;  %v276_v27 = vstv %s2910_s28  ;;  %v274_v37 = vsel %vm1816_vm3, %v273_v26, %v223_v3 }
 0x17c   :  { %s2914_s16 = sld [smem:[#allocation79_spill]]  ;;  %v277_v38 = vsel %vm1816_vm3, %v276_v27, %v226_v4 }
 0x17d   :  { %s1877_s30 = sld [smem:[#allocation6 + $0xc9]]  ;;  %v279_v32 = vstv %s2911_s8 }
 0x17e   :  { %s2916_s7 = sld [smem:[#allocation80_spill]]  ;;  %v280_v41 = vsel %vm1816_vm3, %v279_v32, %v229_v5 }
 0x17f   :  { %s2917_s21 = sld [smem:[#allocation81_spill]] }
 0x180   :  { %s2918_s27 = sld [smem:[#allocation82_spill]]  ;;  %v282_v35 = vstv %s2912_s13 }
 0x181   :  { %2913 = sst [smem:[#allocation42_spill]] %s1869_s14  ;;  %v283_v45 = vsel %vm1816_vm3, %v282_v35, %v232_v8  ;;  %v338_v8 = vsel %vm1960_vm5, 1, %v1283_v28 }
 0x182   :  { %s1886_s18 = sld [smem:[#allocation6 + $0xd9]]  ;;  %v291_v40 = vstv %s2914_s16  ;;  %v339_v18 = vadd.s32 %v338_v8, %v288_v49 }
 0x183   :  { %2915 = sst [smem:[#allocation46_spill]] %s1877_s30  ;;  %v292_v50 = vsel %vm1894_vm4, %v291_v40, %v241_v10  ;;  %v322_v10 = vsel %vm1894_vm4, %v321_v63, %v271_v34 }
 0x184   :  { %s2920_s28 = sld [smem:[#allocation83_spill]]  ;;  %v294_v42 = vstv %s2916_s7 }
 0x185   :  { %s2921_s4 = sld [smem:[#allocation84_spill]]  ;;  %v297_v43 = vstv %s2917_s21  ;;  %v295_v53 = vsel %vm1894_vm4, %v294_v42, %v244_v13 }
 0x186   :  { %s1898_s24 = sld [smem:[#allocation3 + $0xa]]  ;;  %v300_v44 = vstv %s2918_s27  ;;  %v298_v54 = vsel %vm1894_vm4, %v297_v43, %v247_v16 }
 0x187   :  { %s2924_s8 = sld [smem:[#allocation85_spill]]  ;;  %v301_v55 = vsel %vm1894_vm4, %v300_v44, %v250_v20 }
 0x188   :  { %2919 = sst [smem:[#allocation43_spill]] %s1886_s18  ;;  %v352_v26 = vsel %vm1960_vm5, %v351_v17, %v301_v55 }
 0x189   :  { %s2925_s13 = sld [smem:[#allocation86_spill]] }
 0x18a   :  { %s1908_s18 = sld [smem:[#allocation4 + $0xa]]  ;;  %v303_v47 = vstv %s2920_s28 }
 0x18b   :  { %s1915_s30 = sld [smem:[#allocation6 + $0xa]]  ;;  %v306_v48 = vstv %s2921_s4  ;;  %v304_v57 = vsel %vm1894_vm4, %v303_v47, %v253_v24 }
 0x18c   :  { %s2927_s14 = sld [smem:[#allocation87_spill]]  ;;  %v307_v58 = vsel %vm1894_vm4, %v306_v48, %v256_v25  ;;  %v360_v25 = vstv %s1544_s6 }
 0x18d   :  { %s2928_s16 = sld [smem:[#allocation88_spill]]  ;;  %v309_v51 = vstv %s2924_s8 }
 0x18e   :  { %s2930_s7 = sld [smem:[#allocation89_spill]]  ;;  %v310_v61 = vsel %vm1894_vm4, %v309_v51, %v259_v29 }
 0x18f   :  { %v312_v52 = vstv %s2925_s13  ;;  %s1929_s21 = sld [smem:[#allocation6 + $0x2a]]  ;;  %v361_v36 = vsel %vm1960_vm5, %v360_v25, %v310_v61  ;;  %v414_v61 = vstv %s1578_s25 }
 0x190   :  { %2926 = sst [smem:[#allocation44_spill]] %s1908_s18  ;;  %v313_v62 = vsel %vm1894_vm4, %v312_v52, %v262_v30  ;;  %v387_v30 = vstv %s1562_s5 }
 0x191   :  { %s1923_s18 = sld [smem:[#allocation6 + $0x1a]]  ;;  %vm2036_vm6 = vcmp.ge.f32.partialorder %v1582_v6, %v387_v30 }
 0x192   :  { %s2932_s27 = sld [smem:[#allocation90_spill]]  ;;  %v315_v59 = vstv %s2927_s14  ;;  %v389_v49 = vsel %vm2036_vm6, 1, %v1283_v28  ;;  %v391_v52 = vsel %vm2036_vm6, %v387_v30, %v340_v19 }
 0x193   :  { %s2933_s28 = sld [smem:[#allocation91_spill]]  ;;  %v318_v60 = vstv %s2928_s16  ;;  %v316_v5 = vsel %vm1894_vm4, %v315_v59, %v265_v31  ;;  %v390_v59 = vadd.s32 %v389_v49, %v339_v18  ;;  %v444_v18 = vstv %s1636_s29 }
 0x194   :  { %s2934_s4 = sld [smem:[#allocation92_spill]]  ;;  %v324_v0 = vstv %s2930_s7  ;;  %v319_v7 = vsel %vm1894_vm4, %v318_v60, %v268_v33 }
 0x195   :  { %2931 = sst [smem:[#allocation47_spill]] %s1929_s21  ;;  %v325_v11 = vsel %vm1894_vm4, %v324_v0, %v274_v37 }
 0x196   :  { %s2936_s8 = sld [smem:[#allocation93_spill]] }
 0x197   :  { %2929 = sst [smem:[#allocation45_spill]] %s1923_s18 }
 0x198   :  { %s1938_s18 = sld [smem:[#allocation6 + $0x3a]]  ;;  %v327_v1 = vstv %s2932_s27 }
 0x199   :  { %s1946_s13 = sld [smem:[#allocation6 + $0x4a]]  ;;  %v330_v2 = vstv %s2933_s28  ;;  %v328_v14 = vsel %vm1894_vm4, %v327_v1, %v277_v38  ;;  %v420_v1 = vstv %s1585_s26 }
 0x19a   :  { %s2937_s3 = sld [smem:[#allocation94_spill]]  ;;  %v333_v3 = vstv %s2934_s4  ;;  %v331_v15 = vsel %vm1894_vm4, %v330_v2, %v280_v41  ;;  %v438_v2 = vstv %s1627_s22 }
 0x19b   :  { %s1954_s21 = sld [smem:[#allocation6 + $0x5a]]  ;;  %v334_v16 = vsel %vm1894_vm4, %v333_v3, %v283_v45  ;;  %vm2112_vm7 = vcmp.ge.f32.partialorder %v1582_v6, %v438_v2 }
 0x19c   :  { %s1964_s14 = sld [smem:[#allocation6 + $0x6a]]  ;;  %v342_v9 = vstv %s2936_s8  ;;  %v440_v17 = vsel %vm2112_vm7, 1, %v1283_v28 }
 0x19d   :  { %s2943_s11 = sld [smem:[#allocation96_spill]]  ;;  %v343_v20 = vsel %vm1960_vm5, %v342_v9, %v292_v50 }
 0x19e   :  { %2935 = sst [smem:[#allocation48_spill]] %s1938_s18 }
 0x19f   :  { %s2938_s18 = sld [smem:[#allocation95_spill]] }
 0x1a0   :  { %s1974_s16 = sld [smem:[#allocation6 + $0x7a]]  ;;  %v345_v12 = vstv %s2937_s3 }
 0x1a1   :  { %2939 = sst [smem:[#allocation49_spill]] %s1954_s21  ;;  %v346_v22 = vsel %vm1960_vm5, %v345_v12, %v295_v53  ;;  %v399_v53 = vstv %s1568_s9 }
 0x1a2   :  { %2942 = sst [smem:[#allocation50_spill]] %s1964_s14 }
 0x1a3   :  { %s2945_s7 = sld [smem:[#allocation97_spill]]  ;;  %v354_v21 = vstv %s2943_s11 }
 0x1a4   :  { %s1982_s27 = sld [smem:[#allocation6 + $0x8a]]  ;;  %v355_v31 = vsel %vm1960_vm5, %v354_v21, %v304_v57  ;;  %v408_v57 = vstv %s1574_s1 }
 0x1a5   :  { %v348_v13 = vstv %s2938_s18  ;;  %s2947_s28 = sld [smem:[#allocation98_spill]]  ;;  %v406_v3 = vsel %vm2036_vm6, %v405_v56, %v355_v31 }
 0x1a6   :  { %2944 = sst [smem:[#allocation51_spill]] %s1974_s16  ;;  %v349_v23 = vsel %vm1960_vm5, %v348_v13, %v298_v54  ;;  %v432_v13 = vstv %s1613_s17 }
 0x1a7   :  { %s2948_s4 = sld [smem:[#allocation99_spill]]  ;;  %v400_v63 = vsel %vm2036_vm6, %v399_v53, %v349_v23 }
 0x1a8   :  { %s1991_s8 = sld [smem:[#allocation6 + $0x9a]] }
 0x1a9   :  { %s2950_s18 = sld [smem:[#allocation100_spill]]  ;;  %v357_v24 = vstv %s2945_s7 }
 0x1aa   :  { %2946 = sst [smem:[#allocation52_spill]] %s1982_s27  ;;  %v358_v35 = vsel %vm1960_vm5, %v357_v24, %v307_v58 }
 0x1ab   :  { %s2951_s3 = sld [smem:[#allocation101_spill]]  ;;  %v363_v27 = vstv %s2947_s28  ;;  %v409_v4 = vsel %vm2036_vm6, %v408_v57, %v358_v35 }
 0x1ac   :  { %s2952_s27 = sld [smem:[#allocation102_spill]]  ;;  %v364_v39 = vsel %vm1960_vm5, %v363_v27, %v313_v62 }
 0x1ad   :  { %s1998_s16 = sld [smem:[#allocation6 + $0xaa]]  ;;  %v366_v29 = vstv %s2948_s4  ;;  %v415_v8 = vsel %vm2036_vm6, %v414_v61, %v364_v39 }
 0x1ae   :  { %2949 = sst [smem:[#allocation53_spill]] %s1991_s8  ;;  %v367_v40 = vsel %vm1960_vm5, %v366_v29, %v316_v5  ;;  %v441_v29 = vadd.s32 %v440_v17, %v390_v59  ;;  %v528_v17 = vstv %s1862_s23 }
 0x1af   :  { %s2954_s2 = sld [smem:[#allocation103_spill]]  ;;  %v369_v32 = vstv %s2950_s18 }
 0x1b0   :  { %s2955_s8 = sld [smem:[#allocation104_spill]]  ;;  %v370_v43 = vsel %vm1960_vm5, %v369_v32, %v319_v7  ;;  %v423_v7 = vstv %s1591_s0 }
 0x1b1   :  { %s2006_s14 = sld [smem:[#allocation6 + $0xba]]  ;;  %v372_v33 = vstv %s2951_s3  ;;  %v421_v12 = vsel %vm2036_vm6, %v420_v1, %v370_v43 }
 0x1b2   :  { %s2956_s21 = sld [smem:[#allocation105_spill]]  ;;  %v375_v34 = vstv %s2952_s27  ;;  %v373_v44 = vsel %vm1960_vm5, %v372_v33, %v322_v10  ;;  %v426_v10 = vstv %s1597_s12 }
 0x1b3   :  { %2953 = sst [smem:[#allocation54_spill]] %s1998_s16  ;;  %v376_v45 = vsel %vm1960_vm5, %v375_v34, %v325_v11  ;;  %v429_v11 = vstv %s1603_s15 }
 0x1b4   :  { %s2013_s11 = sld [smem:[#allocation6 + $0xca]] }
 0x1b5   :  { %s2957_s16 = sld [smem:[#allocation106_spill]]  ;;  %v378_v37 = vstv %s2954_s2 }
 0x1b6   :  { %s2020_s7 = sld [smem:[#allocation6 + $0xda]]  ;;  %v381_v38 = vstv %s2955_s8  ;;  %v379_v47 = vsel %vm1960_vm5, %v378_v37, %v328_v14  ;;  %v435_v14 = vstv %s1619_s20 }
 0x1b7   :  { %s2958_s6 = sld [smem:[#allocation107_spill]]  ;;  %v382_v48 = vsel %vm1960_vm5, %v381_v38, %v331_v15  ;;  %v430_v21 = vsel %vm2036_vm6, %v429_v11, %v379_v47 }
 0x1b8   :  { %s2028_s5 = sld [smem:[#allocation3 + $0xb]]  ;;  %v384_v41 = vstv %s2956_s21  ;;  %v433_v24 = vsel %vm2036_vm6, %v432_v13, %v382_v48  ;;  %v540_v13 = vstv %s1898_s24 }
 0x1b9   :  { %s2959_s27 = sld [smem:[#allocation108_spill]]  ;;  %v385_v51 = vsel %vm1960_vm5, %v384_v41, %v334_v16  ;;  %v424_v16 = vsel %vm2036_vm6, %v423_v7, %v373_v44  ;;  %vm2262_vm9 = vcmp.ge.f32.partialorder %v1582_v6, %v540_v13 }
 0x1ba   :  { %s2040_s28 = sld [smem:[#allocation4 + $0xb]]  ;;  %v436_v25 = vsel %vm2036_vm6, %v435_v14, %v385_v51 }
 0x1bb   :  { %s2962_s21 = sld [smem:[#allocation109_spill]]  ;;  %v393_v46 = vstv %s2957_s16 }
 0x1bc   :  { %s2049_s4 = sld [smem:[#allocation6 + $0xb]]  ;;  %v394_v55 = vsel %vm2036_vm6, %v393_v46, %v343_v20  ;;  %v427_v20 = vsel %vm2036_vm6, %v426_v10, %v376_v45 }
 0x1bd   :  { %s2963_s8 = sld [smem:[#allocation110_spill]]  ;;  %v396_v50 = vstv %s2958_s6  ;;  %v445_v30 = vsel %vm2112_vm7, %v444_v18, %v394_v55 }
 0x1be   :  { %s2059_s18 = sld [smem:[#allocation6 + $0x1b]]  ;;  %v397_v60 = vsel %vm2036_vm6, %v396_v50, %v346_v22 }
 0x1bf   :  { %v402_v54 = vstv %s2959_s27  ;;  %s2067_s16 = sld [smem:[#allocation6 + $0x2b]] }
 0x1c0   :  { %s2074_s3 = sld [smem:[#allocation6 + $0x3b]]  ;;  %v403_v0 = vsel %vm2036_vm6, %v402_v54, %v352_v26  ;;  %v442_v26 = vsel %vm2112_vm7, %v438_v2, %v391_v52 }
 0x1c1   :  { %v411_v58 = vstv %s2962_s21  ;;  %s2080_s9 = sld [smem:[#allocation6 + $0x4b]] }
 0x1c2   :  { %s2088_s10 = sld [smem:[#allocation6 + $0x5b]]  ;;  %v412_v5 = vsel %vm2036_vm6, %v411_v58, %v361_v36 }
 0x1c3   :  { %v417_v62 = vstv %s2963_s8  ;;  %s2964_s25 = sld [smem:[#allocation17_spill]] }
 0x1c4   :  { %s2097_s1 = sld [smem:[#allocation6 + $0x6b]]  ;;  %v418_v9 = vsel %vm2036_vm6, %v417_v62, %v367_v40 }
 0x1c5   :  { %s2965_s26 = sld [smem:[#allocation19_spill]] }
 0x1c6   :  { %s2966_s22 = sld [smem:[#allocation20_spill]] }
 0x1c7   :  { %s2105_s2 = sld [smem:[#allocation6 + $0x7b]] }
 0x1c8   :  { %s2967_s0 = sld [smem:[#allocation18_spill]] }
 0x1c9   :  { %s2116_s6 = sld [smem:[#allocation6 + $0x8b]]  ;;  %v447_v19 = vstv %s2964_s25 }
 0x1ca   :  { %s2971_s12 = sld [smem:[#allocation21_spill]]  ;;  %v448_v31 = vsel %vm2112_vm7, %v447_v19, %v397_v60 }
 0x1cb   :  { %s2125_s15 = sld [smem:[#allocation6 + $0x9b]]  ;;  %v450_v22 = vstv %s2965_s26 }
 0x1cc   :  { %s2973_s17 = sld [smem:[#allocation22_spill]]  ;;  %v453_v23 = vstv %s2966_s22  ;;  %v451_v33 = vsel %vm2112_vm7, %v450_v22, %v400_v63 }
 0x1cd   :  { %s2974_s20 = sld [smem:[#allocation30_spill]]  ;;  %v454_v34 = vsel %vm2112_vm7, %v453_v23, %v403_v0 }
 0x1ce   :  { %s2133_s27 = sld [smem:[#allocation6 + $0xab]]  ;;  %v456_v27 = vstv %s2967_s0 }
 0x1cf   :  { %2970 = sst [smem:[#allocation55_spill]] %s2116_s6  ;;  %v457_v37 = vsel %vm2112_vm7, %v456_v27, %v406_v3  ;;  %v542_v27 = vsel %vm2262_vm9, 1, %v1283_v28 }
 0x1d0   :  { %s2976_s29 = sld [smem:[#allocation23_spill]]  ;;  %v459_v32 = vstv %s2971_s12 }
 0x1d1   :  { %2972 = sst [smem:[#allocation62_spill]] %s2125_s15  ;;  %v460_v41 = vsel %vm2112_vm7, %v459_v32, %v409_v4 }
 0x1d2   :  { %s2977_s21 = sld [smem:[#allocation24_spill]]  ;;  %v462_v35 = vstv %s2973_s17 }
 0x1d3   :  { %s2978_s8 = sld [smem:[#allocation31_spill]]  ;;  %v465_v36 = vstv %s2974_s20  ;;  %v463_v45 = vsel %vm2112_vm7, %v462_v35, %v412_v5 }
 0x1d4   :  { %2975 = sst [smem:[#allocation56_spill]] %s2133_s27  ;;  %v466_v46 = vsel %vm2112_vm7, %v465_v36, %v415_v8 }
 0x1d5   :  { %s2142_s25 = sld [smem:[#allocation6 + $0xbb]] }
 0x1d6   :  { %s2980_s26 = sld [smem:[#allocation25_spill]]  ;;  %v468_v38 = vstv %s2976_s29 }
 0x1d7   :  { %s2981_s22 = sld [smem:[#allocation26_spill]]  ;;  %v469_v49 = vsel %vm2112_vm7, %v468_v38, %v418_v9  ;;  %v561_v38 = vstv %s1946_s13 }
 0x1d8   :  { %s2982_s27 = sld [smem:[#allocation27_spill]]  ;;  %v471_v39 = vstv %s2977_s21 }
 0x1d9   :  { %s2149_s15 = sld [smem:[#allocation6 + $0xcb]]  ;;  %v489_v40 = vstv %s2978_s8  ;;  %v472_v50 = vsel %vm2112_vm7, %v471_v39, %v421_v12  ;;  %v525_v12 = vstv %s1855_s19 }
 0x1da   :  { %s2984_s0 = sld [smem:[#allocation28_spill]]  ;;  %vm2186_vm8 = vcmp.ge.f32.partialorder %v1582_v6, %v489_v40 }
 0x1db   :  { %2979 = sst [smem:[#allocation57_spill]] %s2142_s25  ;;  %v491_v56 = vsel %vm2186_vm8, 1, %v1283_v28  ;;  %v493_v61 = vsel %vm2186_vm8, %v489_v40, %v442_v26 }
 0x1dc   :  { %s2985_s25 = sld [smem:[#allocation29_spill]]  ;;  %v474_v42 = vstv %s2980_s26  ;;  %v492_v1 = vadd.s32 %v491_v56, %v441_v29  ;;  %v549_v29 = vstv %s1915_s30  ;;  %v544_v36 = vsel %vm2262_vm9, %v540_v13, %v493_v61 }
 0x1dd   :  { %s2157_s6 = sld [smem:[#allocation6 + $0xdb]]  ;;  %v477_v43 = vstv %s2981_s22  ;;  %v475_v53 = vsel %vm2112_vm7, %v474_v42, %v424_v16  ;;  %v588_v56 = vstv %s2020_s7  ;;  %v615_v13 = vstv %s2088_s10 }
 0x1de   :  { %s2986_s12 = sld [smem:[#allocation32_spill]]  ;;  %v480_v44 = vstv %s2982_s27  ;;  %v478_v54 = vsel %vm2112_vm7, %v477_v43, %v427_v20  ;;  %v526_v22 = vsel %vm2186_vm8, %v525_v12, %v475_v53  ;;  %v543_v39 = vadd.s32 %v542_v27, %v492_v1 }
 0x1df   :  { %2983 = sst [smem:[#allocation58_spill]] %s2149_s15  ;;  %v481_v55 = vsel %vm2112_vm7, %v480_v44, %v430_v21  ;;  %v529_v26 = vsel %vm2186_vm8, %v528_v17, %v478_v54  ;;  %v582_v53 = vstv %s2006_s14  ;;  %v585_v54 = vstv %s2013_s11 }
 0x1e0   :  { %s2164_s15 = sld [smem:[#allocation3 + $0xc]]  ;;  %v483_v47 = vstv %s2984_s0 }
 0x1e1   :  { %s2171_s17 = sld [smem:[#allocation4 + $0xc]]  ;;  %v484_v57 = vsel %vm2112_vm7, %v483_v47, %v433_v24 }
 0x1e2   :  { %s2988_s20 = sld [smem:[#allocation33_spill]]  ;;  %v486_v48 = vstv %s2985_s25 }
 0x1e3   :  { %s2989_s29 = sld [smem:[#allocation34_spill]]  ;;  %v487_v58 = vsel %vm2112_vm7, %v486_v48, %v436_v25 }
 0x1e4   :  { %s2179_s21 = sld [smem:[#allocation6 + $0xc]]  ;;  %v495_v52 = vstv %s2986_s12 }
 0x1e5   :  { %s2991_s27 = sld [smem:[#allocation35_spill]]  ;;  %v496_v62 = vsel %vm2186_vm8, %v495_v52, %v445_v30 }
 0x1e6   :  { %s2994_s8 = sld [smem:[#allocation36_spill]] }
 0x1e7   :  { %2987 = sst [smem:[#allocation59_spill]] %s2171_s17 }
 0x1e8   :  { %s2191_s26 = sld [smem:[#allocation6 + $0x1c]]  ;;  %v498_v59 = vstv %s2988_s20 }
 0x1e9   :  { %s2996_s25 = sld [smem:[#allocation37_spill]]  ;;  %v501_v60 = vstv %s2989_s29  ;;  %v499_v5 = vsel %vm2186_vm8, %v498_v59, %v448_v31 }
 0x1ea   :  { %2990 = sst [smem:[#allocation60_spill]] %s2179_s21  ;;  %v502_v7 = vsel %vm2186_vm8, %v501_v60, %v451_v33  ;;  %v550_v40 = vsel %vm2262_vm9, %v549_v29, %v499_v5 }
 0x1eb   :  { %s2997_s22 = sld [smem:[#allocation38_spill]]  ;;  %v504_v63 = vstv %s2991_s27 }
 0x1ec   :  { %s2998_s0 = sld [smem:[#allocation39_spill]]  ;;  %v507_v0 = vstv %s2994_s8  ;;  %v505_v10 = vsel %vm2186_vm8, %v504_v63, %v454_v34 }
 0x1ed   :  { %s2202_s21 = sld [smem:[#allocation6 + $0x2c]]  ;;  %v508_v11 = vsel %vm2186_vm8, %v507_v0, %v457_v37 }
 0x1ee   :  { %2995 = sst [smem:[#allocation61_spill]] %s2191_s26 }
 0x1ef   :  { %s3000_s12 = sld [smem:[#allocation40_spill]]  ;;  %v510_v2 = vstv %s2996_s25 }
 0x1f0   :  { %s3001_s26 = sld [smem:[#allocation41_spill]]  ;;  %v511_v14 = vsel %vm2186_vm8, %v510_v2, %v460_v41  ;;  %v600_v2 = vstv %s2049_s4 }
 0x1f1   :  { %s2210_s17 = sld [smem:[#allocation6 + $0x3c]]  ;;  %v513_v3 = vstv %s2997_s22  ;;  %v562_v47 = vsel %vm2262_vm9, %v561_v38, %v511_v14  ;;  %v618_v14 = vstv %s2097_s1 }
 0x1f2   :  { %v516_v4 = vstv %s2998_s0  ;;  %s2223_s20 = sld [smem:[#allocation6 + $0x5c]]  ;;  %v514_v15 = vsel %vm2186_vm8, %v513_v3, %v463_v45 }
 0x1f3   :  { %2999 = sst [smem:[#allocation63_spill]] %s2202_s21  ;;  %v517_v16 = vsel %vm2186_vm8, %v516_v4, %v466_v46  ;;  %v591_v46 = vstv %s2028_s5 }
 0x1f4   :  { %s2218_s21 = sld [smem:[#allocation6 + $0x4c]]  ;;  %vm2328_vm10 = vcmp.ge.f32.partialorder %v1582_v6, %v591_v46 }
 0x1f5   :  { %s3002_s29 = sld [smem:[#allocation42_spill]]  ;;  %v519_v8 = vstv %s3000_s12  ;;  %v595_v4 = vsel %vm2328_vm10, %v591_v46, %v544_v36  ;;  %v601_v12 = vsel %vm2328_vm10, %v600_v2, %v550_v40 }
 0x1f6   :  { %s3003_s27 = sld [smem:[#allocation46_spill]]  ;;  %v522_v9 = vstv %s3001_s26  ;;  %v520_v18 = vsel %vm2186_vm8, %v519_v8, %v469_v49 }
 0x1f7   :  { %s2231_s8 = sld [smem:[#allocation6 + $0x6c]]  ;;  %v523_v19 = vsel %vm2186_vm8, %v522_v9, %v472_v50  ;;  %v606_v9 = vstv %s2067_s16 }
 0x1f8   :  { %s3004_s25 = sld [smem:[#allocation43_spill]] }
 0x1f9   :  { %s3005_s22 = sld [smem:[#allocation44_spill]] }
 0x1fa   :  { %s2239_s0 = sld [smem:[#allocation6 + $0x7c]] }
 0x1fb   :  { %s3007_s26 = sld [smem:[#allocation45_spill]]  ;;  %v531_v20 = vstv %s3002_s29 }
 0x1fc   :  { %s2248_s12 = sld [smem:[#allocation6 + $0x8c]]  ;;  %v534_v21 = vstv %s3003_s27  ;;  %v532_v31 = vsel %vm2186_vm8, %v531_v20, %v481_v55 }
 0x1fd   :  { %s3008_s19 = sld [smem:[#allocation47_spill]]  ;;  %v535_v32 = vsel %vm2186_vm8, %v534_v21, %v484_v57  ;;  %v583_v0 = vsel %vm2262_vm9, %v582_v53, %v532_v31 }
 0x1fe   :  { %s3009_s24 = sld [smem:[#allocation48_spill]]  ;;  %v537_v23 = vstv %s3004_s25  ;;  %v586_v1 = vsel %vm2262_vm9, %v585_v54, %v535_v32 }
 0x1ff   :  { %v546_v25 = vstv %s3005_s22  ;;  %s2267_s23 = sld [smem:[#allocation6 + $0xac]]  ;;  %v538_v35 = vsel %vm2186_vm8, %v537_v23, %v487_v58  ;;  %v597_v58 = vstv %s2040_s28 }
 0x200   :  { %3006 = sst [smem:[#allocation64_spill]] %s2239_s0  ;;  %v547_v37 = vsel %vm2262_vm9, %v546_v25, %v496_v62  ;;  %v593_v62 = vsel %vm2328_vm10, 1, %v1283_v28  ;;  %v589_v3 = vsel %vm2262_vm9, %v588_v56, %v538_v35  ;;  %v669_v56 = vstv %s2231_s8 }
 0x201   :  { %s2256_s0 = sld [smem:[#allocation6 + $0x9c]]  ;;  %v552_v30 = vstv %s3007_s26  ;;  %v598_v5 = vsel %vm2328_vm10, %v597_v58, %v547_v37  ;;  %v594_v8 = vadd.s32 %v593_v62, %v543_v39 }
 0x202   :  { %s3013_s29 = sld [smem:[#allocation49_spill]]  ;;  %v553_v41 = vsel %vm2262_vm9, %v552_v30, %v502_v7  ;;  %v603_v7 = vstv %s2059_s18  ;;  %v675_v58 = vstv %s2248_s12 }
 0x203   :  { %s2276_s27 = sld [smem:[#allocation6 + $0xbc]]  ;;  %v555_v33 = vstv %s3008_s19 }
 0x204   :  { %s3015_s25 = sld [smem:[#allocation50_spill]]  ;;  %v558_v34 = vstv %s3009_s24  ;;  %v556_v43 = vsel %vm2262_vm9, %v555_v33, %v505_v10  ;;  %v609_v10 = vstv %s2074_s3 }
 0x205   :  { %3012 = sst [smem:[#allocation65_spill]] %s2267_s23  ;;  %v559_v44 = vsel %vm2262_vm9, %v558_v34, %v508_v11  ;;  %v612_v11 = vstv %s2080_s9  ;;  %v607_v20 = vsel %vm2328_vm10, %v606_v9, %v556_v43  ;;  %v639_v34 = vstv %s2157_s6 }
 0x206   :  { %s2284_s22 = sld [smem:[#allocation6 + $0xcc]]  ;;  %v610_v21 = vsel %vm2328_vm10, %v609_v10, %v559_v44  ;;  %v663_v43 = vstv %s2218_s21  ;;  %v666_v44 = vstv %s2223_s20 }
 0x207   :  { %s3016_s30 = sld [smem:[#allocation51_spill]] }
 0x208   :  { %s3017_s26 = sld [smem:[#allocation52_spill]]  ;;  %v564_v42 = vstv %s3013_s29 }
 0x209   :  { %3014 = sst [smem:[#allocation66_spill]] %s2276_s27  ;;  %v565_v51 = vsel %vm2262_vm9, %v564_v42, %v514_v15  ;;  %v621_v15 = vstv %s2105_s2  ;;  %v660_v42 = vstv %s2210_s17 }
 0x20a   :  { %s3018_s27 = sld [smem:[#allocation53_spill]]  ;;  %v567_v45 = vstv %s3015_s25  ;;  %v616_v24 = vsel %vm2328_vm10, %v615_v13, %v565_v51 }
 0x20b   :  { %s2293_s23 = sld [smem:[#allocation6 + $0xdc]]  ;;  %v568_v55 = vsel %vm2262_vm9, %v567_v45, %v517_v16  ;;  %v604_v16 = vsel %vm2328_vm10, %v603_v7, %v553_v41  ;;  %v640_v45 = vsel %vm2328_vm10, %v639_v34, %v589_v3 }
 0x20c   :  { %s3019_s19 = sld [smem:[#allocation54_spill]]  ;;  %v619_v25 = vsel %vm2328_vm10, %v618_v14, %v568_v55  ;;  %v687_v62 = vstv %s2284_s22 }
 0x20d   :  { %s2300_s24 = sld [smem:[#allocation3 + $0xd]]  ;;  %v570_v48 = vstv %s3016_s30 }
 0x20e   :  { %s2308_s13 = sld [smem:[#allocation4 + $0xd]]  ;;  %v573_v49 = vstv %s3017_s26  ;;  %v571_v59 = vsel %vm2262_vm9, %v570_v48, %v520_v18 }
 0x20f   :  { %s2315_s29 = sld [smem:[#allocation6 + $0xd]]  ;;  %v574_v60 = vsel %vm2262_vm9, %v573_v49, %v523_v19  ;;  %v642_v19 = vstv %s2164_s15 }
 0x210   :  { %v576_v50 = vstv %s3018_s27  ;;  %s2322_s25 = sld [smem:[#allocation6 + $0x1d]]  ;;  %vm2407_vm11 = vcmp.ge.f32.partialorder %v1582_v6, %v642_v19 }
 0x211   :  { %s2333_s5 = sld [smem:[#allocation6 + $0x2d]]  ;;  %v577_v61 = vsel %vm2262_vm9, %v576_v50, %v526_v22  ;;  %v613_v22 = vsel %vm2328_vm10, %v612_v11, %v562_v47  ;;  %v644_v35 = vsel %vm2407_vm11, 1, %v1283_v28  ;;  %v646_v47 = vsel %vm2407_vm11, %v642_v19, %v595_v4 }
 0x212   :  { %v579_v52 = vstv %s3019_s19  ;;  %s2344_s14 = sld [smem:[#allocation6 + $0x3d]]  ;;  %v645_v46 = vadd.s32 %v644_v35, %v594_v8  ;;  %v661_v53 = vsel %vm2407_vm11, %v660_v42, %v610_v21  ;;  %v664_v54 = vsel %vm2407_vm11, %v663_v43, %v613_v22 }
 0x213   :  { %v580_v63 = vsel %vm2262_vm9, %v579_v52, %v529_v26  ;;  %s2353_s11 = sld [smem:[#allocation6 + $0x4d]]  ;;  %v622_v26 = vsel %vm2328_vm10, %v621_v15, %v571_v59  ;;  %v693_v52 = vstv %s2300_s24  ;;  %v667_v55 = vsel %vm2407_vm11, %v666_v44, %v616_v24 }
 0x214   :  { %s3022_s7 = sld [smem:[#allocation55_spill]]  ;;  %v678_v59 = vstv %s2256_s0  ;;  %vm2472_vm12 = vcmp.ge.f32.partialorder %v1582_v6, %v693_v52  ;;  %v699_v3 = vstv %s2308_s13 }
 0x215   :  { %s3023_s28 = sld [smem:[#allocation62_spill]]  ;;  %v695_v2 = vsel %vm2472_vm12, 1, %v1283_v28  ;;  %v702_v4 = vstv %s2315_s29  ;;  %v697_v15 = vsel %vm2472_vm12, %v693_v52, %v646_v47 }
 0x216   :  { %s2362_s27 = sld [smem:[#allocation6 + $0x5d]]  ;;  %v705_v9 = vstv %s2322_s25  ;;  %v696_v14 = vadd.s32 %v695_v2, %v645_v46 }
 0x217   :  { %s3024_s4 = sld [smem:[#allocation56_spill]]  ;;  %v708_v19 = vstv %s2333_s5 }
 0x218   :  { %s2367_s30 = sld [smem:[#allocation6 + $0x6d]] }
 0x219   :  { %s3025_s26 = sld [smem:[#allocation57_spill]]  ;;  %v714_v21 = vstv %s2353_s11 }
 0x21a   :  { %s2374_s19 = sld [smem:[#allocation6 + $0x7d]]  ;;  %v624_v17 = vstv %s3022_s7 }
 0x21b   :  { %s3026_s18 = sld [smem:[#allocation58_spill]]  ;;  %v627_v18 = vstv %s3023_s28  ;;  %v625_v29 = vsel %vm2328_vm10, %v624_v17, %v574_v60 }
 0x21c   :  { %s2381_s16 = sld [smem:[#allocation6 + $0x8d]]  ;;  %v628_v30 = vsel %vm2328_vm10, %v627_v18, %v577_v61  ;;  %v676_v7 = vsel %vm2407_vm11, %v675_v58, %v625_v29  ;;  %v717_v22 = vstv %s2362_s27 }
 0x21d   :  { %s3027_s3 = sld [smem:[#allocation59_spill]]  ;;  %v630_v23 = vstv %s3024_s4  ;;  %v679_v8 = vsel %vm2407_vm11, %v678_v59, %v628_v30  ;;  %v718_v35 = vsel %vm2472_vm12, %v717_v22, %v667_v55 }
 0x21e   :  { %s2390_s9 = sld [smem:[#allocation6 + $0x9d]]  ;;  %v631_v33 = vsel %vm2328_vm10, %v630_v23, %v580_v63  ;;  %v690_v63 = vstv %s2293_s23  ;;  %v720_v23 = vstv %s2367_s30 }
 0x21f   :  { %s3028_s10 = sld [smem:[#allocation60_spill]]  ;;  %v633_v27 = vstv %s3025_s26  ;;  %v691_v13 = vsel %vm2407_vm11, %v690_v63, %v640_v45 }
 0x220   :  { %s3029_s1 = sld [smem:[#allocation61_spill]]  ;;  %v634_v37 = vsel %vm2328_vm10, %v633_v27, %v583_v0  ;;  %v723_v24 = vstv %s2374_s19 }
 0x221   :  { %s3030_s2 = sld [smem:[#allocation63_spill]]  ;;  %v636_v31 = vstv %s3026_s18 }
 0x222   :  { %s2399_s15 = sld [smem:[#allocation6 + $0xad]]  ;;  %v637_v41 = vsel %vm2328_vm10, %v636_v31, %v586_v1  ;;  %v670_v1 = vsel %vm2407_vm11, %v669_v56, %v619_v25  ;;  %v726_v25 = vstv %s2381_s16 }
 0x223   :  { %s2411_s7 = sld [smem:[#allocation6 + $0xbd]]  ;;  %v648_v36 = vstv %s3027_s3 }
 0x224   :  { %s2420_s28 = sld [smem:[#allocation6 + $0xcd]]  ;;  %v649_v48 = vsel %vm2407_vm11, %v648_v36, %v598_v5  ;;  %v721_v36 = vsel %vm2472_vm12, %v720_v23, %v670_v1 }
 0x225   :  { %v651_v38 = vstv %s3028_s10  ;;  %s2427_s4 = sld [smem:[#allocation6 + $0xdd]] }
 0x226   :  { %v654_v39 = vstv %s3029_s1  ;;  %s2434_s6 = sld [smem:[#allocation3 + $0xe]]  ;;  %v652_v49 = vsel %vm2407_vm11, %v651_v38, %v601_v12  ;;  %v688_v12 = vsel %vm2407_vm11, %v687_v62, %v637_v41  ;;  %v727_v38 = vsel %vm2472_vm12, %v726_v25, %v676_v7 }
 0x227   :  { %v657_v40 = vstv %s3030_s2  ;;  %s3033_s26 = sld [smem:[#allocation64_spill]]  ;;  %v655_v50 = vsel %vm2407_vm11, %v654_v39, %v604_v16  ;;  %v700_v16 = vsel %vm2472_vm12, %v699_v3, %v649_v48  ;;  %v703_v17 = vsel %vm2472_vm12, %v702_v4, %v652_v49 }
 0x228   :  { %s3034_s18 = sld [smem:[#allocation65_spill]]  ;;  %v658_v51 = vsel %vm2407_vm11, %v657_v40, %v607_v20  ;;  %v706_v18 = vsel %vm2472_vm12, %v705_v9, %v655_v50  ;;  %v711_v20 = vstv %s2344_s14  ;;  %v732_v27 = vstv %s2399_s15 }
 0x229   :  { %s2442_s17 = sld [smem:[#allocation4 + $0xe]]  ;;  %v735_v29 = vstv %s2411_s7  ;;  %v709_v31 = vsel %vm2472_vm12, %v708_v19, %v658_v51  ;;  %v712_v32 = vsel %vm2472_vm12, %v711_v20, %v661_v53 }
 0x22a   :  { %s3035_s21 = sld [smem:[#allocation66_spill]]  ;;  %v738_v34 = vstv %s2420_s28 }
 0x22b   :  { %s2451_s20 = sld [smem:[#allocation6 + $0xe]]  ;;  %v739_v43 = vsel %vm2472_vm12, %v738_v34, %v688_v12  ;;  %v741_v44 = vstv %s2427_s4  ;;  %s1284_s4 = smov [#allocation11]  }
 0x22c   :  { %s2460_s3 = sld [smem:[#allocation6 + $0x1e]]  ;;  %v744_v30 = vstv %s2434_s6  ;;  %v742_v55 = vsel %vm2472_vm12, %v741_v44, %v691_v13  ;;  %s902_s6 = sshll.u32 %s1284_s4, 4  ;;  %s903_s6 = int_to_ptr.vmem [resolvable:$true] %s902_s6 }
 0x22d   :  { %v672_v57 = vstv %s3033_s26  ;;  %s2466_s24 = sld [smem:[#allocation6 + $0x2e]]  ;;  %vm2559_vm13 = vcmp.ge.f32.partialorder %v1582_v6, %v744_v30  ;;  %p1236_p2 = scmp.lt.s32.totalorder %s903_s6, %s903_s6 }
 0x22e   :  { %v681_v60 = vstv %s3034_s18  ;;  %s2476_s10 = sld [smem:[#allocation6 + $0x3e]]  ;;  %v673_v5 = vsel %vm2407_vm11, %v672_v57, %v622_v26  ;;  %v729_v26 = vstv %s2390_s9  ;;  %v746_v45 = vsel %vm2559_vm13, 1, %v1283_v28 }
 0x22f   :  { %s2485_s8 = sld [smem:[#allocation6 + $0x4e]]  ;;  %v682_v10 = vsel %vm2407_vm11, %v681_v60, %v631_v33  ;;  %v715_v33 = vsel %vm2472_vm12, %v714_v21, %v664_v54  ;;  %v730_v39 = vsel %vm2472_vm12, %v729_v26, %v679_v8  ;;  %v750_v46 = vstv %s2442_s17 }
 0x230   :  { %v684_v61 = vstv %s3035_s21  ;;  %s2494_s0 = sld [smem:[#allocation6 + $0x5e]]  ;;  %v733_v40 = vsel %vm2472_vm12, %v732_v27, %v682_v10  ;;  %v747_v56 = vadd.s32 %v746_v45, %v696_v14  ;;  %v748_v57 = vsel %vm2559_vm13, %v744_v30, %v697_v15 }
 0x231   :  { %v685_v11 = vsel %vm2407_vm11, %v684_v61, %v634_v37  ;;  %s2504_s12 = sld [smem:[#allocation6 + $0x6e]]  ;;  %v724_v37 = vsel %vm2472_vm12, %v723_v24, %v673_v5  ;;  %v753_v47 = vstv %s2451_s20  ;;  %v751_v58 = vsel %vm2559_vm13, %v750_v46, %v700_v16 }
 0x232   :  { %s2512_s23 = sld [smem:[#allocation6 + $0x7e]]  ;;  %v736_v41 = vsel %vm2472_vm12, %v735_v29, %v685_v11  ;;  %v756_v48 = vstv %s2460_s3  ;;  %v754_v59 = vsel %vm2559_vm13, %v753_v47, %v703_v17  ;;  %s1231_s3 = scalar_lea.vmem %s903_s6, 128 }
 0x233   :  { %s2519_s22 = sld [smem:[#allocation6 + $0x8e]]  ;;  %v759_v49 = vstv %s2466_s24  ;;  %v757_v60 = vsel %vm2559_vm13, %v756_v48, %v706_v18  ;;  %p1232_p1 = scmp.ne.s32.totalorder %s903_s6, %s1231_s3 }
 0x234   :  { %s2525_s13 = sld [smem:[#allocation6 + $0x9e]]  ;;  %v762_v50 = vstv %s2476_s10  ;;  %v760_v61 = vsel %vm2559_vm13, %v759_v49, %v709_v31  ;;  %p1237_p3 = scmp.lt.s32.totalorder %s1231_s3, %s1231_s3 }
 0x235   :  { %s2531_s29 = sld [smem:[#allocation6 + $0xae]]  ;;  %v765_v51 = vstv %s2485_s8  ;;  %v763_v62 = vsel %vm2559_vm13, %v762_v50, %v712_v32 }
 0x236   :  { %s2540_s25 = sld [smem:[#allocation6 + $0xbe]]  ;;  %v768_v52 = vstv %s2494_s0  ;;  %v766_v63 = vsel %vm2559_vm13, %v765_v51, %v715_v33  ;;  %p1238_p4 = por %p1237_p3, %p1236_p2 }
 0x237   :  { %s2550_s5 = sld [smem:[#allocation6 + $0xce]]  ;;  %v771_v53 = vstv %s2504_s12  ;;  %v769_v0 = vsel %vm2559_vm13, %v768_v52, %v718_v35 }
 0x238   :  { %s2563_s14 = sld [smem:[#allocation6 + $0xde]]  ;;  %v774_v54 = vstv %s2512_s23  ;;  %v772_v1 = vsel %vm2559_vm13, %v771_v53, %v721_v36  ;;  %p1239_p5 = pnand %p1238_p4, %p1232_p1 }
 0x239   :  { %s2572_s11 = sld [smem:[#allocation3 + $0xf]]  ;;  %v775_v2 = vsel %vm2559_vm13, %v774_v54, %v724_v37  ;;  %v777_v3 = vstv %s2519_s22 }
 0x23a   :  { %s2578_s27 = sld [smem:[#allocation4 + $0xf]]  ;;  %v780_v4 = vstv %s2525_s13  ;;  %v778_v20 = vsel %vm2559_vm13, %v777_v3, %v727_v38 }
 0x23b   :  { %s2584_s30 = sld [smem:[#allocation6 + $0xf]]  ;;  %v783_v5 = vstv %s2531_s29 }
 0x23c   :  { %s2592_s19 = sld [smem:[#allocation6 + $0x1f]]  ;;  %v786_v8 = vstv %s2540_s25  ;;  %v784_v21 = vsel %vm2559_vm13, %v783_v5, %v733_v40 }
 0x23d   :  { %s2602_s16 = sld [smem:[#allocation6 + $0x2f]]  ;;  %v789_v9 = vstv %s2550_s5  ;;  %v787_v23 = vsel %vm2559_vm13, %v786_v8, %v736_v41 }
 0x23e   :  { %s2612_s9 = sld [smem:[#allocation6 + $0x3f]]  ;;  %v792_v12 = vstv %s2563_s14 }
 0x23f   :  { %v795_v7 = vstv %s2572_s11  ;;  %s2618_s1 = sld [smem:[#allocation6 + $0x4f]]  ;;  %v793_v26 = vsel %vm2559_vm13, %v792_v12, %v742_v55 }
 0x240   :  { %vm2623_vm14 = vcmp.ge.f32.partialorder %v1582_v6, %v795_v7  ;;  %v801_v11 = vstv %s2578_s27  ;;  %s2628_s2 = sld [smem:[#allocation6 + $0x5f]] }
 0x241   :  { %v797_v13 = vsel %vm2623_vm14, 1, %v1283_v28  ;;  %v799_v14 = vsel %vm2623_vm14, %v795_v7, %v748_v57  ;;  %v802_v15 = vsel %vm2623_vm14, %v801_v11, %v751_v58  ;;  %s2638_s15 = sld [smem:[#allocation6 + $0x6f]]  ;;  %v804_v17 = vstv %s2584_s30 }
 0x242   :  { %v798_v16 = vadd.s32 %v797_v13, %v747_v56  ;;  %v807_v18 = vstv %s2592_s19  ;;  %s2642_s7 = sld [smem:[#allocation6 + $0x7f]]  ;;  %v845_v19 = vsub.f32 %v1582_v6, %v799_v14  ;;  %v781_v28 = vsel %vm2559_vm13, %v780_v4, %v730_v39 }
 0x243   :  { %v810_v22 = vstv %s2602_s16  ;;  %s2652_s28 = sld [smem:[#allocation6 + $0x8f]]  ;;  %v790_v6 = vsel %vm2559_vm13, %v789_v9, %v739_v43  ;;  %v805_v27 = vsel %vm2623_vm14, %v804_v17, %v754_v59  ;;  %v808_v29 = vsel %vm2623_vm14, %v807_v18, %v757_v60 }
 0x244   :  { %v813_v24 = vstv %s2612_s9  ;;  %s2659_s26 = sld [smem:[#allocation6 + $0x9f]]  ;;  %v846_v25 = vmul.f32 %v845_v19, %v802_v15  ;;  %883 = vst [vmem:[#allocation11] sm:$0xff] %v798_v16  ;;  %v811_v31 = vsel %vm2623_vm14, %v810_v22, %v760_v61 }
 0x245   :  { %v816_v30 = vstv %s2618_s1  ;;  %s2668_s18 = sld [smem:[#allocation6 + $0xaf]]  ;;  %v814_v35 = vsel %vm2623_vm14, %v813_v24, %v763_v62 }
 0x246   :  { %v819_v32 = vstv %s2628_s2  ;;  %s2673_s17 = sld [smem:[#allocation6 + $0xbf]]  ;;  %v847_v33 = vsub.f32 1.0, %v846_v25  ;;  %v848_v34 = vmul.f32 %v846_v25, %v846_v25  ;;  %v817_v36 = vsel %vm2623_vm14, %v816_v30, %v766_v63 }
 0x247   :  { %v820_v37 = vsel %vm2623_vm14, %v819_v32, %v769_v0  ;;  %v822_v38 = vstv %s2638_s15  ;;  %s2682_s21 = sld [smem:[#allocation6 + $0xcf]] }
 0x248   :  { %v823_v39 = vsel %vm2623_vm14, %v822_v38, %v772_v1  ;;  %v825_v40 = vstv %s2642_s7  ;;  %s2687_s20 = sld [smem:[#allocation6 + $0xdf]]  ;;  %v849_v41 = vmul.f32 %v847_v33, %v847_v33  ;;  %v850_v42 = vmul.f32 %v848_v34, %v846_v25 }
 0x249   :  { %v826_v43 = vsel %vm2623_vm14, %v825_v40, %v775_v2  ;;  %v828_v44 = vstv %s2652_s28  ;;  %v853_v45 = vmul.f32 %v848_v34, %v847_v33  ;;  %v854_v46 = vmul.f32 %v847_v33, %v846_v25 }
 0x24a   :  { %1242 = shalt.err (!%p1239_p5)
}
 0x24b   :  { %s3042_s8 = sld [smem:[#allocation112_spill]]  ;;  %v829_v47 = vsel %vm2623_vm14, %v828_v44, %v778_v20  ;;  %v831_v48 = vstv %s2659_s26  ;;  %v851_v49 = vmul.f32 %v849_v41, %v847_v33  ;;  %v852_v50 = vmul.f32 %v849_v41, %v846_v25  ;;  %s1285_s0 = smov [#allocation10]  }
 0x24c   :  { %v832_v51 = vsel %vm2623_vm14, %v831_v48, %v781_v28  ;;  %v834_v52 = vstv %s2668_s18  ;;  %v858_v53 = vmul.f32 %v853_v45, %v817_v36  ;;  %v860_v54 = vmul.f32 %v850_v42, %v823_v39  ;;  %s889_s12 = sshll.u32 %s1285_s0, 4  ;;  %s890_s12 = int_to_ptr.vmem [resolvable:$true] %s889_s12 }
 0x24d   :  { %v835_v55 = vsel %vm2623_vm14, %v834_v52, %v784_v21  ;;  %v837_v56 = vstv %s2673_s17  ;;  %v855_v57 = vmul.f32 %v851_v49, %v805_v27  ;;  %v856_v58 = vmul.f32 %v852_v50, %v811_v31  ;;  %s1251_s23 = scalar_lea.vmem %s890_s12, 512  ;;  %p1256_p7 = scmp.lt.s32.totalorder %s890_s12, %s890_s12 }
 0x24e   :  { %v838_v59 = vsel %vm2623_vm14, %v837_v56, %v787_v23  ;;  %v840_v60 = vstv %s2682_s21  ;;  %v863_v61 = vmul.f32 %v849_v41, %v829_v47  ;;  %v864_v62 = vmul.f32 %v854_v46, %v835_v55  ;;  %p1252_p6 = scmp.ne.s32.totalorder %s890_s12, %s1251_s23  ;;  %p1257_p8 = scmp.lt.s32.totalorder %s1251_s23, %s1251_s23 }
 0x24f   :  { %v841_v63 = vsel %vm2623_vm14, %v840_v60, %v790_v6  ;;  %v843_v0 = vstv %s2687_s20  ;;  %v857_v1 = vadd.f32 %v856_v58, %v855_v57  ;;  %v869_v2 = vmul.f32 %v851_v49, %v808_v29 }
 0x250   :  { %v844_v3 = vsel %vm2623_vm14, %v843_v0, %v793_v26  ;;  %v865_v4 = vadd.f32 %v864_v62, %v863_v61  ;;  %v866_v5 = vmul.f32 %v848_v34, %v841_v63  ;;  %v870_v7 = vmul.f32 %v852_v50, %v814_v35  ;;  %p1258_p9 = por %p1257_p8, %p1256_p7 }
 0x251   :  { %905 = dma.vmem_to_hbm [thread:$0]  %s903_s6, 128, %s3042_s8, [#allocation12]   ;;  %v859_v8 = vadd.f32 %v858_v53, %v857_v1  ;;  %v872_v9 = vmul.f32 %v853_v45, %v820_v37  ;;  %v874_v11 = vmul.f32 %v850_v42, %v826_v43  ;;  %v877_v12 = vmul.f32 %v849_v41, %v832_v51 }
 0x252   :  { %v867_v13 = vadd.f32 %v866_v5, %v865_v4  ;;  %v871_v14 = vadd.f32 %v870_v7, %v869_v2  ;;  %v878_v15 = vmul.f32 %v854_v46, %v838_v59  ;;  %v880_v16 = vmul.f32 %v848_v34, %v844_v3  ;;  %p1259_p10 = pnand %p1258_p9, %p1252_p6 }
 0x253   :  { %v861_v17 = vadd.f32 %v860_v54, %v859_v8 }
 0x254   :  { %868 = vst [vmem:[#allocation10 + $0x10] sm:$0xff] %v867_v13  ;;  %v873_v18 = vadd.f32 %v872_v9, %v871_v14  ;;  %v879_v19 = vadd.f32 %v878_v15, %v877_v12 }
 0x255   :  { %862 = vst [vmem:[#allocation10] sm:$0xff] %v861_v17 }
 0x256   :  { %v875_v10 = vadd.f32 %v874_v11, %v873_v18  ;;  %v881_v20 = vadd.f32 %v880_v16, %v879_v19 }
 0x258   :  { %876 = vst [vmem:[#allocation10 + $0x8] sm:$0xff] %v875_v10  ;;  %882 = vst [vmem:[#allocation10 + $0x18] sm:$0xff] %v881_v20 }
 0x259   :  { %1262 = shalt.err (!%p1259_p10)
}
 0x25a   :  { %s1286_s22 = smov 128   ;;  %s1287_s13 = smov 8  }
 0x25b   :  { %s3043_s5 = sld [smem:[#allocation111_spill]] }
 0x261   :  { %895 = dma.vmem_to_hbm [thread:$0]  %s890_s12, 512, %s3043_s5, [#allocation9], %s1286_s22, %s1286_s22, %s1287_s13  }
 0x262   :  { %1275 = dma.done.wait [#allocation9], 512  }
 0x263   :  { %1276 = vsyncadd [#allocation9], 4294966784 }
 0x264   :  { %1277 = dma.done.wait [#allocation12], 128  }
 0x265   :  { %1278 = vsyncadd [#allocation12], 4294967168 }
 0x266   :  { %912 = vsyncpa [#allocation8], 1 }
 0x267   :  { %913 = vsyncpa [#allocation9], 1 }
 0x268   :  { %914 = vsyncpa [#allocation12], 1 }

</bundles_post_ra>
